<compile_context>
chip_gen: v5e
topology: v5e:2x2
jax: 0.10.0
libtpu: 0.0.40
codegen_flags: <defaults>
</compile_context>

<pallas_src>
import functools

import jax
import jax.numpy as jnp
from jax.experimental import pallas as pl
from jax.experimental.pallas import tpu as pltpu


def _mha_t_branch_kernel(x_ref,
                         wq_ref, bq_ref, wk_ref, bk_ref, wv_ref, bv_ref,
                         ln1_ref, ln2_ref, ln3_ref,
                         wc_ref, bc_ref, alpha_ref,
                         out_ref):
    eps = 1e-5
    TB, T, C2 = x_ref.shape
    C = C2 // 2
    H = wq_ref.shape[-1] // 8
    TBT = TB * T
    scale = 1.0 / (float(H) ** 0.5)

    x = x_ref[...]                                   # (TB, T, 2C)
    real0 = x[:, :, :C].reshape(TBT, C)              # original real (residual)
    imag0 = x[:, :, C:].reshape(TBT, C)              # original imag (residual)

    def layer_norm(y, gb_ref):                       # y: (rows, D); gb: (2, D)
        g = gb_ref[0:1, :]
        b = gb_ref[1:2, :]
        mu = jnp.mean(y, axis=-1, keepdims=True)
        var = jnp.mean(jnp.square(y - mu), axis=-1, keepdims=True)
        return (y - mu) * jax.lax.rsqrt(var + eps) * g + b

    # layernorm1 over channels (real / imag normalized independently with
    # shared gamma/beta) == LayerNorm(in_channel) on x.transpose(2, 3).
    real = layer_norm(real0, ln1_ref)                # (TBT, C)
    imag = layer_norm(imag0, ln1_ref)

    # Fused q/k/v projections for all 8 heads and both (real, imag) sources:
    # 3 matmuls of (2*TBT, C) @ (C, 8H) instead of 24 tiny per-head matmuls.
    xcat = jnp.concatenate([real, imag], axis=0)     # (2*TBT, C)
    q_cat = jnp.dot(xcat, wq_ref[...], preferred_element_type=jnp.float32) + bq_ref[...]
    k_cat = jnp.dot(xcat, wk_ref[...], preferred_element_type=jnp.float32) + bk_ref[...]
    v_cat = jnp.dot(xcat, wv_ref[...], preferred_element_type=jnp.float32) + bv_ref[...]

    def split(cat):                                  # -> (from_real, from_imag)
        return (cat[:TBT].reshape(TB, T, 8 * H),
                cat[TBT:].reshape(TB, T, 8 * H))

    q_r, q_i = split(q_cat)
    k_r, k_i = split(k_cat)
    v_r, v_i = split(v_cat)

    # Per-head (q, k, v) source pattern of the complex attention:
    #   A(r,r,r) B(r,i,i) C(i,r,i) D(i,i,r) E(r,r,i) F(r,i,r) G(i,r,r) H(i,i,i)
    q_is_real = (True, True, False, False, True, True, False, False)
    k_is_real = (True, False, True, False, True, False, True, False)
    v_is_real = (True, False, False, True, False, True, True, False)

    real_att = None   # = A - B - C - D
    imag_att = None   # = E + F + G - H
    for h in range(8):
        sl = slice(h * H, (h + 1) * H)
        q_h = (q_r if q_is_real[h] else q_i)[:, :, sl]
        k_h = (k_r if k_is_real[h] else k_i)[:, :, sl]
        v_h = (v_r if v_is_real[h] else v_i)[:, :, sl]
        # Batched attention over the TB rows; dot_general contracts the last
        # dims directly (no .T -> no XLU transpose per head).
        e = jnp.einsum('bqc,bkc->bqk', q_h, k_h,
                       preferred_element_type=jnp.float32) * scale
        e = e - jnp.max(e, axis=-1, keepdims=True)
        p = jnp.exp(e)
        p = p * pl.reciprocal(jnp.sum(p, axis=-1, keepdims=True), approx=True)
        o_h = jnp.einsum('bqk,bkc->bqc', p, v_h,
                         preferred_element_type=jnp.float32)
        # Running sign accumulation (keeps live ranges short).
        if h == 0:
            real_att = o_h
        elif h < 4:
            real_att = real_att - o_h
        elif h == 4:
            imag_att = o_h
        elif h < 7:
            imag_att = imag_att + o_h
        else:
            imag_att = imag_att - o_h

    # layernorm2 over hidden (real / imag independently, shared affine)
    ra = layer_norm(real_att.reshape(TBT, H), ln2_ref)
    ia = layer_norm(imag_att.reshape(TBT, H), ln2_ref)

    # Complex_Linear(hidden -> in_channel) folded into one matmul:
    #   [ra | ia] @ [[Wr, Wi], [-Wi, Wr]] + [br - bi | br + bi]
    cat = jnp.concatenate([ra, ia], axis=-1)                       # (TBT, 2H)
    oc = jnp.dot(cat, wc_ref[...], preferred_element_type=jnp.float32) + bc_ref[...]
    out_r = oc[:, :C]
    out_i = oc[:, C:]

    # layernorm3 over channels
    out_r = layer_norm(out_r, ln3_ref)
    out_i = layer_norm(out_i, ln3_ref)

    # PReLU (single shared parameter read from SMEM)
    alpha = alpha_ref[0]
    out_r = jnp.where(out_r >= 0.0, out_r, alpha * out_r)
    out_i = jnp.where(out_i >= 0.0, out_i, alpha * out_i)

    # TODO(synk): nn.Dropout(p=0.1) is treated as identity (inference mode).

    # residual with the original (pre-layernorm) input, single packed store
    out_r = out_r + real0
    out_i = out_i + imag0
    out_ref[...] = jnp.concatenate(
        [out_r.reshape(TB, T, C), out_i.reshape(TB, T, C)], axis=-1)


def multihead_attention_t_branch(inputs, params):
    """inputs: (N, C, F, T, 2) float32. Returns the same shape."""
    N, C, Fdim, T, ri = inputs.shape
    assert ri == 2
    B = N * Fdim
    C2 = 2 * C
    H = params["wq"].shape[-1] // 8

    # (N, C, F, T, 2) -> (N, F, T, 2, C) -> (B, T, 2C): real | imag on lanes.
    x = jnp.transpose(inputs, (0, 2, 3, 4, 1)).reshape(B, T, C2)

    # Rows per grid step: amortize the ~0.35us/step pipeline overhead; keep the
    # double-buffered in/out blocks plus the fused q/k/v and score
    # intermediates well inside v7x's 64 MiB VMEM (v5e/v6e have more headroom).
    row_bytes = 4 * T * (2 * C2 + 6 * 8 * H + 8 * T)
    TB = int(max(1, min(B, 256, (16 * 1024 * 1024) // row_bytes)))
    grid = (pl.cdiv(B, TB),)

    row_spec = pl.BlockSpec((TB, T, C2), lambda b: (b, 0, 0))
    full2 = lambda a: pl.BlockSpec(a.shape, lambda b: (0, 0))

    out = pl.pallas_call(
        _mha_t_branch_kernel,
        grid=grid,
        in_specs=[
            row_spec,                                    # x (real|imag packed)
            full2(params["wq"]), full2(params["bq"]),    # fused 8-head query
            full2(params["wk"]), full2(params["bk"]),    # fused 8-head key
            full2(params["wv"]), full2(params["bv"]),    # fused 8-head value
            full2(params["ln1"]), full2(params["ln2"]), full2(params["ln3"]),
            full2(params["wc"]), full2(params["bc"]),    # fused Complex_Linear
            pl.BlockSpec(memory_space=pltpu.MemorySpace.SMEM),   # prelu alpha
        ],
        out_specs=row_spec,
        out_shape=jax.ShapeDtypeStruct((B, T, C2), jnp.float32),
        compiler_params=pltpu.CompilerParams(
            dimension_semantics=("parallel",),
            vmem_limit_bytes=48 * 1024 * 1024),
    )(x, params["wq"], params["bq"], params["wk"], params["bk"],
      params["wv"], params["bv"], params["ln1"], params["ln2"], params["ln3"],
      params["wc"], params["bc"], params["alpha"])

    # (B, T, 2C) -> (N, F, T, 2, C) -> (N, C, F, T, 2)
    out = out.reshape(N, Fdim, T, ri, C)
    return jnp.transpose(out, (0, 4, 1, 2, 3))


def init_params(key, in_channel, hidden_channel):
    C, H = in_channel, hidden_channel
    ks = jax.random.split(key, 10)
    lim_c = 1.0 / (C ** 0.5)
    lim_h = 1.0 / (H ** 0.5)
    u = lambda k, shape, lim: jax.random.uniform(k, shape, jnp.float32, -lim, lim)
    return {
        # 8 T_att heads; q/k/v weights stored transposed for x @ W and packed
        # head-major along the output dim: w[:, h*H:(h+1)*H] is head h.
        "wq": u(ks[0], (C, 8 * H), lim_c), "bq": u(ks[1], (1, 8 * H), lim_c),
        "wk": u(ks[2], (C, 8 * H), lim_c), "bk": u(ks[3], (1, 8 * H), lim_c),
        "wv": u(ks[4], (C, 8 * H), lim_c), "bv": u(ks[5], (1, 8 * H), lim_c),
        # layernorms: row 0 = gamma, row 1 = beta
        "ln1": jnp.stack([jnp.ones((C,), jnp.float32), jnp.zeros((C,), jnp.float32)]),
        "ln2": jnp.stack([jnp.ones((H,), jnp.float32), jnp.zeros((H,), jnp.float32)]),
        "ln3": jnp.stack([jnp.ones((C,), jnp.float32), jnp.zeros((C,), jnp.float32)]),
        # Complex_Linear(hidden -> in_channel): real/imag linears (x @ W + b)
        "cwr": u(ks[6], (H, C), lim_h), "cwi": u(ks[7], (H, C), lim_h),
        "cbr": u(ks[8], (C,), lim_h),  "cbi": u(ks[9], (C,), lim_h),
        # PReLU default init (single shared parameter)
        "alpha": jnp.full((1,), 0.25, jnp.float32),
    }


def pack_params(p):
    """Fold Complex_Linear's 4 matmuls into one (2H, 2C) matmul:
       out_r = ra@Wr - ia@Wi + (br - bi); out_i = ra@Wi + ia@Wr + (br + bi)."""
    wr, wi = p["cwr"], p["cwi"]
    br, bi = p["cbr"], p["cbi"]
    wc = jnp.concatenate(
        [jnp.concatenate([wr, wi], axis=1),
         jnp.concatenate([-wi, wr], axis=1)], axis=0)          # (2H, 2C)
    bc = jnp.concatenate([br - bi, br + bi])[None, :]          # (1, 2C)
    packed = {k: v for k, v in p.items()
              if k not in ("cwr", "cwi", "cbr", "cbi")}
    packed["wc"] = wc
    packed["bc"] = bc
    return packed


if __name__ == "__main__":
    N, C, Fdim, T, ri = 2, 4, 4, 8, 2     # in_channel = 4
    hidden_channel = 8

    key = jax.random.PRNGKey(0)
    k_in, k_par = jax.random.split(key)
    inputs = jax.random.normal(k_in, (N, C, Fdim, T, ri), jnp.float32)
    params = pack_params(init_params(k_par, C, hidden_channel))

    fn = jax.jit(functools.partial(multihead_attention_t_branch, params=params))
    out = jax.block_until_ready(fn(inputs))
    assert out.shape == (N, C, Fdim, T, ri)
    assert bool(jnp.all(jnp.isfinite(out)))
    print("KERNEL_OK")
</pallas_src>

<mosaic_0001>
module attributes {stable_mosaic.version = 11 : i64} {
  func.func @_mha_t_branch_kernel(%arg0: i32, %arg1: memref<8x8x8xf32, #tpu.memory_space<vmem>>, %arg2: memref<4x64xf32, #tpu.memory_space<vmem>>, %arg3: memref<1x64xf32, #tpu.memory_space<vmem>>, %arg4: memref<4x64xf32, #tpu.memory_space<vmem>>, %arg5: memref<1x64xf32, #tpu.memory_space<vmem>>, %arg6: memref<4x64xf32, #tpu.memory_space<vmem>>, %arg7: memref<1x64xf32, #tpu.memory_space<vmem>>, %arg8: memref<2x4xf32, #tpu.memory_space<vmem>>, %arg9: memref<2x8xf32, #tpu.memory_space<vmem>>, %arg10: memref<2x4xf32, #tpu.memory_space<vmem>>, %arg11: memref<16x8xf32, #tpu.memory_space<vmem>>, %arg12: memref<1x8xf32, #tpu.memory_space<vmem>>, %arg13: memref<1xf32, #tpu.memory_space<smem>>, %arg14: memref<8x8x8xf32, #tpu.memory_space<vmem>>) attributes {dimension_semantics = [#tpu.dimension_semantics<parallel>], iteration_bounds = array<i64: 1>, scalar_prefetch = 0 : i64, scratch_operands = 0 : i64, tpu.core_type = #tpu.core_type<tc>, window_params = [{transform_indices = @transform_0, window_bounds = array<i64: 8, 8, 8>}, {pipeline_mode = #tpu.pipeline_mode<synchronous>, transform_indices = @transform_1, window_bounds = array<i64: 4, 64>}, {pipeline_mode = #tpu.pipeline_mode<synchronous>, transform_indices = @transform_2, window_bounds = array<i64: 1, 64>}, {pipeline_mode = #tpu.pipeline_mode<synchronous>, transform_indices = @transform_3, window_bounds = array<i64: 4, 64>}, {pipeline_mode = #tpu.pipeline_mode<synchronous>, transform_indices = @transform_4, window_bounds = array<i64: 1, 64>}, {pipeline_mode = #tpu.pipeline_mode<synchronous>, transform_indices = @transform_5, window_bounds = array<i64: 4, 64>}, {pipeline_mode = #tpu.pipeline_mode<synchronous>, transform_indices = @transform_6, window_bounds = array<i64: 1, 64>}, {pipeline_mode = #tpu.pipeline_mode<synchronous>, transform_indices = @transform_7, window_bounds = array<i64: 2, 4>}, {pipeline_mode = #tpu.pipeline_mode<synchronous>, transform_indices = @transform_8, window_bounds = array<i64: 2, 8>}, {pipeline_mode = #tpu.pipeline_mode<synchronous>, transform_indices = @transform_9, window_bounds = array<i64: 2, 4>}, {pipeline_mode = #tpu.pipeline_mode<synchronous>, transform_indices = @transform_10, window_bounds = array<i64: 16, 8>}, {pipeline_mode = #tpu.pipeline_mode<synchronous>, transform_indices = @transform_11, window_bounds = array<i64: 1, 8>}, {transform_indices = @transform_12, window_bounds = array<i64: 1>}, {transform_indices = @transform_13, window_bounds = array<i64: 8, 8, 8>}]} {
    %c0 = arith.constant 0 : index
    %c0_0 = arith.constant 0 : index
    %c0_1 = arith.constant 0 : index
    %0 = vector.load %arg1[%c0, %c0_0, %c0_1] : memref<8x8x8xf32, #tpu.memory_space<vmem>>, vector<8x8x8xf32>
    %1 = vector.extract_strided_slice %0 {offsets = [0, 0, 0], sizes = [8, 8, 4], strides = [1, 1, 1]} : vector<8x8x8xf32> to vector<8x8x4xf32>
    %2 = vector.shape_cast %1 : vector<8x8x4xf32> to vector<64x4xf32>
    %3 = vector.extract_strided_slice %0 {offsets = [0, 0, 4], sizes = [8, 8, 4], strides = [1, 1, 1]} : vector<8x8x8xf32> to vector<8x8x4xf32>
    %4 = vector.shape_cast %3 : vector<8x8x4xf32> to vector<64x4xf32>
    %c0_2 = arith.constant 0 : index
    %c0_3 = arith.constant 0 : index
    %5 = vector.load %arg8[%c0_2, %c0_3] : memref<2x4xf32, #tpu.memory_space<vmem>>, vector<1x4xf32>
    %c1 = arith.constant 1 : index
    %c0_4 = arith.constant 0 : index
    %6 = vector.load %arg8[%c1, %c0_4] : memref<2x4xf32, #tpu.memory_space<vmem>>, vector<1x4xf32>
    %cst = arith.constant dense<0.000000e+00> : vector<64xf32>
    %7 = vector.multi_reduction <add>, %2, %cst [1] : vector<64x4xf32> to vector<64xf32>
    %8 = vector.shape_cast %7 : vector<64xf32> to vector<64x1xf32>
    %cst_5 = arith.constant 4.000000e+00 : f32
    %9 = vector.broadcast %cst_5 : f32 to vector<64x1xf32>
    %10 = arith.divf %8, %9 : vector<64x1xf32>
    %11 = vector.broadcast %10 : vector<64x1xf32> to vector<64x4xf32>
    %12 = arith.subf %2, %11 : vector<64x4xf32>
    %13 = arith.mulf %12, %12 : vector<64x4xf32>
    %cst_6 = arith.constant dense<0.000000e+00> : vector<64xf32>
    %14 = vector.multi_reduction <add>, %13, %cst_6 [1] : vector<64x4xf32> to vector<64xf32>
    %15 = vector.shape_cast %14 : vector<64xf32> to vector<64x1xf32>
    %cst_7 = arith.constant 4.000000e+00 : f32
    %16 = vector.broadcast %cst_7 : f32 to vector<64x1xf32>
    %17 = arith.divf %15, %16 : vector<64x1xf32>
    %18 = vector.broadcast %10 : vector<64x1xf32> to vector<64x4xf32>
    %19 = arith.subf %2, %18 : vector<64x4xf32>
    %cst_8 = arith.constant 9.99999974E-6 : f32
    %20 = vector.broadcast %cst_8 : f32 to vector<64x1xf32>
    %21 = arith.addf %17, %20 : vector<64x1xf32>
    %22 = math.rsqrt %21 : vector<64x1xf32>
    %23 = vector.broadcast %22 : vector<64x1xf32> to vector<64x4xf32>
    %24 = arith.mulf %19, %23 : vector<64x4xf32>
    %25 = vector.broadcast %5 : vector<1x4xf32> to vector<64x4xf32>
    %26 = arith.mulf %24, %25 : vector<64x4xf32>
    %27 = vector.broadcast %6 : vector<1x4xf32> to vector<64x4xf32>
    %28 = arith.addf %26, %27 : vector<64x4xf32>
    %c0_9 = arith.constant 0 : index
    %c0_10 = arith.constant 0 : index
    %29 = vector.load %arg8[%c0_9, %c0_10] : memref<2x4xf32, #tpu.memory_space<vmem>>, vector<1x4xf32>
    %c1_11 = arith.constant 1 : index
    %c0_12 = arith.constant 0 : index
    %30 = vector.load %arg8[%c1_11, %c0_12] : memref<2x4xf32, #tpu.memory_space<vmem>>, vector<1x4xf32>
    %cst_13 = arith.constant dense<0.000000e+00> : vector<64xf32>
    %31 = vector.multi_reduction <add>, %4, %cst_13 [1] : vector<64x4xf32> to vector<64xf32>
    %32 = vector.shape_cast %31 : vector<64xf32> to vector<64x1xf32>
    %cst_14 = arith.constant 4.000000e+00 : f32
    %33 = vector.broadcast %cst_14 : f32 to vector<64x1xf32>
    %34 = arith.divf %32, %33 : vector<64x1xf32>
    %35 = vector.broadcast %34 : vector<64x1xf32> to vector<64x4xf32>
    %36 = arith.subf %4, %35 : vector<64x4xf32>
    %37 = arith.mulf %36, %36 : vector<64x4xf32>
    %cst_15 = arith.constant dense<0.000000e+00> : vector<64xf32>
    %38 = vector.multi_reduction <add>, %37, %cst_15 [1] : vector<64x4xf32> to vector<64xf32>
    %39 = vector.shape_cast %38 : vector<64xf32> to vector<64x1xf32>
    %cst_16 = arith.constant 4.000000e+00 : f32
    %40 = vector.broadcast %cst_16 : f32 to vector<64x1xf32>
    %41 = arith.divf %39, %40 : vector<64x1xf32>
    %42 = vector.broadcast %34 : vector<64x1xf32> to vector<64x4xf32>
    %43 = arith.subf %4, %42 : vector<64x4xf32>
    %cst_17 = arith.constant 9.99999974E-6 : f32
    %44 = vector.broadcast %cst_17 : f32 to vector<64x1xf32>
    %45 = arith.addf %41, %44 : vector<64x1xf32>
    %46 = math.rsqrt %45 : vector<64x1xf32>
    %47 = vector.broadcast %46 : vector<64x1xf32> to vector<64x4xf32>
    %48 = arith.mulf %43, %47 : vector<64x4xf32>
    %49 = vector.broadcast %29 : vector<1x4xf32> to vector<64x4xf32>
    %50 = arith.mulf %48, %49 : vector<64x4xf32>
    %51 = vector.broadcast %30 : vector<1x4xf32> to vector<64x4xf32>
    %52 = arith.addf %50, %51 : vector<64x4xf32>
    %53 = tpu.concatenate %28, %52 in 0 : vector<64x4xf32>, vector<64x4xf32> -> vector<128x4xf32>
    %c0_18 = arith.constant 0 : index
    %c0_19 = arith.constant 0 : index
    %54 = vector.load %arg2[%c0_18, %c0_19] : memref<4x64xf32, #tpu.memory_space<vmem>>, vector<4x64xf32>
    %cst_20 = arith.constant dense<0.000000e+00> : vector<128x64xf32>
    %55 = tpu.matmul %53, %54, %cst_20 {dimension_numbers = #tpu.dot_dimension_numbers<[1], [0], [0], [1], [0, 0, 1, 1], [], []>} : vector<128x4xf32>, vector<4x64xf32>, vector<128x64xf32> -> vector<128x64xf32>
    %c0_21 = arith.constant 0 : index
    %c0_22 = arith.constant 0 : index
    %56 = vector.load %arg3[%c0_21, %c0_22] : memref<1x64xf32, #tpu.memory_space<vmem>>, vector<1x64xf32>
    %57 = vector.broadcast %56 : vector<1x64xf32> to vector<128x64xf32>
    %58 = arith.addf %55, %57 : vector<128x64xf32>
    %c0_23 = arith.constant 0 : index
    %c0_24 = arith.constant 0 : index
    %59 = vector.load %arg4[%c0_23, %c0_24] : memref<4x64xf32, #tpu.memory_space<vmem>>, vector<4x64xf32>
    %cst_25 = arith.constant dense<0.000000e+00> : vector<128x64xf32>
    %60 = tpu.matmul %53, %59, %cst_25 {dimension_numbers = #tpu.dot_dimension_numbers<[1], [0], [0], [1], [0, 0, 1, 1], [], []>} : vector<128x4xf32>, vector<4x64xf32>, vector<128x64xf32> -> vector<128x64xf32>
    %c0_26 = arith.constant 0 : index
    %c0_27 = arith.constant 0 : index
    %61 = vector.load %arg5[%c0_26, %c0_27] : memref<1x64xf32, #tpu.memory_space<vmem>>, vector<1x64xf32>
    %62 = vector.broadcast %61 : vector<1x64xf32> to vector<128x64xf32>
    %63 = arith.addf %60, %62 : vector<128x64xf32>
    %c0_28 = arith.constant 0 : index
    %c0_29 = arith.constant 0 : index
    %64 = vector.load %arg6[%c0_28, %c0_29] : memref<4x64xf32, #tpu.memory_space<vmem>>, vector<4x64xf32>
    %cst_30 = arith.constant dense<0.000000e+00> : vector<128x64xf32>
    %65 = tpu.matmul %53, %64, %cst_30 {dimension_numbers = #tpu.dot_dimension_numbers<[1], [0], [0], [1], [0, 0, 1, 1], [], []>} : vector<128x4xf32>, vector<4x64xf32>, vector<128x64xf32> -> vector<128x64xf32>
    %c0_31 = arith.constant 0 : index
    %c0_32 = arith.constant 0 : index
    %66 = vector.load %arg7[%c0_31, %c0_32] : memref<1x64xf32, #tpu.memory_space<vmem>>, vector<1x64xf32>
    %67 = vector.broadcast %66 : vector<1x64xf32> to vector<128x64xf32>
    %68 = arith.addf %65, %67 : vector<128x64xf32>
    %69 = vector.extract_strided_slice %58 {offsets = [0, 0], sizes = [64, 64], strides = [1, 1]} : vector<128x64xf32> to vector<64x64xf32>
    %70 = vector.shape_cast %69 : vector<64x64xf32> to vector<8x8x64xf32>
    %71 = vector.extract_strided_slice %58 {offsets = [64, 0], sizes = [64, 64], strides = [1, 1]} : vector<128x64xf32> to vector<64x64xf32>
    %72 = vector.shape_cast %71 : vector<64x64xf32> to vector<8x8x64xf32>
    %73 = vector.extract_strided_slice %63 {offsets = [0, 0], sizes = [64, 64], strides = [1, 1]} : vector<128x64xf32> to vector<64x64xf32>
    %74 = vector.shape_cast %73 : vector<64x64xf32> to vector<8x8x64xf32>
    %75 = vector.extract_strided_slice %63 {offsets = [64, 0], sizes = [64, 64], strides = [1, 1]} : vector<128x64xf32> to vector<64x64xf32>
    %76 = vector.shape_cast %75 : vector<64x64xf32> to vector<8x8x64xf32>
    %77 = vector.extract_strided_slice %68 {offsets = [0, 0], sizes = [64, 64], strides = [1, 1]} : vector<128x64xf32> to vector<64x64xf32>
    %78 = vector.shape_cast %77 : vector<64x64xf32> to vector<8x8x64xf32>
    %79 = vector.extract_strided_slice %68 {offsets = [64, 0], sizes = [64, 64], strides = [1, 1]} : vector<128x64xf32> to vector<64x64xf32>
    %80 = vector.shape_cast %79 : vector<64x64xf32> to vector<8x8x64xf32>
    %81 = vector.extract_strided_slice %70 {offsets = [0, 0, 0], sizes = [8, 8, 8], strides = [1, 1, 1]} : vector<8x8x64xf32> to vector<8x8x8xf32>
    %82 = vector.extract_strided_slice %74 {offsets = [0, 0, 0], sizes = [8, 8, 8], strides = [1, 1, 1]} : vector<8x8x64xf32> to vector<8x8x8xf32>
    %83 = vector.extract_strided_slice %78 {offsets = [0, 0, 0], sizes = [8, 8, 8], strides = [1, 1, 1]} : vector<8x8x64xf32> to vector<8x8x8xf32>
    "tpu.trace_start"() <{level = 10 : i32, message = "bqc,bkc->bqk"}> : () -> ()
    %cst_33 = arith.constant dense<0.000000e+00> : vector<8x8x8xf32>
    %84 = tpu.matmul %81, %82, %cst_33 {dimension_numbers = #tpu.dot_dimension_numbers<[2], [2], [1], [1], [0, 0, 0, 1, 1, 1], [0], [0]>} : vector<8x8x8xf32>, vector<8x8x8xf32>, vector<8x8x8xf32> -> vector<8x8x8xf32>
    "tpu.trace_stop"() : () -> ()
    %cst_34 = arith.constant 0.353553385 : f32
    %85 = vector.broadcast %cst_34 : f32 to vector<8x8x8xf32>
    %86 = arith.mulf %84, %85 : vector<8x8x8xf32>
    %cst_35 = arith.constant dense<0xFF800000> : vector<8x8xf32>
    %87 = vector.multi_reduction <maximumf>, %86, %cst_35 [2] : vector<8x8x8xf32> to vector<8x8xf32>
    %88 = vector.shape_cast %87 : vector<8x8xf32> to vector<8x8x1xf32>
    %89 = vector.broadcast %88 : vector<8x8x1xf32> to vector<8x8x8xf32>
    %90 = arith.subf %86, %89 : vector<8x8x8xf32>
    %91 = math.exp %90 : vector<8x8x8xf32>
    %cst_36 = arith.constant dense<0.000000e+00> : vector<8x8xf32>
    %92 = vector.multi_reduction <add>, %91, %cst_36 [2] : vector<8x8x8xf32> to vector<8x8xf32>
    %93 = vector.shape_cast %92 : vector<8x8xf32> to vector<8x8x1xf32>
    %94 = tpu.reciprocal %93 {approx = true} : vector<8x8x1xf32> -> vector<8x8x1xf32>
    %95 = vector.broadcast %94 : vector<8x8x1xf32> to vector<8x8x8xf32>
    %96 = arith.mulf %91, %95 : vector<8x8x8xf32>
    "tpu.trace_start"() <{level = 10 : i32, message = "bqk,bkc->bqc"}> : () -> ()
    %cst_37 = arith.constant dense<0.000000e+00> : vector<8x8x8xf32>
    %97 = tpu.matmul %96, %83, %cst_37 {dimension_numbers = #tpu.dot_dimension_numbers<[2], [1], [1], [2], [0, 0, 0, 1, 1, 2], [0], [0]>} : vector<8x8x8xf32>, vector<8x8x8xf32>, vector<8x8x8xf32> -> vector<8x8x8xf32>
    "tpu.trace_stop"() : () -> ()
    %98 = vector.extract_strided_slice %70 {offsets = [0, 0, 8], sizes = [8, 8, 8], strides = [1, 1, 1]} : vector<8x8x64xf32> to vector<8x8x8xf32>
    %99 = vector.extract_strided_slice %76 {offsets = [0, 0, 8], sizes = [8, 8, 8], strides = [1, 1, 1]} : vector<8x8x64xf32> to vector<8x8x8xf32>
    %100 = vector.extract_strided_slice %80 {offsets = [0, 0, 8], sizes = [8, 8, 8], strides = [1, 1, 1]} : vector<8x8x64xf32> to vector<8x8x8xf32>
    "tpu.trace_start"() <{level = 10 : i32, message = "bqc,bkc->bqk"}> : () -> ()
    %cst_38 = arith.constant dense<0.000000e+00> : vector<8x8x8xf32>
    %101 = tpu.matmul %98, %99, %cst_38 {dimension_numbers = #tpu.dot_dimension_numbers<[2], [2], [1], [1], [0, 0, 0, 1, 1, 1], [0], [0]>} : vector<8x8x8xf32>, vector<8x8x8xf32>, vector<8x8x8xf32> -> vector<8x8x8xf32>
    "tpu.trace_stop"() : () -> ()
    %cst_39 = arith.constant 0.353553385 : f32
    %102 = vector.broadcast %cst_39 : f32 to vector<8x8x8xf32>
    %103 = arith.mulf %101, %102 : vector<8x8x8xf32>
    %cst_40 = arith.constant dense<0xFF800000> : vector<8x8xf32>
    %104 = vector.multi_reduction <maximumf>, %103, %cst_40 [2] : vector<8x8x8xf32> to vector<8x8xf32>
    %105 = vector.shape_cast %104 : vector<8x8xf32> to vector<8x8x1xf32>
    %106 = vector.broadcast %105 : vector<8x8x1xf32> to vector<8x8x8xf32>
    %107 = arith.subf %103, %106 : vector<8x8x8xf32>
    %108 = math.exp %107 : vector<8x8x8xf32>
    %cst_41 = arith.constant dense<0.000000e+00> : vector<8x8xf32>
    %109 = vector.multi_reduction <add>, %108, %cst_41 [2] : vector<8x8x8xf32> to vector<8x8xf32>
    %110 = vector.shape_cast %109 : vector<8x8xf32> to vector<8x8x1xf32>
    %111 = tpu.reciprocal %110 {approx = true} : vector<8x8x1xf32> -> vector<8x8x1xf32>
    %112 = vector.broadcast %111 : vector<8x8x1xf32> to vector<8x8x8xf32>
    %113 = arith.mulf %108, %112 : vector<8x8x8xf32>
    "tpu.trace_start"() <{level = 10 : i32, message = "bqk,bkc->bqc"}> : () -> ()
    %cst_42 = arith.constant dense<0.000000e+00> : vector<8x8x8xf32>
    %114 = tpu.matmul %113, %100, %cst_42 {dimension_numbers = #tpu.dot_dimension_numbers<[2], [1], [1], [2], [0, 0, 0, 1, 1, 2], [0], [0]>} : vector<8x8x8xf32>, vector<8x8x8xf32>, vector<8x8x8xf32> -> vector<8x8x8xf32>
    "tpu.trace_stop"() : () -> ()
    %115 = arith.subf %97, %114 : vector<8x8x8xf32>
    %116 = vector.extract_strided_slice %72 {offsets = [0, 0, 16], sizes = [8, 8, 8], strides = [1, 1, 1]} : vector<8x8x64xf32> to vector<8x8x8xf32>
    %117 = vector.extract_strided_slice %74 {offsets = [0, 0, 16], sizes = [8, 8, 8], strides = [1, 1, 1]} : vector<8x8x64xf32> to vector<8x8x8xf32>
    %118 = vector.extract_strided_slice %80 {offsets = [0, 0, 16], sizes = [8, 8, 8], strides = [1, 1, 1]} : vector<8x8x64xf32> to vector<8x8x8xf32>
    "tpu.trace_start"() <{level = 10 : i32, message = "bqc,bkc->bqk"}> : () -> ()
    %cst_43 = arith.constant dense<0.000000e+00> : vector<8x8x8xf32>
    %119 = tpu.matmul %116, %117, %cst_43 {dimension_numbers = #tpu.dot_dimension_numbers<[2], [2], [1], [1], [0, 0, 0, 1, 1, 1], [0], [0]>} : vector<8x8x8xf32>, vector<8x8x8xf32>, vector<8x8x8xf32> -> vector<8x8x8xf32>
    "tpu.trace_stop"() : () -> ()
    %cst_44 = arith.constant 0.353553385 : f32
    %120 = vector.broadcast %cst_44 : f32 to vector<8x8x8xf32>
    %121 = arith.mulf %119, %120 : vector<8x8x8xf32>
    %cst_45 = arith.constant dense<0xFF800000> : vector<8x8xf32>
    %122 = vector.multi_reduction <maximumf>, %121, %cst_45 [2] : vector<8x8x8xf32> to vector<8x8xf32>
    %123 = vector.shape_cast %122 : vector<8x8xf32> to vector<8x8x1xf32>
    %124 = vector.broadcast %123 : vector<8x8x1xf32> to vector<8x8x8xf32>
    %125 = arith.subf %121, %124 : vector<8x8x8xf32>
    %126 = math.exp %125 : vector<8x8x8xf32>
    %cst_46 = arith.constant dense<0.000000e+00> : vector<8x8xf32>
    %127 = vector.multi_reduction <add>, %126, %cst_46 [2] : vector<8x8x8xf32> to vector<8x8xf32>
    %128 = vector.shape_cast %127 : vector<8x8xf32> to vector<8x8x1xf32>
    %129 = tpu.reciprocal %128 {approx = true} : vector<8x8x1xf32> -> vector<8x8x1xf32>
    %130 = vector.broadcast %129 : vector<8x8x1xf32> to vector<8x8x8xf32>
    %131 = arith.mulf %126, %130 : vector<8x8x8xf32>
    "tpu.trace_start"() <{level = 10 : i32, message = "bqk,bkc->bqc"}> : () -> ()
    %cst_47 = arith.constant dense<0.000000e+00> : vector<8x8x8xf32>
    %132 = tpu.matmul %131, %118, %cst_47 {dimension_numbers = #tpu.dot_dimension_numbers<[2], [1], [1], [2], [0, 0, 0, 1, 1, 2], [0], [0]>} : vector<8x8x8xf32>, vector<8x8x8xf32>, vector<8x8x8xf32> -> vector<8x8x8xf32>
    "tpu.trace_stop"() : () -> ()
    %133 = arith.subf %115, %132 : vector<8x8x8xf32>
    %134 = vector.extract_strided_slice %72 {offsets = [0, 0, 24], sizes = [8, 8, 8], strides = [1, 1, 1]} : vector<8x8x64xf32> to vector<8x8x8xf32>
    %135 = vector.extract_strided_slice %76 {offsets = [0, 0, 24], sizes = [8, 8, 8], strides = [1, 1, 1]} : vector<8x8x64xf32> to vector<8x8x8xf32>
    %136 = vector.extract_strided_slice %78 {offsets = [0, 0, 24], sizes = [8, 8, 8], strides = [1, 1, 1]} : vector<8x8x64xf32> to vector<8x8x8xf32>
    "tpu.trace_start"() <{level = 10 : i32, message = "bqc,bkc->bqk"}> : () -> ()
    %cst_48 = arith.constant dense<0.000000e+00> : vector<8x8x8xf32>
    %137 = tpu.matmul %134, %135, %cst_48 {dimension_numbers = #tpu.dot_dimension_numbers<[2], [2], [1], [1], [0, 0, 0, 1, 1, 1], [0], [0]>} : vector<8x8x8xf32>, vector<8x8x8xf32>, vector<8x8x8xf32> -> vector<8x8x8xf32>
    "tpu.trace_stop"() : () -> ()
    %cst_49 = arith.constant 0.353553385 : f32
    %138 = vector.broadcast %cst_49 : f32 to vector<8x8x8xf32>
    %139 = arith.mulf %137, %138 : vector<8x8x8xf32>
    %cst_50 = arith.constant dense<0xFF800000> : vector<8x8xf32>
    %140 = vector.multi_reduction <maximumf>, %139, %cst_50 [2] : vector<8x8x8xf32> to vector<8x8xf32>
    %141 = vector.shape_cast %140 : vector<8x8xf32> to vector<8x8x1xf32>
    %142 = vector.broadcast %141 : vector<8x8x1xf32> to vector<8x8x8xf32>
    %143 = arith.subf %139, %142 : vector<8x8x8xf32>
    %144 = math.exp %143 : vector<8x8x8xf32>
    %cst_51 = arith.constant dense<0.000000e+00> : vector<8x8xf32>
    %145 = vector.multi_reduction <add>, %144, %cst_51 [2] : vector<8x8x8xf32> to vector<8x8xf32>
    %146 = vector.shape_cast %145 : vector<8x8xf32> to vector<8x8x1xf32>
    %147 = tpu.reciprocal %146 {approx = true} : vector<8x8x1xf32> -> vector<8x8x1xf32>
    %148 = vector.broadcast %147 : vector<8x8x1xf32> to vector<8x8x8xf32>
    %149 = arith.mulf %144, %148 : vector<8x8x8xf32>
    "tpu.trace_start"() <{level = 10 : i32, message = "bqk,bkc->bqc"}> : () -> ()
    %cst_52 = arith.constant dense<0.000000e+00> : vector<8x8x8xf32>
    %150 = tpu.matmul %149, %136, %cst_52 {dimension_numbers = #tpu.dot_dimension_numbers<[2], [1], [1], [2], [0, 0, 0, 1, 1, 2], [0], [0]>} : vector<8x8x8xf32>, vector<8x8x8xf32>, vector<8x8x8xf32> -> vector<8x8x8xf32>
    "tpu.trace_stop"() : () -> ()
    %151 = arith.subf %133, %150 : vector<8x8x8xf32>
    %152 = vector.extract_strided_slice %70 {offsets = [0, 0, 32], sizes = [8, 8, 8], strides = [1, 1, 1]} : vector<8x8x64xf32> to vector<8x8x8xf32>
    %153 = vector.extract_strided_slice %74 {offsets = [0, 0, 32], sizes = [8, 8, 8], strides = [1, 1, 1]} : vector<8x8x64xf32> to vector<8x8x8xf32>
    %154 = vector.extract_strided_slice %80 {offsets = [0, 0, 32], sizes = [8, 8, 8], strides = [1, 1, 1]} : vector<8x8x64xf32> to vector<8x8x8xf32>
    "tpu.trace_start"() <{level = 10 : i32, message = "bqc,bkc->bqk"}> : () -> ()
    %cst_53 = arith.constant dense<0.000000e+00> : vector<8x8x8xf32>
    %155 = tpu.matmul %152, %153, %cst_53 {dimension_numbers = #tpu.dot_dimension_numbers<[2], [2], [1], [1], [0, 0, 0, 1, 1, 1], [0], [0]>} : vector<8x8x8xf32>, vector<8x8x8xf32>, vector<8x8x8xf32> -> vector<8x8x8xf32>
    "tpu.trace_stop"() : () -> ()
    %cst_54 = arith.constant 0.353553385 : f32
    %156 = vector.broadcast %cst_54 : f32 to vector<8x8x8xf32>
    %157 = arith.mulf %155, %156 : vector<8x8x8xf32>
    %cst_55 = arith.constant dense<0xFF800000> : vector<8x8xf32>
    %158 = vector.multi_reduction <maximumf>, %157, %cst_55 [2] : vector<8x8x8xf32> to vector<8x8xf32>
    %159 = vector.shape_cast %158 : vector<8x8xf32> to vector<8x8x1xf32>
    %160 = vector.broadcast %159 : vector<8x8x1xf32> to vector<8x8x8xf32>
    %161 = arith.subf %157, %160 : vector<8x8x8xf32>
    %162 = math.exp %161 : vector<8x8x8xf32>
    %cst_56 = arith.constant dense<0.000000e+00> : vector<8x8xf32>
    %163 = vector.multi_reduction <add>, %162, %cst_56 [2] : vector<8x8x8xf32> to vector<8x8xf32>
    %164 = vector.shape_cast %163 : vector<8x8xf32> to vector<8x8x1xf32>
    %165 = tpu.reciprocal %164 {approx = true} : vector<8x8x1xf32> -> vector<8x8x1xf32>
    %166 = vector.broadcast %165 : vector<8x8x1xf32> to vector<8x8x8xf32>
    %167 = arith.mulf %162, %166 : vector<8x8x8xf32>
    "tpu.trace_start"() <{level = 10 : i32, message = "bqk,bkc->bqc"}> : () -> ()
    %cst_57 = arith.constant dense<0.000000e+00> : vector<8x8x8xf32>
    %168 = tpu.matmul %167, %154, %cst_57 {dimension_numbers = #tpu.dot_dimension_numbers<[2], [1], [1], [2], [0, 0, 0, 1, 1, 2], [0], [0]>} : vector<8x8x8xf32>, vector<8x8x8xf32>, vector<8x8x8xf32> -> vector<8x8x8xf32>
    "tpu.trace_stop"() : () -> ()
    %169 = vector.extract_strided_slice %70 {offsets = [0, 0, 40], sizes = [8, 8, 8], strides = [1, 1, 1]} : vector<8x8x64xf32> to vector<8x8x8xf32>
    %170 = vector.extract_strided_slice %76 {offsets = [0, 0, 40], sizes = [8, 8, 8], strides = [1, 1, 1]} : vector<8x8x64xf32> to vector<8x8x8xf32>
    %171 = vector.extract_strided_slice %78 {offsets = [0, 0, 40], sizes = [8, 8, 8], strides = [1, 1, 1]} : vector<8x8x64xf32> to vector<8x8x8xf32>
    "tpu.trace_start"() <{level = 10 : i32, message = "bqc,bkc->bqk"}> : () -> ()
    %cst_58 = arith.constant dense<0.000000e+00> : vector<8x8x8xf32>
    %172 = tpu.matmul %169, %170, %cst_58 {dimension_numbers = #tpu.dot_dimension_numbers<[2], [2], [1], [1], [0, 0, 0, 1, 1, 1], [0], [0]>} : vector<8x8x8xf32>, vector<8x8x8xf32>, vector<8x8x8xf32> -> vector<8x8x8xf32>
    "tpu.trace_stop"() : () -> ()
    %cst_59 = arith.constant 0.353553385 : f32
    %173 = vector.broadcast %cst_59 : f32 to vector<8x8x8xf32>
    %174 = arith.mulf %172, %173 : vector<8x8x8xf32>
    %cst_60 = arith.constant dense<0xFF800000> : vector<8x8xf32>
    %175 = vector.multi_reduction <maximumf>, %174, %cst_60 [2] : vector<8x8x8xf32> to vector<8x8xf32>
    %176 = vector.shape_cast %175 : vector<8x8xf32> to vector<8x8x1xf32>
    %177 = vector.broadcast %176 : vector<8x8x1xf32> to vector<8x8x8xf32>
    %178 = arith.subf %174, %177 : vector<8x8x8xf32>
    %179 = math.exp %178 : vector<8x8x8xf32>
    %cst_61 = arith.constant dense<0.000000e+00> : vector<8x8xf32>
    %180 = vector.multi_reduction <add>, %179, %cst_61 [2] : vector<8x8x8xf32> to vector<8x8xf32>
    %181 = vector.shape_cast %180 : vector<8x8xf32> to vector<8x8x1xf32>
    %182 = tpu.reciprocal %181 {approx = true} : vector<8x8x1xf32> -> vector<8x8x1xf32>
    %183 = vector.broadcast %182 : vector<8x8x1xf32> to vector<8x8x8xf32>
    %184 = arith.mulf %179, %183 : vector<8x8x8xf32>
    "tpu.trace_start"() <{level = 10 : i32, message = "bqk,bkc->bqc"}> : () -> ()
    %cst_62 = arith.constant dense<0.000000e+00> : vector<8x8x8xf32>
    %185 = tpu.matmul %184, %171, %cst_62 {dimension_numbers = #tpu.dot_dimension_numbers<[2], [1], [1], [2], [0, 0, 0, 1, 1, 2], [0], [0]>} : vector<8x8x8xf32>, vector<8x8x8xf32>, vector<8x8x8xf32> -> vector<8x8x8xf32>
    "tpu.trace_stop"() : () -> ()
    %186 = arith.addf %168, %185 : vector<8x8x8xf32>
    %187 = vector.extract_strided_slice %72 {offsets = [0, 0, 48], sizes = [8, 8, 8], strides = [1, 1, 1]} : vector<8x8x64xf32> to vector<8x8x8xf32>
    %188 = vector.extract_strided_slice %74 {offsets = [0, 0, 48], sizes = [8, 8, 8], strides = [1, 1, 1]} : vector<8x8x64xf32> to vector<8x8x8xf32>
    %189 = vector.extract_strided_slice %78 {offsets = [0, 0, 48], sizes = [8, 8, 8], strides = [1, 1, 1]} : vector<8x8x64xf32> to vector<8x8x8xf32>
    "tpu.trace_start"() <{level = 10 : i32, message = "bqc,bkc->bqk"}> : () -> ()
    %cst_63 = arith.constant dense<0.000000e+00> : vector<8x8x8xf32>
    %190 = tpu.matmul %187, %188, %cst_63 {dimension_numbers = #tpu.dot_dimension_numbers<[2], [2], [1], [1], [0, 0, 0, 1, 1, 1], [0], [0]>} : vector<8x8x8xf32>, vector<8x8x8xf32>, vector<8x8x8xf32> -> vector<8x8x8xf32>
    "tpu.trace_stop"() : () -> ()
    %cst_64 = arith.constant 0.353553385 : f32
    %191 = vector.broadcast %cst_64 : f32 to vector<8x8x8xf32>
    %192 = arith.mulf %190, %191 : vector<8x8x8xf32>
    %cst_65 = arith.constant dense<0xFF800000> : vector<8x8xf32>
    %193 = vector.multi_reduction <maximumf>, %192, %cst_65 [2] : vector<8x8x8xf32> to vector<8x8xf32>
    %194 = vector.shape_cast %193 : vector<8x8xf32> to vector<8x8x1xf32>
    %195 = vector.broadcast %194 : vector<8x8x1xf32> to vector<8x8x8xf32>
    %196 = arith.subf %192, %195 : vector<8x8x8xf32>
    %197 = math.exp %196 : vector<8x8x8xf32>
    %cst_66 = arith.constant dense<0.000000e+00> : vector<8x8xf32>
    %198 = vector.multi_reduction <add>, %197, %cst_66 [2] : vector<8x8x8xf32> to vector<8x8xf32>
    %199 = vector.shape_cast %198 : vector<8x8xf32> to vector<8x8x1xf32>
    %200 = tpu.reciprocal %199 {approx = true} : vector<8x8x1xf32> -> vector<8x8x1xf32>
    %201 = vector.broadcast %200 : vector<8x8x1xf32> to vector<8x8x8xf32>
    %202 = arith.mulf %197, %201 : vector<8x8x8xf32>
    "tpu.trace_start"() <{level = 10 : i32, message = "bqk,bkc->bqc"}> : () -> ()
    %cst_67 = arith.constant dense<0.000000e+00> : vector<8x8x8xf32>
    %203 = tpu.matmul %202, %189, %cst_67 {dimension_numbers = #tpu.dot_dimension_numbers<[2], [1], [1], [2], [0, 0, 0, 1, 1, 2], [0], [0]>} : vector<8x8x8xf32>, vector<8x8x8xf32>, vector<8x8x8xf32> -> vector<8x8x8xf32>
    "tpu.trace_stop"() : () -> ()
    %204 = arith.addf %186, %203 : vector<8x8x8xf32>
    %205 = vector.extract_strided_slice %72 {offsets = [0, 0, 56], sizes = [8, 8, 8], strides = [1, 1, 1]} : vector<8x8x64xf32> to vector<8x8x8xf32>
    %206 = vector.extract_strided_slice %76 {offsets = [0, 0, 56], sizes = [8, 8, 8], strides = [1, 1, 1]} : vector<8x8x64xf32> to vector<8x8x8xf32>
    %207 = vector.extract_strided_slice %80 {offsets = [0, 0, 56], sizes = [8, 8, 8], strides = [1, 1, 1]} : vector<8x8x64xf32> to vector<8x8x8xf32>
    "tpu.trace_start"() <{level = 10 : i32, message = "bqc,bkc->bqk"}> : () -> ()
    %cst_68 = arith.constant dense<0.000000e+00> : vector<8x8x8xf32>
    %208 = tpu.matmul %205, %206, %cst_68 {dimension_numbers = #tpu.dot_dimension_numbers<[2], [2], [1], [1], [0, 0, 0, 1, 1, 1], [0], [0]>} : vector<8x8x8xf32>, vector<8x8x8xf32>, vector<8x8x8xf32> -> vector<8x8x8xf32>
    "tpu.trace_stop"() : () -> ()
    %cst_69 = arith.constant 0.353553385 : f32
    %209 = vector.broadcast %cst_69 : f32 to vector<8x8x8xf32>
    %210 = arith.mulf %208, %209 : vector<8x8x8xf32>
    %cst_70 = arith.constant dense<0xFF800000> : vector<8x8xf32>
    %211 = vector.multi_reduction <maximumf>, %210, %cst_70 [2] : vector<8x8x8xf32> to vector<8x8xf32>
    %212 = vector.shape_cast %211 : vector<8x8xf32> to vector<8x8x1xf32>
    %213 = vector.broadcast %212 : vector<8x8x1xf32> to vector<8x8x8xf32>
    %214 = arith.subf %210, %213 : vector<8x8x8xf32>
    %215 = math.exp %214 : vector<8x8x8xf32>
    %cst_71 = arith.constant dense<0.000000e+00> : vector<8x8xf32>
    %216 = vector.multi_reduction <add>, %215, %cst_71 [2] : vector<8x8x8xf32> to vector<8x8xf32>
    %217 = vector.shape_cast %216 : vector<8x8xf32> to vector<8x8x1xf32>
    %218 = tpu.reciprocal %217 {approx = true} : vector<8x8x1xf32> -> vector<8x8x1xf32>
    %219 = vector.broadcast %218 : vector<8x8x1xf32> to vector<8x8x8xf32>
    %220 = arith.mulf %215, %219 : vector<8x8x8xf32>
    "tpu.trace_start"() <{level = 10 : i32, message = "bqk,bkc->bqc"}> : () -> ()
    %cst_72 = arith.constant dense<0.000000e+00> : vector<8x8x8xf32>
    %221 = tpu.matmul %220, %207, %cst_72 {dimension_numbers = #tpu.dot_dimension_numbers<[2], [1], [1], [2], [0, 0, 0, 1, 1, 2], [0], [0]>} : vector<8x8x8xf32>, vector<8x8x8xf32>, vector<8x8x8xf32> -> vector<8x8x8xf32>
    "tpu.trace_stop"() : () -> ()
    %222 = arith.subf %204, %221 : vector<8x8x8xf32>
    %223 = vector.shape_cast %151 : vector<8x8x8xf32> to vector<64x8xf32>
    %c0_73 = arith.constant 0 : index
    %c0_74 = arith.constant 0 : index
    %224 = vector.load %arg9[%c0_73, %c0_74] : memref<2x8xf32, #tpu.memory_space<vmem>>, vector<1x8xf32>
    %c1_75 = arith.constant 1 : index
    %c0_76 = arith.constant 0 : index
    %225 = vector.load %arg9[%c1_75, %c0_76] : memref<2x8xf32, #tpu.memory_space<vmem>>, vector<1x8xf32>
    %cst_77 = arith.constant dense<0.000000e+00> : vector<64xf32>
    %226 = vector.multi_reduction <add>, %223, %cst_77 [1] : vector<64x8xf32> to vector<64xf32>
    %227 = vector.shape_cast %226 : vector<64xf32> to vector<64x1xf32>
    %cst_78 = arith.constant 8.000000e+00 : f32
    %228 = vector.broadcast %cst_78 : f32 to vector<64x1xf32>
    %229 = arith.divf %227, %228 : vector<64x1xf32>
    %230 = vector.broadcast %229 : vector<64x1xf32> to vector<64x8xf32>
    %231 = arith.subf %223, %230 : vector<64x8xf32>
    %232 = arith.mulf %231, %231 : vector<64x8xf32>
    %cst_79 = arith.constant dense<0.000000e+00> : vector<64xf32>
    %233 = vector.multi_reduction <add>, %232, %cst_79 [1] : vector<64x8xf32> to vector<64xf32>
    %234 = vector.shape_cast %233 : vector<64xf32> to vector<64x1xf32>
    %cst_80 = arith.constant 8.000000e+00 : f32
    %235 = vector.broadcast %cst_80 : f32 to vector<64x1xf32>
    %236 = arith.divf %234, %235 : vector<64x1xf32>
    %237 = vector.broadcast %229 : vector<64x1xf32> to vector<64x8xf32>
    %238 = arith.subf %223, %237 : vector<64x8xf32>
    %cst_81 = arith.constant 9.99999974E-6 : f32
    %239 = vector.broadcast %cst_81 : f32 to vector<64x1xf32>
    %240 = arith.addf %236, %239 : vector<64x1xf32>
    %241 = math.rsqrt %240 : vector<64x1xf32>
    %242 = vector.broadcast %241 : vector<64x1xf32> to vector<64x8xf32>
    %243 = arith.mulf %238, %242 : vector<64x8xf32>
    %244 = vector.broadcast %224 : vector<1x8xf32> to vector<64x8xf32>
    %245 = arith.mulf %243, %244 : vector<64x8xf32>
    %246 = vector.broadcast %225 : vector<1x8xf32> to vector<64x8xf32>
    %247 = arith.addf %245, %246 : vector<64x8xf32>
    %248 = vector.shape_cast %222 : vector<8x8x8xf32> to vector<64x8xf32>
    %c0_82 = arith.constant 0 : index
    %c0_83 = arith.constant 0 : index
    %249 = vector.load %arg9[%c0_82, %c0_83] : memref<2x8xf32, #tpu.memory_space<vmem>>, vector<1x8xf32>
    %c1_84 = arith.constant 1 : index
    %c0_85 = arith.constant 0 : index
    %250 = vector.load %arg9[%c1_84, %c0_85] : memref<2x8xf32, #tpu.memory_space<vmem>>, vector<1x8xf32>
    %cst_86 = arith.constant dense<0.000000e+00> : vector<64xf32>
    %251 = vector.multi_reduction <add>, %248, %cst_86 [1] : vector<64x8xf32> to vector<64xf32>
    %252 = vector.shape_cast %251 : vector<64xf32> to vector<64x1xf32>
    %cst_87 = arith.constant 8.000000e+00 : f32
    %253 = vector.broadcast %cst_87 : f32 to vector<64x1xf32>
    %254 = arith.divf %252, %253 : vector<64x1xf32>
    %255 = vector.broadcast %254 : vector<64x1xf32> to vector<64x8xf32>
    %256 = arith.subf %248, %255 : vector<64x8xf32>
    %257 = arith.mulf %256, %256 : vector<64x8xf32>
    %cst_88 = arith.constant dense<0.000000e+00> : vector<64xf32>
    %258 = vector.multi_reduction <add>, %257, %cst_88 [1] : vector<64x8xf32> to vector<64xf32>
    %259 = vector.shape_cast %258 : vector<64xf32> to vector<64x1xf32>
    %cst_89 = arith.constant 8.000000e+00 : f32
    %260 = vector.broadcast %cst_89 : f32 to vector<64x1xf32>
    %261 = arith.divf %259, %260 : vector<64x1xf32>
    %262 = vector.broadcast %254 : vector<64x1xf32> to vector<64x8xf32>
    %263 = arith.subf %248, %262 : vector<64x8xf32>
    %cst_90 = arith.constant 9.99999974E-6 : f32
    %264 = vector.broadcast %cst_90 : f32 to vector<64x1xf32>
    %265 = arith.addf %261, %264 : vector<64x1xf32>
    %266 = math.rsqrt %265 : vector<64x1xf32>
    %267 = vector.broadcast %266 : vector<64x1xf32> to vector<64x8xf32>
    %268 = arith.mulf %263, %267 : vector<64x8xf32>
    %269 = vector.broadcast %249 : vector<1x8xf32> to vector<64x8xf32>
    %270 = arith.mulf %268, %269 : vector<64x8xf32>
    %271 = vector.broadcast %250 : vector<1x8xf32> to vector<64x8xf32>
    %272 = arith.addf %270, %271 : vector<64x8xf32>
    %273 = tpu.concatenate %247, %272 in 1 : vector<64x8xf32>, vector<64x8xf32> -> vector<64x16xf32>
    %c0_91 = arith.constant 0 : index
    %c0_92 = arith.constant 0 : index
    %274 = vector.load %arg11[%c0_91, %c0_92] : memref<16x8xf32, #tpu.memory_space<vmem>>, vector<16x8xf32>
    %cst_93 = arith.constant dense<0.000000e+00> : vector<64x8xf32>
    %275 = tpu.matmul %273, %274, %cst_93 {dimension_numbers = #tpu.dot_dimension_numbers<[1], [0], [0], [1], [0, 0, 1, 1], [], []>} : vector<64x16xf32>, vector<16x8xf32>, vector<64x8xf32> -> vector<64x8xf32>
    %c0_94 = arith.constant 0 : index
    %c0_95 = arith.constant 0 : index
    %276 = vector.load %arg12[%c0_94, %c0_95] : memref<1x8xf32, #tpu.memory_space<vmem>>, vector<1x8xf32>
    %277 = vector.broadcast %276 : vector<1x8xf32> to vector<64x8xf32>
    %278 = arith.addf %275, %277 : vector<64x8xf32>
    %279 = vector.extract_strided_slice %278 {offsets = [0, 0], sizes = [64, 4], strides = [1, 1]} : vector<64x8xf32> to vector<64x4xf32>
    %280 = vector.extract_strided_slice %278 {offsets = [0, 4], sizes = [64, 4], strides = [1, 1]} : vector<64x8xf32> to vector<64x4xf32>
    %c0_96 = arith.constant 0 : index
    %c0_97 = arith.constant 0 : index
    %281 = vector.load %arg10[%c0_96, %c0_97] : memref<2x4xf32, #tpu.memory_space<vmem>>, vector<1x4xf32>
    %c1_98 = arith.constant 1 : index
    %c0_99 = arith.constant 0 : index
    %282 = vector.load %arg10[%c1_98, %c0_99] : memref<2x4xf32, #tpu.memory_space<vmem>>, vector<1x4xf32>
    %cst_100 = arith.constant dense<0.000000e+00> : vector<64xf32>
    %283 = vector.multi_reduction <add>, %279, %cst_100 [1] : vector<64x4xf32> to vector<64xf32>
    %284 = vector.shape_cast %283 : vector<64xf32> to vector<64x1xf32>
    %cst_101 = arith.constant 4.000000e+00 : f32
    %285 = vector.broadcast %cst_101 : f32 to vector<64x1xf32>
    %286 = arith.divf %284, %285 : vector<64x1xf32>
    %287 = vector.broadcast %286 : vector<64x1xf32> to vector<64x4xf32>
    %288 = arith.subf %279, %287 : vector<64x4xf32>
    %289 = arith.mulf %288, %288 : vector<64x4xf32>
    %cst_102 = arith.constant dense<0.000000e+00> : vector<64xf32>
    %290 = vector.multi_reduction <add>, %289, %cst_102 [1] : vector<64x4xf32> to vector<64xf32>
    %291 = vector.shape_cast %290 : vector<64xf32> to vector<64x1xf32>
    %cst_103 = arith.constant 4.000000e+00 : f32
    %292 = vector.broadcast %cst_103 : f32 to vector<64x1xf32>
    %293 = arith.divf %291, %292 : vector<64x1xf32>
    %294 = vector.broadcast %286 : vector<64x1xf32> to vector<64x4xf32>
    %295 = arith.subf %279, %294 : vector<64x4xf32>
    %cst_104 = arith.constant 9.99999974E-6 : f32
    %296 = vector.broadcast %cst_104 : f32 to vector<64x1xf32>
    %297 = arith.addf %293, %296 : vector<64x1xf32>
    %298 = math.rsqrt %297 : vector<64x1xf32>
    %299 = vector.broadcast %298 : vector<64x1xf32> to vector<64x4xf32>
    %300 = arith.mulf %295, %299 : vector<64x4xf32>
    %301 = vector.broadcast %281 : vector<1x4xf32> to vector<64x4xf32>
    %302 = arith.mulf %300, %301 : vector<64x4xf32>
    %303 = vector.broadcast %282 : vector<1x4xf32> to vector<64x4xf32>
    %304 = arith.addf %302, %303 : vector<64x4xf32>
    %c0_105 = arith.constant 0 : index
    %c0_106 = arith.constant 0 : index
    %305 = vector.load %arg10[%c0_105, %c0_106] : memref<2x4xf32, #tpu.memory_space<vmem>>, vector<1x4xf32>
    %c1_107 = arith.constant 1 : index
    %c0_108 = arith.constant 0 : index
    %306 = vector.load %arg10[%c1_107, %c0_108] : memref<2x4xf32, #tpu.memory_space<vmem>>, vector<1x4xf32>
    %cst_109 = arith.constant dense<0.000000e+00> : vector<64xf32>
    %307 = vector.multi_reduction <add>, %280, %cst_109 [1] : vector<64x4xf32> to vector<64xf32>
    %308 = vector.shape_cast %307 : vector<64xf32> to vector<64x1xf32>
    %cst_110 = arith.constant 4.000000e+00 : f32
    %309 = vector.broadcast %cst_110 : f32 to vector<64x1xf32>
    %310 = arith.divf %308, %309 : vector<64x1xf32>
    %311 = vector.broadcast %310 : vector<64x1xf32> to vector<64x4xf32>
    %312 = arith.subf %280, %311 : vector<64x4xf32>
    %313 = arith.mulf %312, %312 : vector<64x4xf32>
    %cst_111 = arith.constant dense<0.000000e+00> : vector<64xf32>
    %314 = vector.multi_reduction <add>, %313, %cst_111 [1] : vector<64x4xf32> to vector<64xf32>
    %315 = vector.shape_cast %314 : vector<64xf32> to vector<64x1xf32>
    %cst_112 = arith.constant 4.000000e+00 : f32
    %316 = vector.broadcast %cst_112 : f32 to vector<64x1xf32>
    %317 = arith.divf %315, %316 : vector<64x1xf32>
    %318 = vector.broadcast %310 : vector<64x1xf32> to vector<64x4xf32>
    %319 = arith.subf %280, %318 : vector<64x4xf32>
    %cst_113 = arith.constant 9.99999974E-6 : f32
    %320 = vector.broadcast %cst_113 : f32 to vector<64x1xf32>
    %321 = arith.addf %317, %320 : vector<64x1xf32>
    %322 = math.rsqrt %321 : vector<64x1xf32>
    %323 = vector.broadcast %322 : vector<64x1xf32> to vector<64x4xf32>
    %324 = arith.mulf %319, %323 : vector<64x4xf32>
    %325 = vector.broadcast %305 : vector<1x4xf32> to vector<64x4xf32>
    %326 = arith.mulf %324, %325 : vector<64x4xf32>
    %327 = vector.broadcast %306 : vector<1x4xf32> to vector<64x4xf32>
    %328 = arith.addf %326, %327 : vector<64x4xf32>
    %c0_114 = arith.constant 0 : index
    %329 = memref.load %arg13[%c0_114] : memref<1xf32, #tpu.memory_space<smem>>
    %cst_115 = arith.constant 0.000000e+00 : f32
    %330 = vector.broadcast %cst_115 : f32 to vector<64x4xf32>
    %331 = arith.cmpf oge, %304, %330 : vector<64x4xf32>
    %332 = vector.broadcast %329 : f32 to vector<64x4xf32>
    %333 = arith.mulf %332, %304 : vector<64x4xf32>
    %334 = arith.select %331, %304, %333 : vector<64x4xi1>, vector<64x4xf32>
    %cst_116 = arith.constant 0.000000e+00 : f32
    %335 = vector.broadcast %cst_116 : f32 to vector<64x4xf32>
    %336 = arith.cmpf oge, %328, %335 : vector<64x4xf32>
    %337 = vector.broadcast %329 : f32 to vector<64x4xf32>
    %338 = arith.mulf %337, %328 : vector<64x4xf32>
    %339 = arith.select %336, %328, %338 : vector<64x4xi1>, vector<64x4xf32>
    %340 = arith.addf %334, %2 : vector<64x4xf32>
    %341 = arith.addf %339, %4 : vector<64x4xf32>
    %342 = vector.shape_cast %340 : vector<64x4xf32> to vector<8x8x4xf32>
    %343 = vector.shape_cast %341 : vector<64x4xf32> to vector<8x8x4xf32>
    %344 = tpu.concatenate %342, %343 in 2 : vector<8x8x4xf32>, vector<8x8x4xf32> -> vector<8x8x8xf32>
    %c0_117 = arith.constant 0 : index
    %c0_118 = arith.constant 0 : index
    %c0_119 = arith.constant 0 : index
    %345 = vector.load %arg14[%c0_117, %c0_118, %c0_119] : memref<8x8x8xf32, #tpu.memory_space<vmem>>, vector<8x8x8xf32>
    tpu.vector_store %arg14[%c0_117, %c0_118, %c0_119], %344 {strides = array<i32>} : memref<8x8x8xf32, #tpu.memory_space<vmem>>, vector<8x8x8xf32>,
    return
  }
  func.func @transform_0(%arg0: i32) -> (i32, i32, i32) {
    %c0_i32 = arith.constant 0 : i32
    %c0_i32_0 = arith.constant 0 : i32
    %c0_i32_1 = arith.constant 0 : i32
    return %arg0, %c0_i32, %c0_i32_0 : i32, i32, i32
  }
  func.func @transform_1(%arg0: i32) -> (i32, i32) {
    %c0_i32 = arith.constant 0 : i32
    %c0_i32_0 = arith.constant 0 : i32
    %c0_i32_1 = arith.constant 0 : i32
    return %c0_i32, %c0_i32_0 : i32, i32
  }
  func.func @transform_2(%arg0: i32) -> (i32, i32) {
    %c0_i32 = arith.constant 0 : i32
    %c0_i32_0 = arith.constant 0 : i32
    %c0_i32_1 = arith.constant 0 : i32
    return %c0_i32, %c0_i32_0 : i32, i32
  }
  func.func @transform_3(%arg0: i32) -> (i32, i32) {
    %c0_i32 = arith.constant 0 : i32
    %c0_i32_0 = arith.constant 0 : i32
    %c0_i32_1 = arith.constant 0 : i32
    return %c0_i32, %c0_i32_0 : i32, i32
  }
  func.func @transform_4(%arg0: i32) -> (i32, i32) {
    %c0_i32 = arith.constant 0 : i32
    %c0_i32_0 = arith.constant 0 : i32
    %c0_i32_1 = arith.constant 0 : i32
    return %c0_i32, %c0_i32_0 : i32, i32
  }
  func.func @transform_5(%arg0: i32) -> (i32, i32) {
    %c0_i32 = arith.constant 0 : i32
    %c0_i32_0 = arith.constant 0 : i32
    %c0_i32_1 = arith.constant 0 : i32
    return %c0_i32, %c0_i32_0 : i32, i32
  }
  func.func @transform_6(%arg0: i32) -> (i32, i32) {
    %c0_i32 = arith.constant 0 : i32
    %c0_i32_0 = arith.constant 0 : i32
    %c0_i32_1 = arith.constant 0 : i32
    return %c0_i32, %c0_i32_0 : i32, i32
  }
  func.func @transform_7(%arg0: i32) -> (i32, i32) {
    %c0_i32 = arith.constant 0 : i32
    %c0_i32_0 = arith.constant 0 : i32
    %c0_i32_1 = arith.constant 0 : i32
    return %c0_i32, %c0_i32_0 : i32, i32
  }
  func.func @transform_8(%arg0: i32) -> (i32, i32) {
    %c0_i32 = arith.constant 0 : i32
    %c0_i32_0 = arith.constant 0 : i32
    %c0_i32_1 = arith.constant 0 : i32
    return %c0_i32, %c0_i32_0 : i32, i32
  }
  func.func @transform_9(%arg0: i32) -> (i32, i32) {
    %c0_i32 = arith.constant 0 : i32
    %c0_i32_0 = arith.constant 0 : i32
    %c0_i32_1 = arith.constant 0 : i32
    return %c0_i32, %c0_i32_0 : i32, i32
  }
  func.func @transform_10(%arg0: i32) -> (i32, i32) {
    %c0_i32 = arith.constant 0 : i32
    %c0_i32_0 = arith.constant 0 : i32
    %c0_i32_1 = arith.constant 0 : i32
    return %c0_i32, %c0_i32_0 : i32, i32
  }
  func.func @transform_11(%arg0: i32) -> (i32, i32) {
    %c0_i32 = arith.constant 0 : i32
    %c0_i32_0 = arith.constant 0 : i32
    %c0_i32_1 = arith.constant 0 : i32
    return %c0_i32, %c0_i32_0 : i32, i32
  }
  func.func @transform_12(%arg0: i32) -> i32 {
    %c0_i32 = arith.constant 0 : i32
    %c0_i32_0 = arith.constant 0 : i32
    return %c0_i32 : i32
  }
  func.func @transform_13(%arg0: i32) -> (i32, i32, i32) {
    %c0_i32 = arith.constant 0 : i32
    %c0_i32_0 = arith.constant 0 : i32
    %c0_i32_1 = arith.constant 0 : i32
    return %arg0, %c0_i32, %c0_i32_0 : i32, i32, i32
  }
}

</mosaic_0001>

<bundles_post_ra>
// kernel: multihead_attention_t_branch.1
= control target key start
LH: loop header
LB: loop body
LE: loop exit
PB: predicated region body
PF: predicated region fallthrough
CT: control target
= control target key end

     0   :  { %s6891_s27 = smov 124   ;;  %vm55_vm0 = vcmask 31744   ;;  %v6892_v6 = vmov 4.0   ;;  %s6893_s23 = smov 4   ;;  %vm590_vm5 = vcmask 1043456   ;;  %s9764_s0 = inlined_call_operand.vmem [shape: f32[8,8,8], index: 0, kind: input, shape index: {}]   ;;  %s9765_s7 = inlined_call_operand.vmem [shape: f32[2,4], index: 7, kind: input, shape index: {}, may-alias: {7,9}]   ;;  %s9766_s1 = inlined_call_operand.vmem [shape: f32[4,64], index: 1, kind: input, shape index: {}]   ;;  %s9767_s2 = inlined_call_operand.vmem [shape: f32[1,64], index: 2, kind: input, shape index: {}]   ;;  %s9768_s3 = inlined_call_operand.vmem [shape: f32[4,64], index: 3, kind: input, shape index: {}]   ;;  %s9769_s4 = inlined_call_operand.vmem [shape: f32[1,64], index: 4, kind: input, shape index: {}]   ;;  %s9770_s5 = inlined_call_operand.vmem [shape: f32[4,64], index: 5, kind: input, shape index: {}]   ;;  %s9771_s6 = inlined_call_operand.vmem [shape: f32[1,64], index: 6, kind: input, shape index: {}]   ;;  %s9772_s8 = inlined_call_operand.vmem [shape: f32[2,8], index: 8, kind: input, shape index: {}]   ;;  %s9773_s10 = inlined_call_operand.vmem [shape: f32[16,8], index: 10, kind: input, shape index: {}]   ;;  %s9774_s11 = inlined_call_operand.vmem [shape: f32[1,8], index: 11, kind: input, shape index: {}]   ;;  %s9775_s9 = inlined_call_operand.vmem [shape: f32[2,4], index: 9, kind: input, shape index: {}, may-alias: {7,9}]   ;;  %s9776_s12 = inlined_call_operand.<no memory space> [shape: f32[1], index: 12, kind: input, shape index: {}]   ;;  %s9777_s13 = inlined_call_operand.vmem [shape: f32[8,8,8], index: 13, kind: output, shape index: {}]  }
   0x1   :  { %v6976_v0 = vld [vmem:[%s9764_s0 + $0x10] sm:$0xff]  ;;  %v6983_v1 = vld [vmem:[%s9764_s0 + $0x18] sm:$0xff]  ;;  %6526 = vrcp.f32 %v6892_v6  ;;  %v6999_v10 = vld [vmem:[%s9764_s0 + $0x8] sm:$0xff]  ;;  %s6894_s18 = smov 120   ;;  %s6896_s25 = smov 104  }
   0x2   :  { %269 = vrot.lane.b32.xlu0 %v6976_v0, %s6891_s27  ;;  %v6992_v8 = vld [vmem:[%s9764_s0 + $0x30] sm:$0xff]  ;;  %v59_v11 = vsel %vm55_vm0, %v6999_v10, 0.0  ;;  %v62_v14 = vsel %vm55_vm0, %v6976_v0, 0.0  ;;  %v65_v25 = vsel %vm55_vm0, %v6983_v1, 0.0  ;;  %v7026_v26 = vld [vmem:[%s9764_s0] sm:$0xff]  ;;  %v7033_v28 = vld [vmem:[%s9764_s0 + $0x38] sm:$0xff] }
   0x3   :  { %v56_v27 = vsel %vm55_vm0, %v7026_v26, 0.0  ;;  %v7040_v29 = vld [vmem:[%s9765_s7 + $0x1] ss:$0 sm:$0xff]  ;;  %v7049_v34 = vld [vmem:[%s9765_s7] ss:$0 sm:$0xff]  ;;  %v7064_v40 = vld [vmem:[%s9764_s0 + $0x28] sm:$0xff] }
   0x4   :  { %v7056_v35 = vld [vmem:[%s9764_s0 + $0x20] sm:$0xff]  ;;  %v71_v41 = vsel %vm55_vm0, %v7064_v40, 0.0  ;;  %v74_v61 = vsel %vm55_vm0, %v6992_v8, 0.0  ;;  %s6898_s26 = smov 88   ;;  %s6899_s28 = smov 80  }
   0x5   :  { %v68_v36 = vsel %vm55_vm0, %v7056_v35, 0.0  ;;  %s6900_s29 = smov 72   ;;  %s6902_s15 = smov 8  }
   0x7   :  { %v6527_v7 = vpop.eup %6526 }
   0x8   :  { %v81_v9 = vmul.f32 4.0, %v6527_v7  ;;  %vm85_vm1 = vweird.f32 %v6527_v7 }
   0xa   :  { %271 = vrot.lane.b32.xlu0 %v6983_v1, %s6891_s27  ;;  %v82_v12 = vsub.f32 1.0, %v81_v9 }
   0xc   :  { %v83_v13 = vmul.f32 %v6527_v7, %v82_v12 }
   0xe   :  { %v84_v15 = vadd.f32 %v6527_v7, %v83_v13 }
  0x10   :  { %v7005_v16 = vsel %vm85_vm1, %v6527_v7, %v84_v15 }
  0x11   :  { %9811 = vst [vmem:[#allocation3_spill] sm:$0xff] %v7005_v16 }
  0x34   :  { %60 = vadd.xlane.f32.xlu0 %v59_v11 }
  0x3c   :  { %63 = vadd.xlane.f32.xlu0 %v62_v14 }
  0x74   :  { %v270_v2 = vpop.permute.xlu0 %269 }
  0x75   :  { %v295_v3 = vsel %vm55_vm0, %v270_v2, 0.0 }
  0x76   :  { %296 = vadd.xlane.f32.xlu1 %v295_v3  ;;  %v77_v3 = vsel %vm55_vm0, %v7033_v28, 0.0 }
  0x7c   :  { %v272_v4 = vpop.permute.xlu0 %271 }
  0x7d   :  { %v298_v5 = vsel %vm55_vm0, %v272_v4, 0.0 }
  0x7e   :  { %299 = vadd.xlane.f32.xlu1 %v298_v5 }
  0x97   :  { %277 = vrot.lane.b32.xlu1 %v6992_v8, %s6891_s27 }
  0xa7   :  { %v61_v37 = vpop.xlane.xlu0 %60 }
  0xa8   :  { %v88_v59 = vmul.f32 %v7005_v16, %v61_v37 }
  0xaa   :  { %v7092_v60 = vsub.f32 %v6999_v10, %v88_v59 }
  0xac   :  { %v104_v62 = vmul.f32 %v7092_v60, %v7092_v60 }
  0xae   :  { %v114_v63 = vsel %vm55_vm0, %v104_v62, 0.0 }
  0xaf   :  { %v64_v38 = vpop.xlane.xlu0 %63 }
  0xb0   :  { %v89_v39 = vmul.f32 %v7005_v16, %v64_v38 }
  0xb2   :  { %v7069_v42 = vsub.f32 %v6976_v0, %v89_v39 }
  0xb4   :  { %v105_v45 = vmul.f32 %v7069_v42, %v7069_v42 }
  0xb6   :  { %v117_v48 = vsel %vm55_vm0, %v105_v45, 0.0  ;;  %v545_v45 = vld [vmem:[%s9766_s1] sm:$0xf] }
  0xb7   :  { %6115 = vmatpush.msk.msra.mxu0 %vm590_vm5, %v545_v45  ;;  %6366 = vmatpush.msk.msra.mxu1 %vm590_vm5, %v545_v45 }
  0xb8   :  { %6368 = vmatpush.msk.msra.mxu3 %vm590_vm5, %v545_v45  ;;  %6367 = vmatpush.msk.msra.mxu2 %vm590_vm5, %v545_v45 }
  0xc1   :  { %66 = vadd.xlane.f32.xlu1 %v65_v25 }
  0xe9   :  { %v297_v17 = vpop.xlane.xlu1 %296 }
  0xea   :  { %v315_v18 = vmul.f32 %v297_v17, %v7005_v16 }
  0xec   :  { %v7009_v19 = vsub.f32 %v6976_v0, %v315_v18 }
  0xee   :  { %v331_v20 = vmul.f32 %v7009_v19, %v7009_v19 }
  0xf0   :  { %349 = vrot.lane.b32.xlu2 %v331_v20, %s6891_s27 }
  0xf1   :  { %v300_v21 = vpop.xlane.xlu1 %299 }
  0xf2   :  { %v316_v22 = vmul.f32 %v300_v21, %v7005_v16 }
  0xf4   :  { %v7016_v23 = vsub.f32 %v6983_v1, %v316_v22 }
  0xf6   :  { %v332_v24 = vmul.f32 %v7016_v23, %v7016_v23 }
  0xf8   :  { %351 = vrot.lane.b32.xlu2 %v332_v24, %s6891_s27 }
 0x109   :  { %v278_v30 = vpop.permute.xlu1 %277 }
 0x10a   :  { %v307_v31 = vsel %vm55_vm0, %v278_v30, 0.0 }
 0x10b   :  { %308 = vadd.xlane.f32.xlu1 %v307_v31 }
 0x121   :  { %57 = vadd.xlane.f32.xlu2 %v56_v27 }
 0x134   :  { %v67_v43 = vpop.xlane.xlu1 %66 }
 0x135   :  { %v90_v44 = vmul.f32 %v7005_v16, %v67_v43 }
 0x137   :  { %v7075_v47 = vsub.f32 %v6983_v1, %v90_v44 }
 0x139   :  { %279 = vrot.lane.b32.xlu2 %v7033_v28, %s6891_s27  ;;  %v106_v49 = vmul.f32 %v7075_v47, %v7075_v47 }
 0x13b   :  { %v120_v51 = vsel %vm55_vm0, %v106_v49, 0.0 }
 0x141   :  { %510 = vrot.lane.b32.xlu2 %v7040_v29, %s6893_s23 }
 0x14a   :  { %v350_v32 = vpop.permute.xlu2 %349 }
 0x14b   :  { %v375_v33 = vsel %vm55_vm0, %v350_v32, 0.0 }
 0x14c   :  { %376 = vadd.xlane.f32.xlu0 %v375_v33 }
 0x152   :  { %v352_v46 = vpop.permute.xlu2 %351 }
 0x153   :  { %v378_v56 = vsel %vm55_vm0, %v352_v46, 0.0 }
 0x160   :  { %498 = vrot.lane.b32.xlu0 %v7049_v34, %s6893_s23 }
 0x16a   :  { %69 = vadd.xlane.f32.xlu2 %v68_v36 }
 0x172   :  { %78 = vadd.xlane.f32.xlu2 %v77_v3 }
 0x17e   :  { %v309_v15 = vpop.xlane.xlu1 %308 }
 0x17f   :  { %v319_v20 = vmul.f32 %v309_v15, %v7005_v16 }
 0x181   :  { %v7112_v22 = vsub.f32 %v6992_v8, %v319_v20 }
 0x18a   :  { %72 = vadd.xlane.f32.xlu0 %v71_v41 }
 0x192   :  { %118 = vadd.xlane.f32.xlu0 %v117_v48 }
 0x194   :  { %v58_v50 = vpop.xlane.xlu2 %57 }
 0x195   :  { %v87_v54 = vmul.f32 %v7005_v16, %v58_v50 }
 0x197   :  { %v7084_v55 = vsub.f32 %v7026_v26, %v87_v54 }
 0x199   :  { %v103_v57 = vmul.f32 %v7084_v55, %v7084_v55 }
 0x19a   :  { %121 = vadd.xlane.f32.xlu0 %v120_v51 }
 0x19b   :  { %v111_v58 = vsel %vm55_vm0, %v103_v57, 0.0 }
 0x19c   :  { %v280_v52 = vpop.permute.xlu2 %279 }
 0x19d   :  { %v310_v53 = vsel %vm55_vm0, %v280_v52, 0.0 }
 0x19e   :  { %311 = vadd.xlane.f32.xlu1 %v310_v53 }
 0x1a4   :  { %v7102_v12 = vpop.permute.xlu2 %510 }
 0x1a6   :  { %379 = vadd.xlane.f32.xlu1 %v378_v56 }
 0x1ae   :  { %112 = vadd.xlane.f32.xlu1 %v111_v58 }
 0x1b6   :  { %75 = vadd.xlane.f32.xlu1 %v74_v61 }
 0x1be   :  { %115 = vadd.xlane.f32.xlu1 %v114_v63 }
 0x1bf   :  { %v377_v0 = vpop.xlane.xlu0 %376 }
 0x1c0   :  { %v395_v1 = vmul.f32 %v377_v0, %v7005_v16 }
 0x1c2   :  { %v403_v2 = vadd.f32 1e-05, %v395_v1 }
 0x1c4   :  { %6528 = vrsqrt.f32 %v403_v2  ;;  %vm435_vm3 = vweird.f32 %v403_v2 }
 0x1ca   :  { %v6529_v4 = vpop.eup %6528 }
 0x1cb   :  { %v430_v5 = vmul.f32 %v6529_v4, %v403_v2  ;;  %vm436_vm2 = vweird.f32 %v6529_v4 }
 0x1cc   :  { %vm437_vm4 = vmor %vm435_vm3, %vm436_vm2 }
 0x1cd   :  { %v431_v6 = vmul.f32 %v6529_v4, %v430_v5 }
 0x1cf   :  { %v432_v7 = vmul.f32 0.5, %v431_v6 }
 0x1d1   :  { %v433_v9 = vsub.f32 1.5, %v432_v7 }
 0x1d2   :  { %v7104_v13 = vpop.permute.xlu0 %498 }
 0x1d3   :  { %v434_v11 = vmul.f32 %v6529_v4, %v433_v9 }
 0x1d5   :  { %v438_v14 = vsel %vm437_vm4, %v6529_v4, %v434_v11 }
 0x1d6   :  { %v491_v17 = vmul.f32 %v438_v14, %v7009_v19  ;;  %v335_v19 = vmul.f32 %v7112_v22, %v7112_v22 }
 0x1d8   :  { %v503_v18 = vmul.f32 %v7104_v13, %v491_v17 }
 0x1da   :  { %v515_v21 = vadd.f32 %v7102_v12, %v503_v18 }
 0x1dc   :  { %533 = vrot.lane.b32.xlu1 %v515_v21, %s6891_s27 }
 0x1dd   :  { %v70_v24 = vpop.xlane.xlu2 %69 }
 0x1de   :  { %v91_v25 = vmul.f32 %v7005_v16, %v70_v24 }
 0x1e0   :  { %v7116_v27 = vsub.f32 %v7056_v35, %v91_v25 }
 0x1e2   :  { %v107_v30 = vmul.f32 %v7116_v27, %v7116_v27 }
 0x1e4   :  { %357 = vrot.lane.b32.xlu1 %v335_v19, %s6891_s27  ;;  %v123_v31 = vsel %vm55_vm0, %v107_v30, 0.0 }
 0x1e5   :  { %124 = vadd.xlane.f32.xlu0 %v123_v31 }
 0x1fd   :  { %v73_v32 = vpop.xlane.xlu0 %72 }
 0x1fe   :  { %v92_v33 = vmul.f32 %v7005_v16, %v73_v32 }
 0x200   :  { %v7126_v36 = vsub.f32 %v7064_v40, %v92_v33 }
 0x202   :  { %v108_v37 = vmul.f32 %v7126_v36, %v7126_v36 }
 0x204   :  { %v126_v38 = vsel %vm55_vm0, %v108_v37, 0.0 }
 0x205   :  { %127 = vadd.xlane.f32.xlu0 %v126_v38  ;;  %v119_v46 = vpop.xlane.xlu0 %118 }
 0x206   :  { %v137_v49 = vmul.f32 %v119_v46, %v7005_v16 }
 0x208   :  { %v7145_v54 = vadd.f32 1e-05, %v137_v49 }
 0x20a   :  { %vm177_vm14 = vweird.f32 %v7145_v54 }
 0x20d   :  { %v122_v57 = vpop.xlane.xlu0 %121 }
 0x20e   :  { %v138_v0 = vmul.f32 %v122_v57, %v7005_v16 }
 0x210   :  { %v146_v9 = vadd.f32 1e-05, %v138_v0 }
 0x211   :  { %v312_v39 = vpop.xlane.xlu1 %311 }
 0x212   :  { %v320_v24 = vmul.f32 %v312_v39, %v7005_v16  ;;  %vm187_vm3 = vweird.f32 %v146_v9 }
 0x214   :  { %v7166_v32 = vsub.f32 %v7033_v28, %v320_v24 }
 0x219   :  { %v380_v41 = vpop.xlane.xlu1 %379  ;;  %265 = vrot.lane.b32.xlu0 %v7026_v26, %s6891_s27 }
 0x21a   :  { %v396_v43 = vmul.f32 %v380_v41, %v7005_v16 }
 0x21c   :  { %v404_v44 = vadd.f32 1e-05, %v396_v43 }
 0x21e   :  { %6530 = vrsqrt.f32 %v404_v44  ;;  %vm445_vm7 = vweird.f32 %v404_v44 }
 0x221   :  { %v113_v48 = vpop.xlane.xlu1 %112  ;;  %267 = vrot.lane.b32.xlu0 %v6999_v10, %s6891_s27 }
 0x222   :  { %v135_v50 = vmul.f32 %v113_v48, %v7005_v16 }
 0x224   :  { %v6531_v51 = vpop.eup %6530  ;;  %v143_v52 = vadd.f32 1e-05, %v135_v50 }
 0x225   :  { %v440_v53 = vmul.f32 %v6531_v51, %v404_v44  ;;  %vm446_vm6 = vweird.f32 %v6531_v51  ;;  %v336_v44 = vmul.f32 %v7166_v32, %v7166_v32 }
 0x226   :  { %6532 = vrsqrt.f32 %v143_v52  ;;  %vm447_vm8 = vmor %vm445_vm7, %vm446_vm6  ;;  %vm157_vm10 = vweird.f32 %v143_v52 }
 0x227   :  { %v441_v56 = vmul.f32 %v6531_v51, %v440_v53  ;;  %6534 = vrsqrt.f32 %v7145_v54 }
 0x228   :  { %6536 = vrsqrt.f32 %v146_v9 }
 0x229   :  { %v442_v58 = vmul.f32 0.5, %v441_v56  ;;  %v76_v59 = vpop.xlane.xlu1 %75  ;;  %275 = vrot.lane.b32.xlu0 %v7064_v40, %s6891_s27 }
 0x22a   :  { %v93_v61 = vmul.f32 %v7005_v16, %v76_v59 }
 0x22b   :  { %v443_v62 = vsub.f32 1.5, %v442_v58 }
 0x22c   :  { %v6533_v63 = vpop.eup %6532  ;;  %v7153_v1 = vsub.f32 %v6992_v8, %v93_v61 }
 0x22d   :  { %v444_v2 = vmul.f32 %v6531_v51, %v443_v62  ;;  %v152_v3 = vmul.f32 %v6533_v63, %v143_v52  ;;  %v6535_v7 = vpop.eup %6534  ;;  %vm158_vm9 = vweird.f32 %v6533_v63 }
 0x22e   :  { %v109_v4 = vmul.f32 %v7153_v1, %v7153_v1  ;;  %v172_v20 = vmul.f32 %v6535_v7, %v7145_v54  ;;  %vm159_vm11 = vmor %vm157_vm10, %vm158_vm9  ;;  %v6537_v37 = vpop.eup %6536  ;;  %vm178_vm15 = vweird.f32 %v6535_v7 }
 0x22f   :  { %v153_v5 = vmul.f32 %v6533_v63, %v152_v3  ;;  %v448_v6 = vsel %vm447_vm8, %v6531_v51, %v444_v2  ;;  %v182_v45 = vmul.f32 %v6537_v37, %v146_v9  ;;  %vm179_vm2 = vmor %vm177_vm14, %vm178_vm15  ;;  %vm188_vm4 = vweird.f32 %v6537_v37 }
 0x230   :  { %v129_v11 = vsel %vm55_vm0, %v109_v4, 0.0  ;;  %v492_v14 = vmul.f32 %v448_v6, %v7016_v23  ;;  %v173_v31 = vmul.f32 %v6535_v7, %v172_v20  ;;  %vm189_vm6 = vmor %vm187_vm3, %vm188_vm4 }
 0x231   :  { %v154_v15 = vmul.f32 0.5, %v153_v5  ;;  %v116_v17 = vpop.xlane.xlu1 %115  ;;  %130 = vadd.xlane.f32.xlu1 %v129_v11  ;;  %v183_v49 = vmul.f32 %v6537_v37, %v182_v45 }
 0x232   :  { %v136_v8 = vmul.f32 %v116_v17, %v7005_v16  ;;  %v504_v18 = vmul.f32 %v7104_v13, %v492_v14  ;;  %v174_v41 = vmul.f32 0.5, %v173_v31  ;;  %v79_v17 = vpop.xlane.xlu2 %78 }
 0x233   :  { %v155_v21 = vsub.f32 1.5, %v154_v15  ;;  %v184_v53 = vmul.f32 0.5, %v183_v49 }
 0x234   :  { %v144_v25 = vadd.f32 1e-05, %v136_v8  ;;  %v516_v19 = vadd.f32 %v7102_v12, %v504_v18 }
 0x235   :  { %v156_v30 = vmul.f32 %v6533_v63, %v155_v21  ;;  %v185_v59 = vsub.f32 1.5, %v184_v53 }
 0x236   :  { %6538 = vrsqrt.f32 %v144_v25  ;;  %535 = vrot.lane.b32.xlu2 %v516_v19, %s6891_s27  ;;  %vm167_vm12 = vweird.f32 %v144_v25 }
 0x237   :  { %v160_v23 = vsel %vm159_vm11, %v6533_v63, %v156_v30  ;;  %v186_v0 = vmul.f32 %v6537_v37, %v185_v59 }
 0x238   :  { %v231_v33 = vmul.f32 %v160_v23, %v7084_v55  ;;  %v175_v55 = vsub.f32 1.5, %v174_v41 }
 0x239   :  { %v190_v3 = vsel %vm189_vm6, %v6537_v37, %v186_v0 }
 0x23a   :  { %v240_v38 = vmul.f32 %v7049_v34, %v231_v33  ;;  %v176_v52 = vmul.f32 %v6535_v7, %v175_v55  ;;  %v234_v5 = vmul.f32 %v190_v3, %v7075_v47  ;;  %v94_v47 = vmul.f32 %v7005_v16, %v79_v17 }
 0x23c   :  { %v6539_v39 = vpop.eup %6538  ;;  %v7171_v43 = vadd.f32 %v7040_v29, %v240_v38  ;;  %v180_v61 = vsel %vm179_vm2, %v6535_v7, %v176_v52  ;;  %v243_v9 = vmul.f32 %v7049_v34, %v234_v5  ;;  %v7210_v20 = vsub.f32 %v7033_v28, %v94_v47  ;;  %v659_v38 = vld [vmem:[%s9768_s3] sm:$0xf] }
 0x23d   :  { %v162_v46 = vmul.f32 %v6539_v39, %v144_v25  ;;  %vm168_vm13 = vweird.f32 %v6539_v39  ;;  %v233_v63 = vmul.f32 %v180_v61, %v7069_v42  ;;  %6132 = vmatpush.msk.msrb.mxu1 %vm590_vm5, %v659_v38 }
 0x23e   :  { %6116 = vmatmul.msk.f32.vlgmr.msra.gmra.mxu0 %vm55_vm0, %v7171_v43  ;;  %359 = vrot.lane.b32.xlu2 %v336_v44, %s6891_s27  ;;  %vm169_vm1 = vmor %vm167_vm12, %vm168_vm13  ;;  %v7204_v15 = vadd.f32 %v7040_v29, %v243_v9  ;;  %v110_v25 = vmul.f32 %v7210_v20, %v7210_v20 }
 0x23f   :  { %v163_v48 = vmul.f32 %v6539_v39, %v162_v46 }
 0x240   :  { %v132_v23 = vsel %vm55_vm0, %v110_v25, 0.0 }
 0x241   :  { %v164_v50 = vmul.f32 0.5, %v163_v48 }
 0x243   :  { %v165_v51 = vsub.f32 1.5, %v164_v50 }
 0x245   :  { %v166_v56 = vmul.f32 %v6539_v39, %v165_v51 }
 0x246   :  { %273 = vrot.lane.b32.xlu2 %v7056_v35, %s6891_s27 }
 0x247   :  { %v170_v57 = vsel %vm169_vm1, %v6539_v39, %v166_v56 }
 0x248   :  { %v232_v58 = vmul.f32 %v170_v57, %v7092_v60  ;;  %v242_v60 = vmul.f32 %v7049_v34, %v233_v63 }
 0x24a   :  { %v241_v62 = vmul.f32 %v7049_v34, %v232_v58  ;;  %v7195_v4 = vadd.f32 %v7040_v29, %v242_v60 }
 0x24c   :  { %v7184_v54 = vadd.f32 %v7040_v29, %v241_v62 }
 0x24e   :  { %6117 = vmatmul.msk.f32.gmra.mxu0 %vm55_vm0, %v7184_v54  ;;  %v7189_v2 = vpop.permute.xlu1 %533 }
 0x24f   :  { %6126 = vmatmul.msk.f32.vlgmr.msra.gmra.mxu1 %vm55_vm0, %v7189_v2 }
 0x256   :  { %6118 = vmatmul.msk.f32.gmra.mxu0 %vm55_vm0, %v7195_v4  ;;  %v358_v42 = vpop.permute.xlu1 %357 }
 0x257   :  { %v387_v6 = vsel %vm55_vm0, %v358_v42, 0.0 }
 0x258   :  { %388 = vadd.xlane.f32.xlu0 %v387_v6  ;;  %v125_v7 = vpop.xlane.xlu0 %124 }
 0x259   :  { %v139_v11 = vmul.f32 %v125_v7, %v7005_v16 }
 0x25b   :  { %v147_v14 = vadd.f32 1e-05, %v139_v11 }
 0x25d   :  { %6540 = vrsqrt.f32 %v147_v14  ;;  %vm197_vm7 = vweird.f32 %v147_v14 }
 0x25e   :  { %6119 = vmatmul.msk.f32.gmra.mxu0 %vm55_vm0, %v7204_v15 }
 0x263   :  { %v6541_v8 = vpop.eup %6540 }
 0x264   :  { %v192_v18 = vmul.f32 %v6541_v8, %v147_v14  ;;  %vm198_vm8 = vweird.f32 %v6541_v8 }
 0x265   :  { %vm199_vm9 = vmor %vm197_vm7, %vm198_vm8  ;;  %vm805_vm8 = vcmask 64512  }
 0x266   :  { %v193_v21 = vmul.f32 %v6541_v8, %v192_v18 }
 0x268   :  { %v194_v24 = vmul.f32 0.5, %v193_v21 }
 0x26a   :  { %v195_v19 = vsub.f32 1.5, %v194_v24 }
 0x26c   :  { %v196_v30 = vmul.f32 %v6541_v8, %v195_v19 }
 0x26e   :  { %v200_v31 = vsel %vm199_vm9, %v6541_v8, %v196_v30 }
 0x26f   :  { %133 = vadd.xlane.f32.xlu2 %v132_v23  ;;  %v235_v33 = vmul.f32 %v200_v31, %v7116_v27 }
 0x271   :  { %v244_v37 = vmul.f32 %v7049_v34, %v235_v33 }
 0x273   :  { %v7218_v28 = vadd.f32 %v7040_v29, %v244_v37 }
 0x275   :  { %6120 = vmatmul.msk.f32.gmra.mxu0 %vm55_vm0, %v7218_v28 }
 0x278   :  { %v128_v39 = vpop.xlane.xlu0 %127 }
 0x279   :  { %v140_v41 = vmul.f32 %v128_v39, %v7005_v16 }
 0x27b   :  { %v148_v44 = vadd.f32 1e-05, %v140_v41 }
 0x27d   :  { %6542 = vrsqrt.f32 %v148_v44  ;;  %vm207_vm10 = vweird.f32 %v148_v44 }
 0x283   :  { %v6543_v27 = vpop.eup %6542 }
 0x284   :  { %v202_v45 = vmul.f32 %v6543_v27, %v148_v44  ;;  %vm208_vm11 = vweird.f32 %v6543_v27 }
 0x285   :  { %vm209_vm12 = vmor %vm207_vm10, %vm208_vm11 }
 0x286   :  { %v203_v46 = vmul.f32 %v6543_v27, %v202_v45 }
 0x288   :  { %v204_v48 = vmul.f32 0.5, %v203_v46 }
 0x28a   :  { %v205_v55 = vsub.f32 1.5, %v204_v48 }
 0x28b   :  { %v266_v56 = vpop.permute.xlu0 %265 }
 0x28c   :  { %v206_v49 = vmul.f32 %v6543_v27, %v205_v55  ;;  %v289_v61 = vsel %vm55_vm0, %v266_v56, 0.0 }
 0x28e   :  { %v210_v50 = vsel %vm209_vm12, %v6543_v27, %v206_v49 }
 0x28f   :  { %v236_v51 = vmul.f32 %v210_v50, %v7126_v36 }
 0x290   :  { %v7228_v52 = vpop.permute.xlu2 %535 }
 0x291   :  { %6127 = vmatmul.msk.f32.gmra.mxu1 %vm55_vm0, %v7228_v52  ;;  %v245_v53 = vmul.f32 %v7049_v34, %v236_v51 }
 0x293   :  { %v7234_v57 = vadd.f32 %v7040_v29, %v245_v53  ;;  %v268_v59 = vpop.permute.xlu0 %267 }
 0x294   :  { %v292_v42 = vsel %vm55_vm0, %v268_v59, 0.0  ;;  %v7284_v59 = vld [vmem:[%s9769_s4] ss:$0 sm:$0xff] }
 0x295   :  { %6121 = vmatmul.msk.f32.gmra.mxu0 %vm55_vm0, %v7234_v57 }
 0x298   :  { %v360_v58 = vpop.permute.xlu2 %359 }
 0x299   :  { %6133 = vmatmul.msk.f32.vlgmr.msrb.gmra.mxu1 %vm55_vm0, %v7171_v43  ;;  %v390_v36 = vsel %vm55_vm0, %v360_v58, 0.0 }
 0x29a   :  { %391 = vadd.xlane.f32.xlu1 %v390_v36 }
 0x29b   :  { %v276_v60 = vpop.permute.xlu0 %275 }
 0x29c   :  { %v304_v6 = vsel %vm55_vm0, %v276_v60, 0.0 }
 0x2a0   :  { %v274_v62 = vpop.permute.xlu2 %273 }
 0x2a1   :  { %6134 = vmatmul.msk.f32.gmra.mxu1 %vm55_vm0, %v7184_v54  ;;  %v301_v63 = vsel %vm55_vm0, %v274_v62, 0.0 }
 0x2a2   :  { %290 = vadd.xlane.f32.xlu1 %v289_v61  ;;  %302 = vadd.xlane.f32.xlu2 %v301_v63 }
 0x2a4   :  { %v131_v0 = vpop.xlane.xlu1 %130 }
 0x2a5   :  { %v141_v3 = vmul.f32 %v131_v0, %v7005_v16 }
 0x2a7   :  { %v149_v5 = vadd.f32 1e-05, %v141_v3 }
 0x2a9   :  { %6544 = vrsqrt.f32 %v149_v5  ;;  %6135 = vmatmul.msk.f32.gmra.mxu1 %vm55_vm0, %v7195_v4  ;;  %vm217_vm13 = vweird.f32 %v149_v5 }
 0x2aa   :  { %293 = vadd.xlane.f32.xlu1 %v292_v42  ;;  %305 = vadd.xlane.f32.xlu2 %v304_v6 }
 0x2af   :  { %v6545_v7 = vpop.eup %6544 }
 0x2b0   :  { %v212_v9 = vmul.f32 %v6545_v7, %v149_v5  ;;  %vm218_vm14 = vweird.f32 %v6545_v7 }
 0x2b1   :  { %6136 = vmatmul.msk.f32.gmra.mxu1 %vm55_vm0, %v7204_v15  ;;  %vm219_vm15 = vmor %vm217_vm13, %vm218_vm14 }
 0x2b2   :  { %v213_v11 = vmul.f32 %v6545_v7, %v212_v9 }
 0x2b4   :  { %v214_v14 = vmul.f32 0.5, %v213_v11 }
 0x2b6   :  { %v215_v17 = vsub.f32 1.5, %v214_v14 }
 0x2b8   :  { %v216_v47 = vmul.f32 %v6545_v7, %v215_v17 }
 0x2b9   :  { %6137 = vmatmul.msk.f32.gmra.mxu1 %vm55_vm0, %v7218_v28 }
 0x2ba   :  { %v220_v8 = vsel %vm219_vm15, %v6545_v7, %v216_v47 }
 0x2bb   :  { %v237_v18 = vmul.f32 %v220_v8, %v7153_v1 }
 0x2bd   :  { %v246_v21 = vmul.f32 %v7049_v34, %v237_v18 }
 0x2bf   :  { %v7257_v24 = vadd.f32 %v7040_v29, %v246_v21 }
 0x2c1   :  { %6122 = vmatmul.msk.f32.gmra.mxu0 %vm55_vm0, %v7257_v24  ;;  %6138 = vmatmul.msk.f32.gmra.mxu1 %vm55_vm0, %v7234_v57 }
 0x2c9   :  { %6139 = vmatmul.msk.f32.gmra.mxu1 %vm55_vm0, %v7257_v24 }
 0x2cb   :  { %v389_v31 = vpop.xlane.xlu0 %388 }
 0x2cc   :  { %v399_v37 = vmul.f32 %v389_v31, %v7005_v16  ;;  %v7276_v50 = vpop.f32.mrf.mxu1 }
 0x2ce   :  { %v407_v41 = vadd.f32 1e-05, %v399_v37 }
 0x2d0   :  { %vm475_vm4 = vweird.f32 %v407_v41 }
 0x2e2   :  { %v134_v25 = vpop.xlane.xlu2 %133 }
 0x2e3   :  { %v142_v19 = vmul.f32 %v134_v25, %v7005_v16 }
 0x2e5   :  { %v150_v30 = vadd.f32 1e-05, %v142_v19 }
 0x2e7   :  { %6546 = vrsqrt.f32 %v150_v30  ;;  %vm227_vm1 = vweird.f32 %v150_v30 }
 0x2e8   :  { %6548 = vrsqrt.f32 %v407_v41 }
 0x2ed   :  { %v6547_v1 = vpop.eup %6546 }
 0x2ee   :  { %v222_v23 = vmul.f32 %v6547_v1, %v150_v30  ;;  %vm228_vm2 = vweird.f32 %v6547_v1  ;;  %v6549_v55 = vpop.eup %6548 }
 0x2ef   :  { %vm229_vm3 = vmor %vm227_vm1, %vm228_vm2  ;;  %v470_v49 = vmul.f32 %v6549_v55, %v407_v41  ;;  %vm476_vm6 = vweird.f32 %v6549_v55 }
 0x2f0   :  { %v223_v33 = vmul.f32 %v6547_v1, %v222_v23  ;;  %vm7286_vm7 = vmor %vm475_vm4, %vm476_vm6 }
 0x2f1   :  { %v471_v51 = vmul.f32 %v6549_v55, %v470_v49 }
 0x2f2   :  { %v224_v38 = vmul.f32 0.5, %v223_v33 }
 0x2f3   :  { %v472_v53 = vmul.f32 0.5, %v471_v51 }
 0x2f4   :  { %v225_v39 = vsub.f32 1.5, %v224_v38 }
 0x2f6   :  { %v226_v44 = vmul.f32 %v6547_v1, %v225_v39 }
 0x2f8   :  { %v230_v27 = vsel %vm229_vm3, %v6547_v1, %v226_v44 }
 0x2f9   :  { %v238_v45 = vmul.f32 %v230_v27, %v7210_v20 }
 0x2fb   :  { %v247_v46 = vmul.f32 %v7049_v34, %v238_v45  ;;  %v473_v34 = vsub.f32 1.5, %v472_v53 }
 0x2fd   :  { %v7270_v48 = vadd.f32 %v7040_v29, %v247_v46  ;;  %v474_v36 = vmul.f32 %v6549_v55, %v473_v34  ;;  %v611_v34 = vpop.f32.mrf.mxu0 }
 0x2ff   :  { %6123 = vmatmul.msk.f32.gmra.mxu0 %vm55_vm0, %v7270_v48  ;;  %6140 = vmatmul.msk.f32.gmra.mxu1 %vm55_vm0, %v7270_v48  ;;  %v478_v42 = vsel %vm7286_vm7, %v6549_v55, %v474_v36  ;;  %v7353_v36 = vld [vmem:[%s9767_s2] ss:$0 sm:$0xff] }
 0x300   :  { %v495_v47 = vmul.f32 %v478_v42, %v7112_v22  ;;  %v7356_v61 = vadd.f32 %v7353_v36, %v611_v34 }
 0x302   :  { %v507_v25 = vmul.f32 %v7104_v13, %v495_v47 }
 0x304   :  { %v519_v31 = vadd.f32 %v7102_v12, %v507_v25 }
 0x30d   :  { %v392_v56 = vpop.xlane.xlu1 %391 }
 0x30e   :  { %v400_v20 = vmul.f32 %v392_v56, %v7005_v16  ;;  %v7279_v58 = vpop.f32.mrf.mxu1 }
 0x310   :  { %v408_v29 = vadd.f32 1e-05, %v400_v20 }
 0x312   :  { %6550 = vrsqrt.f32 %v408_v29  ;;  %vm485_vm10 = vweird.f32 %v408_v29 }
 0x315   :  { %v291_v62 = vpop.xlane.xlu1 %290  ;;  %v303_v63 = vpop.xlane.xlu2 %302 }
 0x316   :  { %v313_v0 = vmul.f32 %v291_v62, %v7005_v16  ;;  %v317_v60 = vmul.f32 %v303_v63, %v7005_v16  ;;  %v684_v3 = vpop.f32.mrf.mxu1  ;;  %v614_v63 = vpop.f32.mrf.mxu0 }
 0x317   :  { %v7293_v5 = vadd.f32 %v7284_v59, %v684_v3 }
 0x318   :  { %v6551_v6 = vpop.eup %6550  ;;  %v7298_v7 = vsub.f32 %v7026_v26, %v313_v0  ;;  %v7301_v9 = vsub.f32 %v7056_v35, %v317_v60  ;;  %v7366_v60 = vadd.f32 %v7353_v36, %v614_v63 }
 0x319   :  { %v480_v11 = vmul.f32 %v6551_v6, %v408_v29  ;;  %6166 = vmatpush.xpose.msk.msrb.mxu3 %vm805_vm8, %v7293_v5  ;;  %vm486_vm9 = vweird.f32 %v6551_v6 }
 0x31a   :  { %v329_v14 = vmul.f32 %v7298_v7, %v7298_v7  ;;  %v333_v17 = vmul.f32 %v7301_v9, %v7301_v9  ;;  %vm487_vm11 = vmor %vm485_vm10, %vm486_vm9 }
 0x31b   :  { %v481_v8 = vmul.f32 %v6551_v6, %v480_v11 }
 0x31c   :  { %345 = vrot.lane.b32.xlu1 %v329_v14, %s6891_s27  ;;  %353 = vrot.lane.b32.xlu2 %v333_v17, %s6891_s27 }
 0x31d   :  { %v482_v26 = vmul.f32 0.5, %v481_v8  ;;  %v294_v35 = vpop.xlane.xlu1 %293  ;;  %v306_v18 = vpop.xlane.xlu2 %305 }
 0x31e   :  { %v314_v21 = vmul.f32 %v294_v35, %v7005_v16  ;;  %v318_v19 = vmul.f32 %v306_v18, %v7005_v16  ;;  %v687_v46 = vpop.f32.mrf.mxu1 }
 0x31f   :  { %v483_v30 = vsub.f32 1.5, %v482_v26 }
 0x320   :  { %v7316_v1 = vsub.f32 %v6999_v10, %v314_v21  ;;  %v7319_v22 = vsub.f32 %v7064_v40, %v318_v19 }
 0x321   :  { %v484_v23 = vmul.f32 %v6551_v6, %v483_v30 }
 0x322   :  { %v330_v33 = vmul.f32 %v7316_v1, %v7316_v1  ;;  %v334_v37 = vmul.f32 %v7319_v22, %v7319_v22 }
 0x323   :  { %v488_v38 = vsel %vm487_vm11, %v6551_v6, %v484_v23  ;;  %v617_v6 = vpop.f32.mrf.mxu0 }
 0x324   :  { %541 = vrot.lane.b32.xlu1 %v519_v31, %s6891_s27  ;;  %347 = vrot.lane.b32.xlu0 %v330_v33, %s6891_s27  ;;  %v496_v10 = vmul.f32 %v488_v38, %v7166_v32  ;;  %v7336_v32 = vadd.f32 %v7284_v59, %v687_v46  ;;  %v7376_v11 = vadd.f32 %v7353_v36, %v617_v6 }
 0x325   :  { %355 = vrot.lane.b32.xlu2 %v334_v37, %s6891_s27 }
 0x326   :  { %v508_v40 = vmul.f32 %v7104_v13, %v496_v10  ;;  %v690_v20 = vpop.f32.mrf.mxu1  ;;  %9814 = vst [vmem:[#allocation4_spill] sm:$0xff] %v7376_v11 }
 0x327   :  { %v7359_v0 = vadd.f32 %v7284_v59, %v690_v20 }
 0x328   :  { %v520_v39 = vadd.f32 %v7102_v12, %v508_v40 }
 0x32b   :  { %v620_v47 = vpop.f32.mrf.mxu0 }
 0x32c   :  { %543 = vrot.lane.b32.xlu1 %v520_v39, %s6891_s27  ;;  %v7386_v8 = vadd.f32 %v7353_v36, %v620_v47 }
 0x32e   :  { %v693_v62 = vpop.f32.mrf.mxu1  ;;  %9815 = vst [vmem:[#allocation5_spill] sm:$0xff] %v7386_v8 }
 0x32f   :  { %v7369_v3 = vadd.f32 %v7284_v59, %v693_v62 }
 0x333   :  { %v623_v35 = vpop.f32.mrf.mxu0 }
 0x334   :  { %v7396_v21 = vadd.f32 %v7353_v36, %v623_v35 }
 0x336   :  { %v696_v42 = vpop.f32.mrf.mxu1  ;;  %9816 = vst [vmem:[#allocation6_spill] sm:$0xff] %v7396_v21 }
 0x337   :  { %v7379_v14 = vadd.f32 %v7284_v59, %v696_v42 }
 0x33b   :  { %v626_v19 = vpop.f32.mrf.mxu0 }
 0x33c   :  { %v7406_v23 = vadd.f32 %v7353_v36, %v626_v19 }
 0x33e   :  { %v699_v17 = vpop.f32.mrf.mxu1  ;;  %9817 = vst [vmem:[#allocation7_spill] sm:$0xff] %v7406_v23 }
 0x33f   :  { %v7389_v26 = vadd.f32 %v7284_v59, %v699_v17 }
 0x343   :  { %v629_v33 = vpop.f32.mrf.mxu0 }
 0x344   :  { %v7416_v37 = vadd.f32 %v7353_v36, %v629_v33 }
 0x346   :  { %v702_v18 = vpop.f32.mrf.mxu1 }
 0x347   :  { %v7399_v25 = vadd.f32 %v7284_v59, %v702_v18 }
 0x376   :  { %v354_v41 = vpop.permute.xlu2 %353 }
 0x377   :  { %v381_v44 = vsel %vm55_vm0, %v354_v41, 0.0 }
 0x378   :  { %382 = vadd.xlane.f32.xlu2 %v381_v44 }
 0x37c   :  { %v705_v30 = vpop.f32.mrf.mxu1  ;;  %v632_v38 = vpop.f32.mrf.mxu0 }
 0x37d   :  { %v7409_v31 = vadd.f32 %v7284_v59, %v705_v30  ;;  %v7421_v10 = vadd.f32 %v7353_v36, %v632_v38 }
 0x37f   :  { %v356_v55 = vpop.permute.xlu2 %355 }
 0x380   :  { %v384_v53 = vsel %vm55_vm0, %v356_v55, 0.0 }
 0x38e   :  { %v346_v27 = vpop.permute.xlu1 %345 }
 0x38f   :  { %v369_v45 = vsel %vm55_vm0, %v346_v27, 0.0 }
 0x390   :  { %370 = vadd.xlane.f32.xlu0 %v369_v45 }
 0x396   :  { %v348_v49 = vpop.permute.xlu0 %347  ;;  %v7338_v51 = vpop.permute.xlu1 %541 }
 0x397   :  { %6130 = vmatmul.msk.f32.vlgmr.msra.gmra.mxu3 %vm55_vm0, %v7338_v51  ;;  %v372_v56 = vsel %vm55_vm0, %v348_v49, 0.0 }
 0x398   :  { %6168 = vmatpush.xpose.msk.msra.mxu3 %vm805_vm8, %v7336_v32  ;;  %373 = vadd.xlane.f32.xlu1 %v372_v56 }
 0x399   :  { %385 = vadd.xlane.f32.xlu0 %v384_v53 }
 0x39e   :  { %v7346_v29 = vpop.permute.xlu1 %543 }
 0x39f   :  { %6131 = vmatmul.msk.f32.gmra.mxu3 %vm55_vm0, %v7346_v29 }
 0x3a7   :  { %6167 = vmatmul.msk.f32.vlgmr.msrb.gmra.mxu3 %vm805_vm8, %v7356_v61 }
 0x3a8   :  { %6170 = vmatpush.xpose.msk.msrb.mxu3 %vm805_vm8, %v7359_v0 }
 0x3af   :  { %6169 = vmatmul.msk.f32.vlgmr.msra.gmra.mxu3 %vm805_vm8, %v7366_v60 }
 0x3b0   :  { %6172 = vmatpush.xpose.msk.msra.mxu3 %vm805_vm8, %v7369_v3 }
 0x3b7   :  { %6171 = vmatmul.msk.f32.vlgmr.msrb.gmra.mxu3 %vm805_vm8, %v7376_v11 }
 0x3b8   :  { %6174 = vmatpush.xpose.msk.msrb.mxu3 %vm805_vm8, %v7379_v14 }
 0x3bf   :  { %6173 = vmatmul.msk.f32.vlgmr.msra.gmra.mxu3 %vm805_vm8, %v7386_v8 }
 0x3c0   :  { %6176 = vmatpush.xpose.msk.msra.mxu3 %vm805_vm8, %v7389_v26 }
 0x3c7   :  { %6175 = vmatmul.msk.f32.vlgmr.msrb.gmra.mxu3 %vm805_vm8, %v7396_v21 }
 0x3c8   :  { %6178 = vmatpush.xpose.msk.msrb.mxu3 %vm805_vm8, %v7399_v25 }
 0x3cf   :  { %6177 = vmatmul.msk.f32.vlgmr.msra.gmra.mxu3 %vm805_vm8, %v7406_v23 }
 0x3d0   :  { %6180 = vmatpush.xpose.msk.msra.mxu3 %vm805_vm8, %v7409_v31 }
 0x3d7   :  { %6179 = vmatmul.msk.f32.vlgmr.msrb.gmra.mxu3 %vm805_vm8, %v7416_v37 }
 0x3df   :  { %6181 = vmatmul.msk.f32.vlgmr.msra.gmra.mxu3 %vm805_vm8, %v7421_v10 }
 0x3eb   :  { %v383_v40 = vpop.xlane.xlu2 %382 }
 0x3ec   :  { %v397_v39 = vmul.f32 %v383_v40, %v7005_v16 }
 0x3ee   :  { %v405_v41 = vadd.f32 1e-05, %v397_v39 }
 0x3f0   :  { %6552 = vrsqrt.f32 %v405_v41  ;;  %vm455_vm12 = vweird.f32 %v405_v41 }
 0x3f6   :  { %v6553_v44 = vpop.eup %6552 }
 0x3f7   :  { %v450_v27 = vmul.f32 %v6553_v44, %v405_v41  ;;  %vm456_vm13 = vweird.f32 %v6553_v44 }
 0x3f8   :  { %vm457_vm14 = vmor %vm455_vm12, %vm456_vm13 }
 0x3f9   :  { %v451_v45 = vmul.f32 %v6553_v44, %v450_v27 }
 0x3fb   :  { %v452_v46 = vmul.f32 0.5, %v451_v45 }
 0x3fd   :  { %v453_v55 = vsub.f32 1.5, %v452_v46 }
 0x3ff   :  { %v454_v49 = vmul.f32 %v6553_v44, %v453_v55 }
 0x401   :  { %v458_v53 = vsel %vm457_vm14, %v6553_v44, %v454_v49 }
 0x402   :  { %v493_v56 = vmul.f32 %v458_v53, %v7301_v9 }
 0x403   :  { %v371_v20 = vpop.xlane.xlu0 %370 }
 0x404   :  { %v393_v34 = vmul.f32 %v371_v20, %v7005_v16  ;;  %v505_v62 = vmul.f32 %v7104_v13, %v493_v56 }
 0x406   :  { %v401_v63 = vadd.f32 1e-05, %v393_v34  ;;  %v517_v42 = vadd.f32 %v7102_v12, %v505_v62 }
 0x408   :  { %6554 = vrsqrt.f32 %v401_v63  ;;  %537 = vrot.lane.b32.xlu1 %v517_v42, %s6891_s27  ;;  %vm415_vm1 = vweird.f32 %v401_v63 }
 0x40b   :  { %v374_v6 = vpop.xlane.xlu1 %373 }
 0x40c   :  { %v394_v17 = vmul.f32 %v374_v6, %v7005_v16  ;;  %v386_v47 = vpop.xlane.xlu0 %385 }
 0x40d   :  { %v398_v35 = vmul.f32 %v386_v47, %v7005_v16 }
 0x40e   :  { %v6555_v18 = vpop.eup %6554  ;;  %v402_v19 = vadd.f32 1e-05, %v394_v17 }
 0x40f   :  { %v410_v9 = vmul.f32 %v6555_v18, %v401_v63  ;;  %v406_v30 = vadd.f32 1e-05, %v398_v35  ;;  %vm416_vm15 = vweird.f32 %v6555_v18 }
 0x410   :  { %6556 = vrsqrt.f32 %v402_v19  ;;  %vm417_vm2 = vmor %vm415_vm1, %vm416_vm15  ;;  %vm425_vm7 = vweird.f32 %v402_v19 }
 0x411   :  { %v411_v33 = vmul.f32 %v6555_v18, %v410_v9  ;;  %6558 = vrsqrt.f32 %v406_v30  ;;  %vm465_vm3 = vweird.f32 %v406_v30 }
 0x413   :  { %v412_v38 = vmul.f32 0.5, %v411_v33 }
 0x415   :  { %v413_v40 = vsub.f32 1.5, %v412_v38 }
 0x416   :  { %v6557_v39 = vpop.eup %6556 }
 0x417   :  { %v6559_v41 = vpop.eup %6558  ;;  %v414_v44 = vmul.f32 %v6555_v18, %v413_v40  ;;  %v420_v27 = vmul.f32 %v6557_v39, %v402_v19  ;;  %vm426_vm6 = vweird.f32 %v6557_v39 }
 0x418   :  { %v460_v45 = vmul.f32 %v6559_v41, %v406_v30  ;;  %vm466_vm4 = vweird.f32 %v6559_v41  ;;  %vm427_vm10 = vmor %vm425_vm7, %vm426_vm6 }
 0x419   :  { %v421_v46 = vmul.f32 %v6557_v39, %v420_v27  ;;  %v418_v55 = vsel %vm417_vm2, %v6555_v18, %v414_v44  ;;  %vm467_vm9 = vmor %vm465_vm3, %vm466_vm4 }
 0x41a   :  { %v461_v49 = vmul.f32 %v6559_v41, %v460_v45  ;;  %v7433_v53 = vpop.f32.mrf.mxu3  ;;  %v489_v56 = vmul.f32 %v418_v55, %v7298_v7 }
 0x41b   :  { %v422_v20 = vmul.f32 0.5, %v421_v46 }
 0x41c   :  { %v462_v34 = vmul.f32 0.5, %v461_v49  ;;  %v501_v62 = vmul.f32 %v7104_v13, %v489_v56  ;;  %v732_v56 = vld [vmem:[%s9770_s5] sm:$0xf] }
 0x41d   :  { %v423_v42 = vsub.f32 1.5, %v422_v20  ;;  %6149 = vmatpush.msk.msrb.mxu2 %vm590_vm5, %v732_v56 }
 0x41e   :  { %v463_v6 = vsub.f32 1.5, %v462_v34  ;;  %v513_v63 = vadd.f32 %v7102_v12, %v501_v62 }
 0x41f   :  { %v424_v17 = vmul.f32 %v6557_v39, %v423_v42 }
 0x420   :  { %v464_v47 = vmul.f32 %v6559_v41, %v463_v6  ;;  %529 = vrot.lane.b32.xlu2 %v513_v63, %s6891_s27 }
 0x421   :  { %v428_v35 = vsel %vm427_vm10, %v6557_v39, %v424_v17 }
 0x422   :  { %v7439_v7 = vpop.f32.mrf.mxu3  ;;  %v490_v18 = vmul.f32 %v428_v35, %v7316_v1  ;;  %v468_v9 = vsel %vm467_vm9, %v6559_v41, %v464_v47 }
 0x423   :  { %v494_v30 = vmul.f32 %v468_v9, %v7319_v22 }
 0x424   :  { %v502_v33 = vmul.f32 %v7104_v13, %v490_v18 }
 0x425   :  { %v506_v38 = vmul.f32 %v7104_v13, %v494_v30 }
 0x426   :  { %v514_v40 = vadd.f32 %v7102_v12, %v502_v33 }
 0x427   :  { %v518_v19 = vadd.f32 %v7102_v12, %v506_v38 }
 0x428   :  { %531 = vrot.lane.b32.xlu0 %v514_v40, %s6891_s27 }
 0x429   :  { %539 = vrot.lane.b32.xlu2 %v518_v19, %s6891_s27 }
 0x42a   :  { %v7449_v39 = vpop.f32.mrf.mxu3 }
 0x431   :  { %1352 = vrot.lane.b32.xlu2 %v7376_v11, %s6894_s18 }
 0x432   :  { %v7453_v1 = vpop.f32.mrf.mxu3 }
 0x433   :  { %v1015_v38 = vmul.f32 0.35355338, %v7453_v1 }
 0x435   :  { %v1025_v40 = vsel %vm805_vm8, %v1015_v38, -inf }
 0x43a   :  { %v881_v22 = vpop.f32.mrf.mxu3 }
 0x43b   :  { %v7459_v27 = vmul.f32 0.35355338, %v881_v22  ;;  %v1014_v22 = vmul.f32 0.35355338, %v7449_v39 }
 0x43d   :  { %v1028_v12 = vsel %vm805_vm8, %v7459_v27, -inf }
 0x442   :  { %v7455_v41 = vpop.f32.mrf.mxu3 }
 0x443   :  { %v1017_v56 = vmul.f32 0.35355338, %v7455_v41 }
 0x44a   :  { %v7457_v13 = vpop.f32.mrf.mxu3 }
 0x452   :  { %v959_v44 = vpop.f32.mrf.mxu3 }
 0x453   :  { %v7465_v46 = vmul.f32 0.35355338, %v959_v44  ;;  %v7568_v44 = vmul.f32 0.35355338, %v7457_v13  ;;  %v1031_v13 = vsel %vm805_vm8, %v1017_v56, -inf }
 0x455   :  { %v1037_v55 = vsel %vm805_vm8, %v7465_v46, -inf }
 0x45a   :  { %1029 = vmax.xlane.f32.xlu2 %v1028_v12  ;;  %v7463_v45 = vpop.f32.mrf.mxu3  ;;  %v1022_v12 = vsel %vm805_vm8, %v1014_v22, -inf }
 0x462   :  { %1038 = vmax.xlane.f32.xlu2 %v1037_v55  ;;  %v1011_v49 = vpop.f32.mrf.mxu3  ;;  %v1034_v55 = vsel %vm805_vm8, %v7568_v44, -inf }
 0x463   :  { %v7472_v20 = vmul.f32 0.35355338, %v1011_v49 }
 0x465   :  { %v1043_v34 = vsel %vm805_vm8, %v7472_v20, -inf }
 0x46a   :  { %1044 = vmax.xlane.f32.xlu2 %v1043_v34 }
 0x47a   :  { %v538_v62 = vpop.permute.xlu1 %537  ;;  %v530_v42 = vpop.permute.xlu2 %529 }
 0x47b   :  { %6124 = vmatmul.msk.f32.gmra.mxu0 %vm55_vm0, %v530_v42  ;;  %6128 = vmatmul.msk.f32.vlgmr.msra.gmra.mxu2 %vm55_vm0, %v538_v62 }
 0x47c   :  { %6141 = vmatmul.msk.f32.gmra.mxu1 %vm55_vm0, %v530_v42 }
 0x483   :  { %v540_v6 = vpop.permute.xlu2 %539 }
 0x484   :  { %6129 = vmatmul.msk.f32.gmra.mxu2 %vm55_vm0, %v540_v6 }
 0x48c   :  { %6150 = vmatmul.msk.f32.vlgmr.msrb.gmra.mxu2 %vm55_vm0, %v7171_v43 }
 0x494   :  { %6151 = vmatmul.msk.f32.gmra.mxu2 %vm55_vm0, %v7184_v54 }
 0x49a   :  { %v532_v63 = vpop.permute.xlu0 %531 }
 0x49b   :  { %6125 = vmatmul.msk.f32.gmra.mxu0 %vm55_vm0, %v532_v63  ;;  %6142 = vmatmul.msk.f32.gmra.mxu1 %vm55_vm0, %v532_v63 }
 0x49c   :  { %6152 = vmatmul.msk.f32.gmra.mxu2 %vm55_vm0, %v7195_v4 }
 0x4a3   :  { %6143 = vmatmul.msk.f32.gmra.mxu1 %vm55_vm0, %v7189_v2 }
 0x4a4   :  { %6153 = vmatmul.msk.f32.gmra.mxu2 %vm55_vm0, %v7204_v15 }
 0x4ab   :  { %6144 = vmatmul.msk.f32.gmra.mxu1 %vm55_vm0, %v7228_v52 }
 0x4ac   :  { %6154 = vmatmul.msk.f32.gmra.mxu2 %vm55_vm0, %v7218_v28 }
 0x4b3   :  { %6145 = vmatmul.msk.f32.gmra.mxu1 %vm55_vm0, %v538_v62 }
 0x4b4   :  { %6155 = vmatmul.msk.f32.gmra.mxu2 %vm55_vm0, %v7234_v57 }
 0x4bb   :  { %6146 = vmatmul.msk.f32.gmra.mxu1 %vm55_vm0, %v540_v6 }
 0x4bc   :  { %6156 = vmatmul.msk.f32.gmra.mxu2 %vm55_vm0, %v7257_v24 }
 0x4c3   :  { %6147 = vmatmul.msk.f32.gmra.mxu1 %vm55_vm0, %v7338_v51 }
 0x4c4   :  { %6157 = vmatmul.msk.f32.gmra.mxu2 %vm55_vm0, %v7270_v48 }
 0x4cb   :  { %6148 = vmatmul.msk.f32.gmra.mxu1 %vm55_vm0, %v7346_v29 }
 0x4cc   :  { %6158 = vmatmul.msk.f32.gmra.mxu2 %vm55_vm0, %v530_v42  ;;  %v7586_v42 = vmul.f32 0.35355338, %v7463_v45 }
 0x4d4   :  { %6159 = vmatmul.msk.f32.gmra.mxu2 %vm55_vm0, %v532_v63  ;;  %v1040_v63 = vsel %vm805_vm8, %v7586_v42, -inf }
 0x4dc   :  { %6160 = vmatmul.msk.f32.gmra.mxu2 %vm55_vm0, %v7189_v2  ;;  %v7528_v2 = vld [vmem:[%s9771_s6] ss:$0 sm:$0xff]  ;;  %s6895_s6 = smov 112  }
 0x4e4   :  { %6161 = vmatmul.msk.f32.gmra.mxu2 %vm55_vm0, %v7228_v52 }
 0x4ec   :  { %6162 = vmatmul.msk.f32.gmra.mxu2 %vm55_vm0, %v538_v62 }
 0x4f4   :  { %6163 = vmatmul.msk.f32.gmra.mxu2 %vm55_vm0, %v540_v6 }
 0x4f9   :  { %v7530_v15 = vpop.f32.mrf.mxu1 }
 0x4fc   :  { %6164 = vmatmul.msk.f32.gmra.mxu2 %vm55_vm0, %v7338_v51 }
 0x4fe   :  { %v7519_v43 = vpop.f32.mrf.mxu2 }
 0x504   :  { %6165 = vmatmul.msk.f32.gmra.mxu2 %vm55_vm0, %v7346_v29 }
 0x507   :  { %v7523_v54 = vpop.f32.mrf.mxu2 }
 0x50f   :  { %v757_v4 = vpop.f32.mrf.mxu2 }
 0x510   :  { %v7533_v28 = vadd.f32 %v7528_v2, %v757_v4 }
 0x512   :  { %1128 = vmatpush.msrb.mxu3 %v7533_v28 }
 0x517   :  { %v760_v52 = vpop.f32.mrf.mxu2 }
 0x518   :  { %v7537_v57 = vadd.f32 %v7528_v2, %v760_v52  ;;  %v7539_v24 = vpop.f32.mrf.mxu1 }
 0x51a   :  { %1151 = vmatpush.msra.mxu3 %v7537_v57 }
 0x51f   :  { %v7542_v48 = vpop.f32.mrf.mxu2 }
 0x520   :  { %v714_v51 = vpop.f32.mrf.mxu1 }
 0x521   :  { %v7545_v29 = vadd.f32 %v7284_v59, %v714_v51 }
 0x523   :  { %1355 = vrot.lane.b32.xlu1 %v7545_v29, %s6894_s18 }
 0x527   :  { %v7549_v17 = vpop.f32.mrf.mxu2 }
 0x528   :  { %v717_v47 = vpop.f32.mrf.mxu1 }
 0x529   :  { %v7552_v35 = vadd.f32 %v7284_v59, %v717_v47 }
 0x52b   :  { %1384 = vrot.lane.b32.xlu0 %v7552_v35, %s6894_s18 }
 0x52f   :  { %v7556_v18 = vpop.f32.mrf.mxu2 }
 0x537   :  { %v7558_v9 = vpop.f32.mrf.mxu2 }
 0x53f   :  { %v7560_v30 = vpop.f32.mrf.mxu2 }
 0x547   :  { %v7562_v33 = vpop.f32.mrf.mxu2 }
 0x54d   :  { %1026 = vmax.xlane.f32.xlu1 %v1025_v40 }
 0x54f   :  { %v781_v19 = vpop.f32.mrf.mxu2 }
 0x550   :  { %v7575_v1 = vadd.f32 %v7528_v2, %v781_v19 }
 0x555   :  { %1023 = vmax.xlane.f32.xlu0 %v1022_v12  ;;  %1035 = vmax.xlane.f32.xlu1 %v1034_v55 }
 0x557   :  { %v784_v49 = vpop.f32.mrf.mxu2 }
 0x558   :  { %v7578_v34 = vadd.f32 %v7528_v2, %v784_v49 }
 0x55a   :  { %9818 = vst [vmem:[#allocation8_spill] sm:$0xff] %v7578_v34  ;;  %v7582_v39 = vpack.i.bf16 %v7578_v34, %v7575_v1 }
 0x55c   :  { %9819 = vst [vmem:[#allocation9_spill] sm:$0xff] %v7582_v39 }
 0x55d   :  { %1032 = vmax.xlane.f32.xlu0 %v1031_v13  ;;  %v1353_v13 = vpop.permute.xlu2 %1352 }
 0x55f   :  { %v787_v62 = vpop.f32.mrf.mxu2 }
 0x560   :  { %v7589_v6 = vadd.f32 %v7528_v2, %v787_v62 }
 0x562   :  { %9820 = vst [vmem:[#allocation10_spill] sm:$0xff] %v7589_v6 }
 0x565   :  { %1041 = vmax.xlane.f32.xlu0 %v1040_v63  ;;  %v1030_v40 = vpop.xlane.xlu2 %1029 }
 0x567   :  { %v790_v4 = vpop.f32.mrf.mxu2 }
 0x568   :  { %v7596_v52 = vadd.f32 %v7528_v2, %v790_v4 }
 0x56a   :  { %9821 = vst [vmem:[#allocation11_spill] sm:$0xff] %v7596_v52  ;;  %v7600_v51 = vpack.i.bf16 %v7596_v52, %v7589_v6  ;;  %v1048_v52 = vsub.f32 %v7459_v27, %v1030_v40 }
 0x56c   :  { %9822 = vst [vmem:[#allocation12_spill] sm:$0xff] %v7600_v51 }
 0x56f   :  { %v793_v45 = vpop.f32.mrf.mxu2 }
 0x570   :  { %v7603_v47 = vadd.f32 %v7528_v2, %v793_v45 }
 0x572   :  { %9823 = vst [vmem:[#allocation13_spill] sm:$0xff] %v7603_v47 }
 0x577   :  { %v796_v19 = vpop.f32.mrf.mxu2 }
 0x578   :  { %v7608_v12 = vadd.f32 %v7528_v2, %v796_v19 }
 0x57a   :  { %9824 = vst [vmem:[#allocation14_spill] sm:$0xff] %v7608_v12  ;;  %v7612_v55 = vpack.i.bf16 %v7608_v12, %v7603_v47 }
 0x57c   :  { %9825 = vst [vmem:[#allocation15_spill] sm:$0xff] %v7612_v55 }
 0x595   :  { %v1356_v49 = vpop.permute.xlu1 %1355 }
 0x596   :  { %6194 = vmatpush.xpose.msk.msra.mxu2 %vm805_vm8, %v1356_v49 }
 0x599   :  { %6195 = vmatmul.msk.f32.vlgmr.msra.gmra.mxu2 %vm805_vm8, %v1353_v13  ;;  %v1058_v13 = vmul.f32 1.442695, %v1048_v52 }
 0x59d   :  { %v7616_v62 = vpop.permute.xlu0 %1384 }
 0x5c0   :  { %v1027_v63 = vpop.xlane.xlu1 %1026 }
 0x5c1   :  { %v1047_v4 = vsub.f32 %v1015_v38, %v1027_v63 }
 0x5c3   :  { %v1056_v45 = vmul.f32 1.442695, %v1047_v4 }
 0x5c5   :  { %6560 = vpow2.f32 %v1056_v45 }
 0x5c8   :  { %v1024_v41 = vpop.xlane.xlu0 %1023  ;;  %v1036_v63 = vpop.xlane.xlu1 %1035 }
 0x5c9   :  { %v1046_v19 = vsub.f32 %v1014_v22, %v1024_v41  ;;  %v1050_v4 = vsub.f32 %v7568_v44, %v1036_v63  ;;  %v7661_v63 = vadd.f32 %v7284_v59, %v7530_v15 }
 0x5cb   :  { %v7618_v16 = vpop.eup %6560  ;;  %v1054_v12 = vmul.f32 1.442695, %v1046_v19  ;;  %v1062_v45 = vmul.f32 1.442695, %v1050_v4 }
 0x5cc   :  { %v1073_v49 = vsel %vm805_vm8, %v7618_v16, 0.0 }
 0x5cd   :  { %6562 = vpow2.f32 %v1054_v12  ;;  %1074 = vadd.xlane.f32.xlu0 %v1073_v49 }
 0x5ce   :  { %6564 = vpow2.f32 %v1058_v13 }
 0x5d0   :  { %v1033_v47 = vpop.xlane.xlu0 %1032 }
 0x5d1   :  { %v1049_v6 = vsub.f32 %v1017_v56, %v1033_v47  ;;  %v7635_v56 = vpop.f32.mrf.mxu1 }
 0x5d3   :  { %v7623_v11 = vpop.eup %6562  ;;  %v1060_v38 = vmul.f32 1.442695, %v1049_v6 }
 0x5d4   :  { %v1070_v22 = vsel %vm805_vm8, %v7623_v11, 0.0  ;;  %v7627_v41 = vpop.eup %6564 }
 0x5d5   :  { %6566 = vpow2.f32 %v1060_v38  ;;  %1071 = vadd.xlane.f32.xlu1 %v1070_v22  ;;  %v1076_v52 = vsel %vm805_vm8, %v7627_v41, 0.0  ;;  %v1039_v38 = vpop.xlane.xlu2 %1038 }
 0x5d6   :  { %6568 = vpow2.f32 %v1062_v45 }
 0x5d8   :  { %v1042_v49 = vpop.xlane.xlu0 %1041 }
 0x5d9   :  { %v7639_v6 = vpop.f32.mrf.mxu1  ;;  %v1052_v22 = vsub.f32 %v7586_v42, %v1042_v49 }
 0x5db   :  { %v7629_v27 = vpop.eup %6566 }
 0x5dc   :  { %v1079_v40 = vsel %vm805_vm8, %v7629_v27, 0.0  ;;  %v7649_v19 = vpop.eup %6568 }
 0x5dd   :  { %1080 = vadd.xlane.f32.xlu2 %v1079_v40  ;;  %1077 = vadd.xlane.f32.xlu1 %v1076_v52  ;;  %v1082_v13 = vsel %vm805_vm8, %v7649_v19, 0.0  ;;  %v1051_v40 = vsub.f32 %v7465_v46, %v1039_v38  ;;  %v1066_v52 = vmul.f32 1.442695, %v1052_v22  ;;  %v1045_v42 = vpop.xlane.xlu2 %1044  ;;  %v7679_v38 = vadd.f32 %v7284_v59, %v7539_v24 }
 0x5de   :  { %v1053_v49 = vsub.f32 %v7472_v20, %v1045_v42 }
 0x5df   :  { %6570 = vpow2.f32 %v1066_v52 }
 0x5e1   :  { %1468 = vrot.lane.b32.xlu0 %v7416_v37, %s6894_s18  ;;  %v726_v47 = vpop.f32.mrf.mxu1 }
 0x5e2   :  { %v7642_v12 = vadd.f32 %v7284_v59, %v726_v47  ;;  %v1064_v47 = vmul.f32 1.442695, %v1051_v40 }
 0x5e4   :  { %6572 = vpow2.f32 %v1064_v47 }
 0x5e9   :  { %v729_v45 = vpop.f32.mrf.mxu1 }
 0x5ea   :  { %v7673_v15 = vadd.f32 %v7284_v59, %v729_v45 }
 0x5f5   :  { %1381 = vrot.lane.b32.xlu2 %v7386_v8, %s6894_s18  ;;  %v7655_v8 = vpop.eup %6570 }
 0x5f6   :  { %1471 = vrot.lane.b32.xlu1 %v7642_v12, %s6894_s18  ;;  %v7657_v44 = vpop.eup %6572  ;;  %v1088_v4 = vsel %vm805_vm8, %v7655_v8, 0.0 }
 0x5f7   :  { %v1085_v46 = vsel %vm805_vm8, %v7657_v44, 0.0 }
 0x60b   :  { %1083 = vadd.xlane.f32.xlu0 %v1082_v13  ;;  %v1068_v13 = vmul.f32 1.442695, %v1053_v49  ;;  %v7705_v49 = vadd.f32 %v7528_v2, %v7549_v17  ;;  %v7718_v17 = vadd.f32 %v7528_v2, %v7556_v18 }
 0x60d   :  { %6574 = vpow2.f32 %v1068_v13 }
 0x613   :  { %v7685_v22 = vpop.eup %6574 }
 0x614   :  { %v1091_v40 = vsel %vm805_vm8, %v7685_v22, 0.0 }
 0x61e   :  { %1089 = vadd.xlane.f32.xlu2 %v1088_v4  ;;  %v7696_v4 = vadd.f32 %v7528_v2, %v7542_v48 }
 0x61f   :  { %1297 = vrot.lane.b32.xlu0 %v7661_v63, %s6894_s18 }
 0x620   :  { %1086 = vadd.xlane.f32.xlu1 %v1085_v46 }
 0x636   :  { %1497 = vrot.lane.b32.xlu2 %v7421_v10, %s6894_s18 }
 0x639   :  { %1500 = vrot.lane.b32.xlu1 %v7673_v15, %s6894_s18 }
 0x63e   :  { %1326 = vrot.lane.b32.xlu2 %v7679_v38, %s6894_s18 }
 0x640   :  { %v1075_v24 = vpop.xlane.xlu0 %1074 }
 0x641   :  { %1294 = vrot.lane.b32.xlu1 %v7356_v61, %s6894_s18 }
 0x646   :  { %1410 = vrot.lane.b32.xlu2 %v7396_v21, %s6894_s18 }
 0x648   :  { %v1072_v20 = vpop.xlane.xlu1 %1071 }
 0x649   :  { %6576 = vrcp.f32 %v1072_v20  ;;  %1323 = vrot.lane.b32.xlu1 %v7366_v60, %s6894_s18  ;;  %1092 = vadd.xlane.f32.xlu0 %v1091_v40 }
 0x64a   :  { %6578 = vrcp.f32 %v1075_v24 }
 0x64f   :  { %v6577_v52 = vpop.eup %6576 }
 0x650   :  { %v1102_v47 = vmul.f32 %v6577_v52, %v7623_v11  ;;  %v1078_v46 = vpop.xlane.xlu1 %1077  ;;  %v6579_v42 = vpop.eup %6578  ;;  %v7710_v11 = vadd.f32 %v7284_v59, %v7635_v56  ;;  %v7723_v56 = vadd.f32 %v7284_v59, %v7639_v6 }
 0x651   :  { %1439 = vrot.lane.b32.xlu1 %v7406_v23, %s6894_s18  ;;  %6580 = vrcp.f32 %v1078_v46  ;;  %v1103_v45 = vmul.f32 %v6579_v42, %v7618_v16  ;;  %v1081_v48 = vpop.xlane.xlu2 %1080 }
 0x652   :  { %6182 = vmatmul.msk.f32.vlgmr.msrb.gmra.mxu3 %vm805_vm8, %v1102_v47  ;;  %6582 = vrcp.f32 %v1081_v48 }
 0x653   :  { %1174 = vmatpush.msrb.mxu3 %v7696_v4  ;;  %v1469_v18 = vpop.permute.xlu0 %1468 }
 0x657   :  { %v6581_v13 = vpop.eup %6580 }
 0x658   :  { %v1104_v16 = vmul.f32 %v6581_v13, %v7627_v41  ;;  %v6583_v20 = vpop.eup %6582  ;;  %v7731_v41 = vadd.f32 %v7528_v2, %v7558_v9 }
 0x659   :  { %v1105_v40 = vmul.f32 %v6583_v20, %v7629_v27  ;;  %v7740_v27 = vadd.f32 %v7528_v2, %v7560_v30  ;;  %v1382_v9 = vpop.permute.xlu2 %1381  ;;  %v7748_v30 = vadd.f32 %v7528_v2, %v7562_v33 }
 0x65a   :  { %6183 = vmatmul.msk.f32.vlgmr.msra.gmra.mxu3 %vm805_vm8, %v1103_v45 }
 0x65b   :  { %1197 = vmatpush.msra.mxu3 %v7705_v49  ;;  %9826 = vst [vmem:[#allocation16_spill] sm:$0xff] %v7748_v30 }
 0x65d   :  { %1413 = vrot.lane.b32.xlu0 %v7710_v11, %s6894_s18 }
 0x662   :  { %6184 = vmatmul.msk.f32.vlgmr.msrb.gmra.mxu3 %vm805_vm8, %v1104_v16 }
 0x663   :  { %1220 = vmatpush.msrb.mxu3 %v7718_v17 }
 0x665   :  { %1442 = vrot.lane.b32.xlu0 %v7723_v56, %s6894_s18 }
 0x668   :  { %v1472_v24 = vpop.permute.xlu1 %1471 }
 0x669   :  { %6202 = vmatpush.xpose.msk.msrb.mxu2 %vm805_vm8, %v1472_v24 }
 0x66a   :  { %6185 = vmatmul.msk.f32.vlgmr.msra.gmra.mxu3 %vm805_vm8, %v1105_v40 }
 0x66b   :  { %1243 = vmatpush.msra.mxu3 %v7731_v41 }
 0x66c   :  { %6203 = vmatmul.msk.f32.vlgmr.msrb.gmra.mxu2 %vm805_vm8, %v1469_v18 }
 0x67e   :  { %v1084_v59 = vpop.xlane.xlu0 %1083 }
 0x67f   :  { %6584 = vrcp.f32 %v1084_v59 }
 0x685   :  { %v6585_v6 = vpop.eup %6584 }
 0x686   :  { %v1106_v52 = vmul.f32 %v6585_v6, %v7649_v19 }
 0x688   :  { %6186 = vmatmul.msk.f32.vlgmr.msrb.gmra.mxu3 %vm805_vm8, %v1106_v52 }
 0x689   :  { %1266 = vmatpush.msrb.mxu3 %v7740_v27 }
 0x691   :  { %v1298_v47 = vpop.permute.xlu0 %1297  ;;  %v1090_v46 = vpop.xlane.xlu2 %1089 }
 0x692   :  { %6190 = vmatpush.xpose.msk.msrb.mxu0 %vm805_vm8, %v1298_v47 }
 0x693   :  { %v1087_v42 = vpop.xlane.xlu1 %1086 }
 0x694   :  { %6586 = vrcp.f32 %v1087_v42 }
 0x695   :  { %6588 = vrcp.f32 %v1090_v46  ;;  %v7772_v46 = vpop.f32.mrf.mxu2 }
 0x699   :  { %v1498_v45 = vpop.permute.xlu2 %1497 }
 0x69a   :  { %v6587_v48 = vpop.eup %6586 }
 0x69b   :  { %v1107_v19 = vmul.f32 %v6587_v48, %v7657_v44  ;;  %v6589_v13 = vpop.eup %6588 }
 0x69c   :  { %v1108_v20 = vmul.f32 %v6589_v13, %v7655_v8 }
 0x69d   :  { %6187 = vmatmul.msk.f32.vlgmr.msra.gmra.mxu3 %vm805_vm8, %v1107_v19  ;;  %v7775_v19 = vpop.f32.mrf.mxu2 }
 0x69e   :  { %1289 = vmatpush.msra.mxu3 %v7748_v30 }
 0x6a1   :  { %v1327_v16 = vpop.permute.xlu2 %1326 }
 0x6a2   :  { %6192 = vmatpush.xpose.msk.msra.mxu1 %vm805_vm8, %v1327_v16 }
 0x6a5   :  { %6188 = vmatmul.msk.f32.vlgmr.msrb.gmra.mxu3 %vm805_vm8, %v1108_v20  ;;  %v1378_v20 = vpop.f32.mrf.mxu2 }
 0x6a6   :  { %6196 = vmatpush.xpose.msk.msrb.mxu3 %vm805_vm8, %v7616_v62 }
 0x6a9   :  { %v1411_v62 = vpop.permute.xlu2 %1410 }
 0x6ab   :  { %v1501_v44 = vpop.permute.xlu1 %1500 }
 0x6b3   :  { %v1295_v40 = vpop.permute.xlu1 %1294 }
 0x6b4   :  { %6191 = vmatmul.msk.f32.vlgmr.msrb.gmra.mxu0 %vm805_vm8, %v1295_v40 }
 0x6bb   :  { %v1324_v33 = vpop.permute.xlu1 %1323 }
 0x6bc   :  { %v1093_v24 = vpop.xlane.xlu0 %1092  ;;  %6193 = vmatmul.msk.f32.vlgmr.msra.gmra.mxu1 %vm805_vm8, %v1324_v33 }
 0x6bd   :  { %6590 = vrcp.f32 %v1093_v24 }
 0x6c3   :  { %v6591_v18 = vpop.eup %6590  ;;  %v1440_v52 = vpop.permute.xlu1 %1439 }
 0x6c4   :  { %v1109_v59 = vmul.f32 %v6591_v18, %v7685_v22  ;;  %v7768_v22 = vpop.f32.mrf.mxu0 }
 0x6c6   :  { %6189 = vmatmul.msk.f32.vlgmr.msra.gmra.mxu3 %vm805_vm8, %v1109_v59 }
 0x6c7   :  { %6204 = vmatpush.xpose.msk.msra.mxu3 %vm805_vm8, %v1501_v44  ;;  %v1528_v44 = vmul.f32 0.35355338, %v1378_v20 }
 0x6c9   :  { %v1540_v40 = vsel %vm805_vm8, %v1528_v44, -inf }
 0x6cc   :  { %v7770_v47 = vpop.f32.mrf.mxu0 }
 0x6ce   :  { %6197 = vmatmul.msk.f32.vlgmr.msrb.gmra.mxu3 %vm805_vm8, %v1382_v9 }
 0x6cf   :  { %v1414_v8 = vpop.permute.xlu0 %1413 }
 0x6d0   :  { %6198 = vmatpush.xpose.msk.msra.mxu0 %vm805_vm8, %v1414_v8 }
 0x6d3   :  { %6199 = vmatmul.msk.f32.vlgmr.msra.gmra.mxu0 %vm805_vm8, %v1411_v62 }
 0x6d6   :  { %6205 = vmatmul.msk.f32.vlgmr.msra.gmra.mxu3 %vm805_vm8, %v1498_v45 }
 0x6d7   :  { %v1443_v6 = vpop.permute.xlu0 %1442 }
 0x6d8   :  { %6200 = vmatpush.xpose.msk.msrb.mxu1 %vm805_vm8, %v1443_v6 }
 0x6db   :  { %6201 = vmatmul.msk.f32.vlgmr.msrb.gmra.mxu1 %vm805_vm8, %v1440_v52 }
 0x6ef   :  { %v1494_v59 = vpop.f32.mrf.mxu2 }
 0x6f0   :  { %v1532_v8 = vmul.f32 0.35355338, %v1494_v59 }
 0x731   :  { %v1320_v9 = vpop.f32.mrf.mxu0 }
 0x732   :  { %v1526_v42 = vmul.f32 0.35355338, %v1320_v9  ;;  %v1552_v9 = vsel %vm805_vm8, %v1532_v8, -inf }
 0x734   :  { %v1534_v48 = vsel %vm805_vm8, %v1526_v42, -inf }
 0x735   :  { %1535 = vmax.xlane.f32.xlu0 %v1534_v48  ;;  %v7791_v48 = vpop.f32.mrf.mxu3 }
 0x736   :  { %9827 = vst [vmem:[#allocation17_spill] sm:$0xff] %v7791_v48 }
 0x739   :  { %v1349_v45 = vpop.f32.mrf.mxu1 }
 0x73a   :  { %v7777_v13 = vmul.f32 0.35355338, %v1349_v45 }
 0x73c   :  { %v1537_v16 = vsel %vm805_vm8, %v7777_v13, -inf }
 0x73d   :  { %1538 = vmax.xlane.f32.xlu2 %v1537_v16  ;;  %v7793_v45 = vpop.f32.mrf.mxu3 }
 0x73e   :  { %9828 = vst [vmem:[#allocation18_spill] sm:$0xff] %v7793_v45 }
 0x745   :  { %1541 = vmax.xlane.f32.xlu2 %v1540_v40  ;;  %v7795_v16 = vpop.f32.mrf.mxu3 }
 0x746   :  { %9829 = vst [vmem:[#allocation19_spill] sm:$0xff] %v7795_v16 }
 0x74d   :  { %v7797_v20 = vpop.f32.mrf.mxu3 }
 0x74e   :  { %9830 = vst [vmem:[#allocation20_spill] sm:$0xff] %v7797_v20 }
 0x750   :  { %v1436_v33 = vpop.f32.mrf.mxu0 }
 0x751   :  { %v7782_v24 = vmul.f32 0.35355338, %v1436_v33 }
 0x753   :  { %v1546_v18 = vsel %vm805_vm8, %v7782_v24, -inf }
 0x754   :  { %1547 = vmax.xlane.f32.xlu1 %v1546_v18 }
 0x755   :  { %v7799_v40 = vpop.f32.mrf.mxu3 }
 0x756   :  { %9831 = vst [vmem:[#allocation21_spill] sm:$0xff] %v7799_v40 }
 0x758   :  { %v1465_v62 = vpop.f32.mrf.mxu1 }
 0x759   :  { %v7786_v6 = vmul.f32 0.35355338, %v1465_v62 }
 0x75b   :  { %v1549_v52 = vsel %vm805_vm8, %v7786_v6, -inf }
 0x75c   :  { %1550 = vmax.xlane.f32.xlu0 %v1549_v52  ;;  %1553 = vmax.xlane.f32.xlu1 %v1552_v9 }
 0x75d   :  { %v7801_v33 = vpop.f32.mrf.mxu3 }
 0x75e   :  { %9832 = vst [vmem:[#allocation22_spill] sm:$0xff] %v7801_v33 }
 0x765   :  { %v7803_v59 = vpop.f32.mrf.mxu3 }
 0x766   :  { %9833 = vst [vmem:[#allocation23_spill] sm:$0xff] %v7803_v59 }
 0x76d   :  { %v7805_v9 = vpop.f32.mrf.mxu3 }
 0x76e   :  { %9834 = vst [vmem:[#allocation24_spill] sm:$0xff] %v7805_v9 }
 0x775   :  { %v1407_v40 = vpop.f32.mrf.mxu3 }
 0x7a8   :  { %v1536_v18 = vpop.xlane.xlu0 %1535 }
 0x7a9   :  { %v1558_v62 = vsub.f32 %v1526_v42, %v1536_v18 }
 0x7ab   :  { %v1566_v21 = vmul.f32 1.442695, %v1558_v62 }
 0x7ad   :  { %6592 = vpow2.f32 %v1566_v21  ;;  %v1523_v21 = vpop.f32.mrf.mxu3 }
 0x7ae   :  { %v7815_v62 = vmul.f32 0.35355338, %v1523_v21  ;;  %v7849_v21 = vadd.f32 %v7528_v2, %v7772_v46 }
 0x7b0   :  { %v1539_v52 = vpop.xlane.xlu2 %1538  ;;  %v1555_v9 = vsel %vm805_vm8, %v7815_v62, -inf  ;;  %9837 = vst [vmem:[#allocation27_spill] sm:$0xff] %v7849_v21 }
 0x7b3   :  { %v7807_v48 = vpop.eup %6592 }
 0x7b4   :  { %v1582_v45 = vsel %vm805_vm8, %v7807_v48, 0.0 }
 0x7b5   :  { %1583 = vadd.xlane.f32.xlu1 %v1582_v45 }
 0x7b8   :  { %v1542_v20 = vpop.xlane.xlu2 %1541 }
 0x7b9   :  { %v1560_v16 = vsub.f32 %v1528_v44, %v1542_v20 }
 0x7bb   :  { %v1570_v23 = vmul.f32 1.442695, %v1560_v16 }
 0x7bd   :  { %6594 = vpow2.f32 %v1570_v23 }
 0x7c3   :  { %v7811_v33 = vpop.eup %6594 }
 0x7c4   :  { %v1588_v42 = vsel %vm805_vm8, %v7811_v33, 0.0 }
 0x7c5   :  { %1589 = vadd.xlane.f32.xlu2 %v1588_v42 }
 0x7c7   :  { %v1548_v18 = vpop.xlane.xlu1 %1547 }
 0x7cd   :  { %1556 = vmax.xlane.f32.xlu2 %v1555_v9  ;;  %v7829_v9 = vmul.f32 0.35355338, %v1407_v40  ;;  %v7845_v40 = vadd.f32 %v7528_v2, %v7775_v19  ;;  %v7865_v2 = vadd.f32 %v7353_v36, %v7276_v50  ;;  %v7871_v19 = vadd.f32 %v7353_v36, %v7768_v22 }
 0x7ce   :  { %1907 = vrot.lane.b32.xlu1 %v7359_v0, %s6895_s6  ;;  %v1562_v50 = vsub.f32 %v7782_v24, %v1548_v18  ;;  %v7883_v22 = vadd.f32 %v7353_v36, %v7279_v58 }
 0x7cf   :  { %v1554_v44 = vpop.xlane.xlu1 %1553  ;;  %v1543_v42 = vsel %vm805_vm8, %v7829_v9, -inf  ;;  %9836 = vst [vmem:[#allocation26_spill] sm:$0xff] %v7845_v40 }
 0x7d0   :  { %v1564_v23 = vsub.f32 %v1532_v8, %v1554_v44  ;;  %v7839_v8 = vadd.f32 %v7353_v36, %v7433_v53  ;;  %v6386_v44 = vpack.i.bf16 %v7845_v40, %v7849_v21  ;;  %v7858_v53 = vadd.f32 %v7353_v36, %v7439_v7  ;;  %9839 = vst [vmem:[#allocation29_spill] sm:$0xff] %v7865_v2 }
 0x7d1   :  { %9840 = vst [vmem:[#allocation30_spill] sm:$0xff] %v7871_v19 }
 0x7d2   :  { %v1578_v45 = vmul.f32 1.442695, %v1564_v23  ;;  %9835 = vst [vmem:[#allocation25_spill] sm:$0xff] %v7839_v8  ;;  %v1559_v23 = vsub.f32 %v7777_v13, %v1539_v52  ;;  %v1574_v52 = vmul.f32 1.442695, %v1562_v50 }
 0x7d3   :  { %9838 = vst [vmem:[#allocation28_spill] sm:$0xff] %v7858_v53 }
 0x7d4   :  { %6596 = vpow2.f32 %v1578_v45  ;;  %v1568_v46 = vmul.f32 1.442695, %v1559_v23  ;;  %v1551_v45 = vpop.xlane.xlu0 %1550  ;;  %9841 = vst [vmem:[#allocation31_spill] sm:$0xff] %v7883_v22 }
 0x7d6   :  { %6392 = vrot.lane.b32.xlu1 %v7582_v39, %s6894_s18  ;;  %6598 = vpow2.f32 %v1568_v46  ;;  %v7901_v46 = vadd.f32 %v7353_v36, %v7519_v43 }
 0x7d7   :  { %6600 = vpow2.f32 %v1574_v52  ;;  %v6406_v52 = vpack.i.bf16 %v7575_v1, %v7849_v21 }
 0x7da   :  { %v7823_v16 = vpop.eup %6596 }
 0x7db   :  { %v1600_v20 = vsel %vm805_vm8, %v7823_v16, 0.0 }
 0x7dc   :  { %1601 = vadd.xlane.f32.xlu0 %v1600_v20  ;;  %v7875_v7 = vpop.eup %6598  ;;  %v1563_v20 = vsub.f32 %v7786_v6, %v1551_v45 }
 0x7dd   :  { %v1585_v13 = vsel %vm805_vm8, %v7875_v7, 0.0 }
 0x7de   :  { %1936 = vrot.lane.b32.xlu1 %v7369_v3, %s6895_s6 }
 0x7e4   :  { %1544 = vmax.xlane.f32.xlu0 %v1543_v42  ;;  %v1576_v42 = vmul.f32 1.442695, %v1563_v20 }
 0x7e5   :  { %6382 = vrot.lane.b32.xlu2 %v7600_v51, %s6894_s18 }
 0x7e6   :  { %2023 = vrot.lane.b32.xlu1 %v7399_v25, %s6895_s6  ;;  %6602 = vpow2.f32 %v1576_v42 }
 0x7ee   :  { %2021 = vrot.lane.b32.xlu1 %v7839_v8, %s6895_s6 }
 0x7f6   :  { %6397 = vrot.lane.b32.xlu1 %v7612_v55, %s6894_s18 }
 0x7f8   :  { %6387 = vrot.lane.b32.xlu0 %v6386_v44, %s6894_s18  ;;  %v7887_v44 = vpop.eup %6600 }
 0x7f9   :  { %v1594_v23 = vsel %vm805_vm8, %v7887_v44, 0.0  ;;  %v7893_v24 = vpop.eup %6602 }
 0x7fa   :  { %v1597_v58 = vsel %vm805_vm8, %v7893_v24, 0.0 }
 0x7fe   :  { %2050 = vrot.lane.b32.xlu1 %v7858_v53, %s6895_s6 }
 0x800   :  { %1905 = vrot.lane.b32.xlu0 %v7865_v2, %s6895_s6 }
 0x806   :  { %1847 = vrot.lane.b32.xlu1 %v7871_v19, %s6895_s6 }
 0x80e   :  { %1586 = vadd.xlane.f32.xlu2 %v1585_v13 }
 0x826   :  { %1934 = vrot.lane.b32.xlu2 %v7883_v22, %s6895_s6 }
 0x828   :  { %v1584_v6 = vpop.xlane.xlu1 %1583 }
 0x829   :  { %6604 = vrcp.f32 %v1584_v6 }
 0x82a   :  { %1595 = vadd.xlane.f32.xlu0 %v1594_v23 }
 0x82e   :  { %1849 = vrot.lane.b32.xlu2 %v7293_v5, %s6895_s6 }
 0x82f   :  { %v6605_v45 = vpop.eup %6604 }
 0x830   :  { %v1614_v59 = vmul.f32 %v6605_v45, %v7807_v48 }
 0x832   :  { %1598 = vadd.xlane.f32.xlu0 %v1597_v58 }
 0x836   :  { %1878 = vrot.lane.b32.xlu2 %v7336_v32, %s6895_s6 }
 0x838   :  { %v1590_v18 = vpop.xlane.xlu2 %1589 }
 0x839   :  { %6606 = vrcp.f32 %v1590_v18  ;;  %v6411_v18 = vpack.i.bf16 %v7578_v34, %v7845_v40 }
 0x83e   :  { %1963 = vrot.lane.b32.xlu2 %v7901_v46, %s6895_s6 }
 0x83f   :  { %v6607_v20 = vpop.eup %6606 }
 0x840   :  { %v7905_v13 = vpop.permute.xlu1 %1907  ;;  %v1557_v50 = vpop.xlane.xlu2 %1556  ;;  %v1616_v6 = vmul.f32 %v6607_v20, %v7811_v33 }
 0x841   :  { %v1565_v20 = vsub.f32 %v7815_v62, %v1557_v50 }
 0x846   :  { %6407 = vrot.lane.b32.xlu2 %v6406_v52, %s6895_s6  ;;  %2052 = vrot.lane.b32.xlu0 %v7409_v31, %s6895_s6  ;;  %v6882_v52 = vld [vmem:[%s9767_s2] ss:$0 sm:$0xff]  ;;  %s6897_s2 = smov 96  }
 0x847   :  { %v7920_v21 = vadd.f32 %v6882_v52, %v7770_v47  ;;  %v7930_v33 = vadd.f32 %v6882_v52, %v7523_v54  ;;  %v1580_v54 = vmul.f32 1.442695, %v1565_v20 }
 0x848   :  { %v6393_v36 = vpop.permute.xlu1 %6392  ;;  %v6383_v43 = vpop.permute.xlu2 %6382 }
 0x849   :  { %v6395_v42 = vunpack.i.h.bf16 %v6393_v36  ;;  %v6394_v23 = vunpack.i.l.bf16 %v6393_v36  ;;  %v6385_v58 = vunpack.i.h.bf16 %v6383_v43  ;;  %v6384_v39 = vunpack.i.l.bf16 %v6383_v43 }
 0x84b   :  { %1644 = vmatpush.msrb.mxu0 %v6394_v23  ;;  %1671 = vmatpush.msra.mxu1 %v6395_v42 }
 0x84c   :  { %1698 = vmatpush.msra.mxu2 %v6384_v39  ;;  %1725 = vmatpush.msrb.mxu3 %v6385_v58 }
 0x84d   :  { %6206 = vmatmul.msk.f32.vlgmr.msrb.gmra.mxu0 %vm805_vm8, %v1614_v59  ;;  %6208 = vmatmul.msk.f32.vlgmr.msra.gmra.mxu2 %vm805_vm8, %v1616_v6 }
 0x84e   :  { %6412 = vrot.lane.b32.xlu2 %v6411_v18, %s6895_s6  ;;  %1876 = vrot.lane.b32.xlu0 %v7920_v21, %s6895_s6 }
 0x84f   :  { %v1602_v39 = vpop.xlane.xlu0 %1601 }
 0x850   :  { %v7927_v48 = vpop.permute.xlu1 %1936 }
 0x856   :  { %2446 = vrot.lane.b32.xlu2 %v7865_v2, %s6896_s25  ;;  %1992 = vrot.lane.b32.xlu0 %v7930_v33, %s6895_s6 }
 0x857   :  { %v1545_v47 = vpop.xlane.xlu0 %1544 }
 0x858   :  { %v2024_v59 = vpop.permute.xlu1 %2023  ;;  %v1561_v45 = vsub.f32 %v7829_v9, %v1545_v47 }
 0x85a   :  { %v1572_v36 = vmul.f32 1.442695, %v1561_v45 }
 0x85c   :  { %6608 = vpow2.f32 %v1572_v36 }
 0x85d   :  { %6610 = vpow2.f32 %v1580_v54 }
 0x85e   :  { %6417 = vrot.lane.b32.xlu2 %v7612_v55, %s6895_s6  ;;  %6402 = vrot.lane.b32.xlu0 %v7600_v51, %s6895_s6  ;;  %6612 = vrcp.f32 %v1602_v39 }
 0x860   :  { %v2022_v43 = vpop.permute.xlu1 %2021 }
 0x862   :  { %v7942_v42 = vpop.eup %6608 }
 0x863   :  { %v1591_v23 = vsel %vm805_vm8, %v7942_v42, 0.0  ;;  %v7950_v9 = vpop.eup %6610 }
 0x864   :  { %1592 = vadd.xlane.f32.xlu1 %v1591_v23  ;;  %v6613_v6 = vpop.eup %6612  ;;  %v1603_v39 = vsel %vm805_vm8, %v7950_v9, 0.0 }
 0x865   :  { %v1620_v45 = vmul.f32 %v6613_v6, %v7823_v16 }
 0x866   :  { %2476 = vrot.lane.b32.xlu2 %v7552_v35, %s6896_s25  ;;  %2560 = vrot.lane.b32.xlu0 %v7642_v12, %s6896_s25 }
 0x868   :  { %v6398_v62 = vpop.permute.xlu1 %6397 }
 0x869   :  { %v6400_v50 = vunpack.i.h.bf16 %v6398_v62  ;;  %v6399_v58 = vunpack.i.l.bf16 %v6398_v62 }
 0x86a   :  { %v6388_v18 = vpop.permute.xlu0 %6387 }
 0x86b   :  { %1752 = vmatpush.msra.mxu0 %v6399_v58  ;;  %1779 = vmatpush.msrb.mxu1 %v6400_v50  ;;  %v6390_v52 = vunpack.i.h.bf16 %v6388_v18  ;;  %v6389_v47 = vunpack.i.l.bf16 %v6388_v18 }
 0x86c   :  { %1604 = vadd.xlane.f32.xlu1 %v1603_v39 }
 0x86d   :  { %1806 = vmatpush.msrb.mxu2 %v6389_v47  ;;  %1833 = vmatpush.msra.mxu3 %v6390_v52 }
 0x86e   :  { %2392 = vrot.lane.b32.xlu0 %v7661_v63, %s6896_s25  ;;  %2474 = vrot.lane.b32.xlu2 %v7883_v22, %s6896_s25 }
 0x86f   :  { %6212 = vmatmul.msk.f32.vlgmr.msrb.gmra.mxu2 %vm805_vm8, %v1620_v45 }
 0x870   :  { %6218 = vmatpush.xpose.msk.msra.mxu2 %vm805_vm8, %v7905_v13  ;;  %v2051_v62 = vpop.permute.xlu1 %2050 }
 0x872   :  { %v1906_v20 = vpop.permute.xlu0 %1905 }
 0x874   :  { %6226 = vmatpush.xpose.msk.msrb.mxu2 %vm805_vm8, %v2024_v59 }
 0x876   :  { %2558 = vrot.lane.b32.xlu2 %v7839_v8, %s6896_s25 }
 0x877   :  { %6219 = vmatmul.msk.f32.vlgmr.msra.gmra.mxu2 %vm805_vm8, %v1906_v20 }
 0x878   :  { %v1848_v52 = vpop.permute.xlu1 %1847 }
 0x87e   :  { %2588 = vrot.lane.b32.xlu2 %v7673_v15, %s6896_s25 }
 0x87f   :  { %6227 = vmatmul.msk.f32.vlgmr.msrb.gmra.mxu2 %vm805_vm8, %v2022_v43 }
 0x881   :  { %v1587_v16 = vpop.xlane.xlu2 %1586 }
 0x882   :  { %6614 = vrcp.f32 %v1587_v16 }
 0x885   :  { %1965 = vrot.lane.b32.xlu1 %v7379_v14, %s6895_s6 }
 0x888   :  { %v6615_v36 = vpop.eup %6614 }
 0x889   :  { %v1615_v13 = vmul.f32 %v6615_v36, %v7875_v7  ;;  %v1935_v59 = vpop.permute.xlu2 %1934 }
 0x88b   :  { %6207 = vmatmul.msk.f32.vlgmr.msra.gmra.mxu1 %vm805_vm8, %v1615_v13 }
 0x88d   :  { %1994 = vrot.lane.b32.xlu1 %v7389_v26, %s6895_s6 }
 0x891   :  { %v1850_v54 = vpop.permute.xlu2 %1849 }
 0x892   :  { %6214 = vmatpush.xpose.msk.msrb.mxu0 %vm805_vm8, %v1850_v54 }
 0x895   :  { %2448 = vrot.lane.b32.xlu1 %v7545_v29, %s6896_s25 }
 0x899   :  { %v1879_v43 = vpop.permute.xlu2 %1878 }
 0x89a   :  { %6216 = vmatpush.xpose.msk.msra.mxu1 %vm805_vm8, %v1879_v43 }
 0x89d   :  { %v1596_v23 = vpop.xlane.xlu0 %1595  ;;  %2390 = vrot.lane.b32.xlu1 %v7871_v19, %s6896_s25 }
 0x89e   :  { %6616 = vrcp.f32 %v1596_v23 }
 0x8a1   :  { %v1964_v45 = vpop.permute.xlu2 %1963 }
 0x8a4   :  { %v6617_v7 = vpop.eup %6616 }
 0x8a5   :  { %v1618_v50 = vmul.f32 %v6617_v7, %v7887_v44  ;;  %v1599_v58 = vpop.xlane.xlu0 %1598 }
 0x8a6   :  { %6618 = vrcp.f32 %v1599_v58 }
 0x8a7   :  { %6210 = vmatmul.msk.f32.vlgmr.msra.gmra.mxu0 %vm805_vm8, %v1618_v50 }
 0x8a9   :  { %v6408_v16 = vpop.permute.xlu2 %6407 }
 0x8aa   :  { %v6409_v13 = vunpack.i.l.bf16 %v6408_v16 }
 0x8ac   :  { %v6619_v6 = vpop.eup %6618 }
 0x8ad   :  { %v1619_v18 = vmul.f32 %v6619_v6, %v7893_v24 }
 0x8af   :  { %6211 = vmatmul.msk.f32.vlgmr.msrb.gmra.mxu1 %vm805_vm8, %v1619_v18  ;;  %6215 = vmatmul.msk.f32.vlgmr.msrb.gmra.mxu0 %vm805_vm8, %v1848_v52 }
 0x8b1   :  { %v6413_v7 = vpop.permute.xlu2 %6412 }
 0x8b8   :  { %v2053_v47 = vpop.permute.xlu0 %2052 }
 0x8b9   :  { %v7994_v6 = vpop.permute.xlu2 %2446 }
 0x8c0   :  { %v1877_v39 = vpop.permute.xlu0 %1876 }
 0x8c1   :  { %6217 = vmatmul.msk.f32.vlgmr.msra.gmra.mxu1 %vm805_vm8, %v1877_v39  ;;  %v6418_v52 = vpop.permute.xlu2 %6417 }
 0x8c8   :  { %v1993_v20 = vpop.permute.xlu0 %1992 }
 0x8d0   :  { %v6403_v44 = vpop.permute.xlu0 %6402 }
 0x8d1   :  { %v6404_v36 = vunpack.i.l.bf16 %v6403_v44  ;;  %v6405_v18 = vunpack.i.h.bf16 %v6403_v44 }
 0x8d3   :  { %2247 = vmatpush.msra.mxu2 %v6404_v36  ;;  %v6414_v36 = vunpack.i.l.bf16 %v6413_v7 }
 0x8d5   :  { %2351 = vmatpush.msrb.mxu2 %v6409_v13 }
 0x8d7   :  { %v1593_v54 = vpop.xlane.xlu1 %1592 }
 0x8d8   :  { %6620 = vrcp.f32 %v1593_v54 }
 0x8de   :  { %v6621_v24 = vpop.eup %6620 }
 0x8df   :  { %v1617_v43 = vmul.f32 %v6621_v24, %v7942_v42  ;;  %v1605_v23 = vpop.xlane.xlu1 %1604  ;;  %v6410_v42 = vunpack.i.h.bf16 %v6408_v16  ;;  %v8002_v16 = vpop.f32.mrf.mxu0 }
 0x8e0   :  { %6622 = vrcp.f32 %v1605_v23  ;;  %9842 = vst [vmem:[#allocation32_spill] sm:$0xff] %v8002_v16 }
 0x8e1   :  { %6209 = vmatmul.msk.f32.vlgmr.msrb.gmra.mxu3 %vm805_vm8, %v1617_v43 }
 0x8e2   :  { %6220 = vmatpush.xpose.msk.msrb.mxu3 %vm805_vm8, %v7927_v48  ;;  %v6419_v48 = vunpack.i.l.bf16 %v6418_v52 }
 0x8e6   :  { %v6623_v50 = vpop.eup %6622 }
 0x8e7   :  { %v1621_v58 = vmul.f32 %v6623_v50, %v7950_v9  ;;  %v6415_v9 = vunpack.i.h.bf16 %v6413_v7 }
 0x8e9   :  { %6213 = vmatmul.msk.f32.vlgmr.msra.gmra.mxu3 %vm805_vm8, %v1621_v58 }
 0x8ea   :  { %6228 = vmatpush.xpose.msk.msra.mxu3 %vm805_vm8, %v2053_v47 }
 0x8f1   :  { %6221 = vmatmul.msk.f32.vlgmr.msrb.gmra.mxu3 %vm805_vm8, %v1935_v59  ;;  %v6420_v59 = vunpack.i.h.bf16 %v6418_v52 }
 0x8f2   :  { %2273 = vmatpush.msrb.mxu3 %v6405_v18 }
 0x8f7   :  { %v1966_v39 = vpop.permute.xlu1 %1965 }
 0x8f8   :  { %6222 = vmatpush.xpose.msk.msra.mxu0 %vm805_vm8, %v1966_v39 }
 0x8f9   :  { %6229 = vmatmul.msk.f32.vlgmr.msra.gmra.mxu3 %vm805_vm8, %v2051_v62  ;;  %v8006_v62 = vpop.f32.mrf.mxu2 }
 0x8fa   :  { %2377 = vmatpush.msra.mxu3 %v6414_v36 }
 0x8fb   :  { %6223 = vmatmul.msk.f32.vlgmr.msra.gmra.mxu0 %vm805_vm8, %v1964_v45 }
 0x8fc   :  { %2195 = vmatpush.msrb.mxu0 %v6410_v42 }
 0x8fe   :  { %2299 = vmatpush.msra.mxu0 %v6419_v48 }
 0x8ff   :  { %v1995_v47 = vpop.permute.xlu1 %1994 }
 0x900   :  { %6224 = vmatpush.xpose.msk.msrb.mxu1 %vm805_vm8, %v1995_v47 }
 0x901   :  { %v8008_v24 = vpop.f32.mrf.mxu2 }
 0x903   :  { %6225 = vmatmul.msk.f32.vlgmr.msrb.gmra.mxu1 %vm805_vm8, %v1993_v20 }
 0x904   :  { %2221 = vmatpush.msra.mxu1 %v6415_v9 }
 0x906   :  { %2325 = vmatpush.msrb.mxu1 %v6420_v59 }
 0x908   :  { %v8010_v45 = vpop.f32.mrf.mxu1 }
 0x909   :  { %9844 = vst [vmem:[#allocation34_spill] sm:$0xff] %v8010_v45  ;;  %v1930_v7 = vpop.f32.mrf.mxu2 }
 0x90a   :  { %v2080_v9 = vmul.f32 0.35355338, %v1930_v7 }
 0x911   :  { %v2046_v18 = vpop.f32.mrf.mxu2 }
 0x912   :  { %v2084_v42 = vmul.f32 0.35355338, %v2046_v18 }
 0x914   :  { %v2104_v52 = vsel %vm805_vm8, %v2084_v42, -inf }
 0x924   :  { %v8004_v44 = vpop.f32.mrf.mxu0 }
 0x925   :  { %9843 = vst [vmem:[#allocation33_spill] sm:$0xff] %v8004_v44 }
 0x92c   :  { %v1872_v13 = vpop.f32.mrf.mxu0  ;;  %v8013_v23 = vpop.f32.mrf.mxu1 }
 0x92d   :  { %v2078_v54 = vmul.f32 0.35355338, %v1872_v13  ;;  %9845 = vst [vmem:[#allocation35_spill] sm:$0xff] %v8013_v23 }
 0x92f   :  { %v2086_v43 = vsel %vm805_vm8, %v2078_v54, -inf }
 0x930   :  { %2087 = vmax.xlane.f32.xlu2 %v2086_v43  ;;  %v2092_v43 = vsel %vm805_vm8, %v2080_v9, -inf }
 0x93e   :  { %v1901_v20 = vpop.f32.mrf.mxu1 }
 0x93f   :  { %v2079_v50 = vmul.f32 0.35355338, %v1901_v20  ;;  %v8022_v20 = vpop.permute.xlu2 %2476 }
 0x941   :  { %v2089_v58 = vsel %vm805_vm8, %v2079_v50, -inf }
 0x942   :  { %2090 = vmax.xlane.f32.xlu0 %v2089_v58 }
 0x947   :  { %v8024_v58 = vpop.permute.xlu2 %2474 }
 0x94a   :  { %2105 = vmax.xlane.f32.xlu0 %v2104_v52  ;;  %v8030_v52 = vpop.permute.xlu0 %2560 }
 0x94f   :  { %v8028_v18 = vpop.permute.xlu2 %2558 }
 0x957   :  { %v8032_v7 = vpop.permute.xlu2 %2588 }
 0x95e   :  { %2586 = vrot.lane.b32.xlu0 %v7858_v53, %s6896_s25  ;;  %v8041_v53 = vpop.permute.xlu1 %2448 }
 0x966   :  { %v8043_v8 = vpop.permute.xlu1 %2390 }
 0x978   :  { %v1988_v39 = vpop.f32.mrf.mxu0 }
 0x979   :  { %v2082_v36 = vmul.f32 0.35355338, %v1988_v39  ;;  %v8034_v39 = vpop.permute.xlu0 %2392 }
 0x97b   :  { %v2098_v48 = vsel %vm805_vm8, %v2082_v36, -inf }
 0x97c   :  { %2099 = vmax.xlane.f32.xlu2 %v2098_v48 }
 0x980   :  { %v2017_v47 = vpop.f32.mrf.mxu1 }
 0x981   :  { %v2083_v59 = vmul.f32 0.35355338, %v2017_v47 }
 0x983   :  { %v2101_v13 = vsel %vm805_vm8, %v2083_v59, -inf }
 0x984   :  { %2102 = vmax.xlane.f32.xlu1 %v2101_v13  ;;  %2093 = vmax.xlane.f32.xlu2 %v2092_v43 }
 0x99c   :  { %2420 = vrot.lane.b32.xlu2 %v7679_v38, %s6896_s25 }
 0x9a3   :  { %v2088_v48 = vpop.xlane.xlu2 %2087 }
 0x9a4   :  { %v2110_v47 = vsub.f32 %v2078_v54, %v2088_v48 }
 0x9a6   :  { %v2118_v43 = vmul.f32 1.442695, %v2110_v47 }
 0x9b5   :  { %v2091_v23 = vpop.xlane.xlu0 %2090 }
 0x9b6   :  { %v2111_v13 = vsub.f32 %v2079_v50, %v2091_v23 }
 0x9b8   :  { %v2120_v44 = vmul.f32 1.442695, %v2111_v13 }
 0x9ba   :  { %6624 = vpow2.f32 %v2120_v44  ;;  %v8045_v44 = vpop.f32.mrf.mxu3 }
 0x9bb   :  { %6626 = vpow2.f32 %v2118_v43  ;;  %9846 = vst [vmem:[#allocation36_spill] sm:$0xff] %v8045_v44 }
 0x9bd   :  { %v2106_v48 = vpop.xlane.xlu0 %2105 }
 0x9be   :  { %v2116_v22 = vsub.f32 %v2084_v42, %v2106_v48 }
 0x9c0   :  { %v6625_v45 = vpop.eup %6624  ;;  %v2130_v2 = vmul.f32 1.442695, %v2116_v22 }
 0x9c1   :  { %v8036_v16 = vpop.eup %6626  ;;  %v2137_v51 = vsel %vm805_vm8, %v6625_v45, 0.0 }
 0x9c2   :  { %2138 = vadd.xlane.f32.xlu1 %v2137_v51  ;;  %v2134_v55 = vsel %vm805_vm8, %v8036_v16, 0.0 }
 0x9c5   :  { %2135 = vadd.xlane.f32.xlu2 %v2134_v55 }
 0x9ef   :  { %v2100_v54 = vpop.xlane.xlu2 %2099 }
 0x9f0   :  { %v2114_v23 = vsub.f32 %v2082_v36, %v2100_v54  ;;  %v8048_v36 = vpop.f32.mrf.mxu3 }
 0x9f2   :  { %v2126_v50 = vmul.f32 1.442695, %v2114_v23 }
 0x9f4   :  { %6628 = vpow2.f32 %v2126_v50 }
 0x9f7   :  { %v2103_v47 = vpop.xlane.xlu1 %2102  ;;  %v2094_v13 = vpop.xlane.xlu2 %2093 }
 0x9f8   :  { %v2115_v43 = vsub.f32 %v2083_v59, %v2103_v47  ;;  %v2112_v19 = vsub.f32 %v2080_v9, %v2094_v13  ;;  %v1959_v59 = vpop.f32.mrf.mxu3  ;;  %v8063_v47 = vpack.i.bf16 %v7740_v27, %v7705_v49 }
 0x9fa   :  { %v6629_v51 = vpop.eup %6628  ;;  %v2128_v40 = vmul.f32 1.442695, %v2115_v43  ;;  %v2122_v34 = vmul.f32 1.442695, %v2112_v19  ;;  %v8069_v43 = vpack.i.bf16 %v7533_v28, %v7696_v4 }
 0x9fb   :  { %v2146_v55 = vsel %vm805_vm8, %v6629_v51, 0.0 }
 0x9fc   :  { %6630 = vpow2.f32 %v2128_v40  ;;  %2147 = vadd.xlane.f32.xlu0 %v2146_v55  ;;  %v2081_v40 = vmul.f32 0.35355338, %v1959_v59 }
 0x9fd   :  { %6632 = vpow2.f32 %v2122_v34 }
 0x9fe   :  { %6634 = vpow2.f32 %v2130_v2  ;;  %v2095_v34 = vsel %vm805_vm8, %v2081_v40, -inf }
 0x9ff   :  { %v2421_v13 = vpop.permute.xlu2 %2420 }
 0xa00   :  { %v2075_v22 = vpop.f32.mrf.mxu3 }
 0xa01   :  { %v2085_v48 = vmul.f32 0.35355338, %v2075_v22 }
 0xa02   :  { %v6631_v54 = vpop.eup %6630 }
 0xa03   :  { %v6633_v23 = vpop.eup %6632  ;;  %v2149_v50 = vsel %vm805_vm8, %v6631_v54, 0.0  ;;  %v2107_v2 = vsel %vm805_vm8, %v2085_v48, -inf }
 0xa04   :  { %2150 = vadd.xlane.f32.xlu1 %v2149_v50  ;;  %v2140_v9 = vsel %vm805_vm8, %v6633_v23, 0.0  ;;  %v6635_v42 = vpop.eup %6634  ;;  %v8075_v50 = vpack.i.bf16 %v7718_v17, %v7537_v57  ;;  %v8091_v57 = vpop.permute.xlu0 %2586 }
 0xa05   :  { %2141 = vadd.xlane.f32.xlu0 %v2140_v9  ;;  %v2152_v19 = vsel %vm805_vm8, %v6635_v42, 0.0 }
 0xa0c   :  { %2153 = vadd.xlane.f32.xlu1 %v2152_v19 }
 0xa14   :  { %2096 = vmax.xlane.f32.xlu1 %v2095_v34  ;;  %v9847_v34 = vld [vmem:[#allocation4_spill] sm:$0xff] }
 0xa19   :  { %2504 = vrot.lane.b32.xlu0 %v7710_v11, %s6896_s25 }
 0xa1c   :  { %2108 = vmax.xlane.f32.xlu1 %v2107_v2 }
 0xa21   :  { %2502 = vrot.lane.b32.xlu0 %v7901_v46, %s6896_s25 }
 0xa29   :  { %2530 = vrot.lane.b32.xlu0 %v7930_v33, %s6896_s25 }
 0xa31   :  { %6427 = vrot.lane.b32.xlu0 %v8063_v47, %s6896_s25 }
 0xa35   :  { %v2139_v55 = vpop.xlane.xlu1 %2138  ;;  %6422 = vrot.lane.b32.xlu1 %v8069_v43, %s6896_s25 }
 0xa36   :  { %6636 = vrcp.f32 %v2139_v55 }
 0xa38   :  { %v2136_v9 = vpop.xlane.xlu2 %2135 }
 0xa39   :  { %6638 = vrcp.f32 %v2136_v9  ;;  %6432 = vrot.lane.b32.xlu0 %v8075_v50, %s6896_s25 }
 0xa3c   :  { %v6637_v49 = vpop.eup %6636 }
 0xa3d   :  { %v2167_v27 = vmul.f32 %v6637_v49, %v6625_v45 }
 0xa3f   :  { %v6639_v59 = vpop.eup %6638  ;;  %6231 = vmatmul.msk.f32.vlgmr.msra.gmra.mxu1 %vm805_vm8, %v2167_v27 }
 0xa40   :  { %v2166_v19 = vmul.f32 %v6639_v59, %v8036_v16  ;;  %6240 = vmatpush.xpose.msk.msra.mxu1 %vm805_vm8, %v2421_v13 }
 0xa41   :  { %2990 = vrot.lane.b32.xlu0 %v9847_v34, %s6897_s2 }
 0xa42   :  { %6230 = vmatmul.msk.f32.vlgmr.msrb.gmra.mxu0 %vm805_vm8, %v2166_v19 }
 0xa43   :  { %6238 = vmatpush.xpose.msk.msrb.mxu0 %vm805_vm8, %v8034_v39 }
 0xa49   :  { %3020 = vrot.lane.b32.xlu0 %v7369_v3, %s6897_s2 }
 0xa51   :  { %2934 = vrot.lane.b32.xlu0 %v7356_v61, %s6897_s2 }
 0xa6f   :  { %v2148_v17 = vpop.xlane.xlu0 %2147 }
 0xa70   :  { %6640 = vrcp.f32 %v2148_v17 }
 0xa76   :  { %v6641_v16 = vpop.eup %6640 }
 0xa77   :  { %v2170_v45 = vmul.f32 %v6641_v16, %v6629_v51  ;;  %v2151_v22 = vpop.xlane.xlu1 %2150 }
 0xa78   :  { %6642 = vrcp.f32 %v2151_v22  ;;  %v2142_v2 = vpop.xlane.xlu0 %2141 }
 0xa79   :  { %6644 = vrcp.f32 %v2142_v2  ;;  %6234 = vmatmul.msk.f32.vlgmr.msra.gmra.mxu0 %vm805_vm8, %v2170_v45 }
 0xa7e   :  { %v6643_v13 = vpop.eup %6642 }
 0xa7f   :  { %v6645_v39 = vpop.eup %6644  ;;  %v2171_v55 = vmul.f32 %v6643_v13, %v6631_v54  ;;  %v2154_v9 = vpop.xlane.xlu1 %2153 }
 0xa80   :  { %v2168_v49 = vmul.f32 %v6645_v39, %v6633_v23  ;;  %6646 = vrcp.f32 %v2154_v9 }
 0xa81   :  { %6235 = vmatmul.msk.f32.vlgmr.msrb.gmra.mxu1 %vm805_vm8, %v2171_v55  ;;  %6239 = vmatmul.msk.f32.vlgmr.msrb.gmra.mxu0 %vm805_vm8, %v8043_v8 }
 0xa82   :  { %6232 = vmatmul.msk.f32.vlgmr.msra.gmra.mxu2 %vm805_vm8, %v2168_v49  ;;  %v9848_v49 = vld [vmem:[#allocation5_spill] sm:$0xff] }
 0xa83   :  { %6242 = vmatpush.xpose.msk.msra.mxu2 %vm805_vm8, %v8041_v53 }
 0xa86   :  { %v6647_v51 = vpop.eup %6646 }
 0xa87   :  { %v2172_v27 = vmul.f32 %v6647_v51, %v6635_v42  ;;  %v2097_v59 = vpop.xlane.xlu1 %2096 }
 0xa88   :  { %v2113_v19 = vsub.f32 %v2081_v40, %v2097_v59 }
 0xa8a   :  { %v2124_v17 = vmul.f32 1.442695, %v2113_v19  ;;  %6236 = vmatmul.msk.f32.vlgmr.msrb.gmra.mxu2 %vm805_vm8, %v2172_v27 }
 0xa8b   :  { %6250 = vmatpush.xpose.msk.msrb.mxu2 %vm805_vm8, %v8030_v52  ;;  %v2505_v54 = vpop.permute.xlu0 %2504 }
 0xa8c   :  { %6648 = vpow2.f32 %v2124_v17  ;;  %6246 = vmatpush.xpose.msk.msra.mxu0 %vm805_vm8, %v2505_v54 }
 0xa8f   :  { %v2109_v8 = vpop.xlane.xlu1 %2108 }
 0xa90   :  { %v2117_v23 = vsub.f32 %v2085_v48, %v2109_v8 }
 0xa92   :  { %v6649_v16 = vpop.eup %6648  ;;  %v2132_v45 = vmul.f32 1.442695, %v2117_v23  ;;  %6243 = vmatmul.msk.f32.vlgmr.msra.gmra.mxu2 %vm805_vm8, %v7994_v6 }
 0xa93   :  { %v2503_v53 = vpop.permute.xlu0 %2502  ;;  %v2143_v42 = vsel %vm805_vm8, %v6649_v16, 0.0 }
 0xa94   :  { %6650 = vpow2.f32 %v2132_v45  ;;  %6247 = vmatmul.msk.f32.vlgmr.msra.gmra.mxu0 %vm805_vm8, %v2503_v53  ;;  %2144 = vadd.xlane.f32.xlu2 %v2143_v42 }
 0xa9a   :  { %v6651_v40 = vpop.eup %6650  ;;  %6251 = vmatmul.msk.f32.vlgmr.msrb.gmra.mxu2 %vm805_vm8, %v8028_v18  ;;  %v8121_v18 = vpack.i.bf16 %v7731_v41, %v7748_v30 }
 0xa9b   :  { %v2531_v52 = vpop.permute.xlu0 %2530  ;;  %v2155_v22 = vsel %vm805_vm8, %v6651_v40, 0.0 }
 0xa9c   :  { %2156 = vadd.xlane.f32.xlu1 %v2155_v22 }
 0xaa3   :  { %v6428_v48 = vpop.permute.xlu0 %6427 }
 0xaa4   :  { %v6430_v6 = vunpack.i.h.bf16 %v6428_v48 }
 0xaa7   :  { %v6423_v2 = vpop.permute.xlu1 %6422 }
 0xaa8   :  { %v6425_v13 = vunpack.i.h.bf16 %v6423_v2  ;;  %v6424_v39 = vunpack.i.l.bf16 %v6423_v2 }
 0xaaa   :  { %2732 = vmatpush.msrb.mxu0 %v6425_v13  ;;  %2786 = vmatpush.msra.mxu2 %v6424_v39 }
 0xaab   :  { %v6433_v55 = vpop.permute.xlu0 %6432 }
 0xaac   :  { %2894 = vmatpush.msrb.mxu2 %v6430_v6  ;;  %v6435_v9 = vunpack.i.h.bf16 %v6433_v55  ;;  %2418 = vrot.lane.b32.xlu2 %v7920_v21, %s6896_s25 }
 0xaae   :  { %2840 = vmatpush.msra.mxu0 %v6435_v9 }
 0xab4   :  { %2532 = vrot.lane.b32.xlu2 %v7723_v56, %s6896_s25 }
 0xab5   :  { %3102 = vrot.lane.b32.xlu1 %v7416_v37, %s6897_s2 }
 0xabc   :  { %2992 = vrot.lane.b32.xlu2 %v7359_v0, %s6897_s2 }
 0xabf   :  { %v8131_v51 = vpop.f32.mrf.mxu0 }
 0xac0   :  { %9849 = vst [vmem:[#allocation4_spill] sm:$0xff] %v8131_v51 }
 0xac4   :  { %6437 = vrot.lane.b32.xlu2 %v8121_v18, %s6896_s25 }
 0xacc   :  { %2936 = vrot.lane.b32.xlu2 %v7293_v5, %s6897_s2 }
 0xad4   :  { %3104 = vrot.lane.b32.xlu2 %v7399_v25, %s6897_s2 }
 0xadc   :  { %3018 = vrot.lane.b32.xlu2 %v9848_v49, %s6897_s2 }
 0xaf6   :  { %v8133_v27 = vpop.f32.mrf.mxu0 }
 0xaf7   :  { %9850 = vst [vmem:[#allocation5_spill] sm:$0xff] %v8133_v27 }
 0xafe   :  { %v2415_v59 = vpop.f32.mrf.mxu0 }
 0xaff   :  { %v2614_v19 = vmul.f32 0.35355338, %v2415_v59 }
 0xb01   :  { %v2622_v17 = vsel %vm805_vm8, %v2614_v19, -inf }
 0xb05   :  { %v8136_v54 = vpop.f32.mrf.mxu2  ;;  %2623 = vmax.xlane.f32.xlu2 %v2622_v17 }
 0xb07   :  { %v2145_v8 = vpop.xlane.xlu2 %2144 }
 0xb08   :  { %6652 = vrcp.f32 %v2145_v8  ;;  %v6434_v8 = vunpack.i.l.bf16 %v6433_v55 }
 0xb0d   :  { %v8138_v23 = vpop.f32.mrf.mxu2 }
 0xb0e   :  { %v6653_v45 = vpop.eup %6652 }
 0xb0f   :  { %v2169_v53 = vmul.f32 %v6653_v45, %v6649_v16  ;;  %v2419_v42 = vpop.permute.xlu2 %2418  ;;  %v2157_v22 = vpop.xlane.xlu1 %2156 }
 0xb10   :  { %6654 = vrcp.f32 %v2157_v22  ;;  %6241 = vmatmul.msk.f32.vlgmr.msra.gmra.mxu1 %vm805_vm8, %v2419_v42 }
 0xb11   :  { %v2527_v2 = vpop.f32.mrf.mxu0  ;;  %6233 = vmatmul.msk.f32.vlgmr.msrb.gmra.mxu3 %vm805_vm8, %v2169_v53 }
 0xb12   :  { %v2618_v13 = vmul.f32 0.35355338, %v2527_v2  ;;  %6244 = vmatpush.xpose.msk.msrb.mxu3 %vm805_vm8, %v8022_v20 }
 0xb14   :  { %v2634_v39 = vsel %vm805_vm8, %v2618_v13, -inf }
 0xb15   :  { %v2471_v6 = vpop.f32.mrf.mxu2  ;;  %2635 = vmax.xlane.f32.xlu0 %v2634_v39 }
 0xb16   :  { %v6655_v9 = vpop.eup %6654  ;;  %v2616_v59 = vmul.f32 0.35355338, %v2471_v6 }
 0xb17   :  { %v2173_v17 = vmul.f32 %v6655_v9, %v6651_v40  ;;  %v2533_v16 = vpop.permute.xlu2 %2532  ;;  %v6429_v40 = vunpack.i.l.bf16 %v6428_v48  ;;  %v8162_v48 = vpop.permute.xlu0 %2990 }
 0xb18   :  { %6248 = vmatpush.xpose.msk.msrb.mxu1 %vm805_vm8, %v2533_v16  ;;  %v2628_v45 = vsel %vm805_vm8, %v2616_v59, -inf }
 0xb19   :  { %2629 = vmax.xlane.f32.xlu1 %v2628_v45  ;;  %6237 = vmatmul.msk.f32.vlgmr.msra.gmra.mxu3 %vm805_vm8, %v2173_v17 }
 0xb1a   :  { %6252 = vmatpush.xpose.msk.msra.mxu3 %vm805_vm8, %v8032_v7 }
 0xb1b   :  { %6249 = vmatmul.msk.f32.vlgmr.msrb.gmra.mxu1 %vm805_vm8, %v2531_v52 }
 0xb1c   :  { %2759 = vmatpush.msra.mxu1 %v6434_v8  ;;  %v8168_v8 = vpop.f32.mrf.mxu1 }
 0xb1d   :  { %v2583_v20 = vpop.f32.mrf.mxu2  ;;  %9851 = vst [vmem:[#allocation37_spill] sm:$0xff] %v8168_v8 }
 0xb1e   :  { %v2620_v53 = vmul.f32 0.35355338, %v2583_v20 }
 0xb1f   :  { %v8151_v42 = vpop.permute.xlu2 %2992  ;;  %v8166_v9 = vpop.permute.xlu0 %3020 }
 0xb20   :  { %v2640_v55 = vsel %vm805_vm8, %v2620_v53, -inf }
 0xb21   :  { %2641 = vmax.xlane.f32.xlu1 %v2640_v55  ;;  %6245 = vmatmul.msk.f32.vlgmr.msrb.gmra.mxu3 %vm805_vm8, %v8024_v58 }
 0xb22   :  { %2813 = vmatpush.msrb.mxu3 %v6429_v40 }
 0xb24   :  { %v8175_v55 = vpop.f32.mrf.mxu1 }
 0xb25   :  { %9852 = vst [vmem:[#allocation38_spill] sm:$0xff] %v8175_v55 }
 0xb27   :  { %v6438_v22 = vpop.permute.xlu2 %6437  ;;  %v8170_v45 = vpop.permute.xlu0 %2934 }
 0xb28   :  { %v6440_v2 = vunpack.i.h.bf16 %v6438_v22  ;;  %v6439_v39 = vunpack.i.l.bf16 %v6438_v22  ;;  %v8172_v20 = vpop.permute.xlu1 %3102 }
 0xb29   :  { %6253 = vmatmul.msk.f32.vlgmr.msra.gmra.mxu3 %vm805_vm8, %v8091_v57 }
 0xb2a   :  { %2867 = vmatpush.msrb.mxu1 %v6440_v2  ;;  %2921 = vmatpush.msra.mxu3 %v6439_v39 }
 0xb2f   :  { %v8158_v7 = vpop.permute.xlu2 %2936 }
 0xb37   :  { %v8160_v52 = vpop.permute.xlu2 %3104 }
 0xb3f   :  { %v8164_v6 = vpop.permute.xlu2 %3018 }
 0xb78   :  { %v2624_v58 = vpop.xlane.xlu2 %2623 }
 0xb79   :  { %v2646_v17 = vsub.f32 %v2614_v19, %v2624_v58 }
 0xb7b   :  { %v2654_v16 = vmul.f32 1.442695, %v2646_v17 }
 0xb7d   :  { %6656 = vpow2.f32 %v2654_v16 }
 0xb83   :  { %v6657_v57 = vpop.eup %6656 }
 0xb84   :  { %v2670_v40 = vsel %vm805_vm8, %v6657_v57, 0.0 }
 0xb85   :  { %2671 = vadd.xlane.f32.xlu1 %v2670_v40 }
 0xb88   :  { %v2636_v22 = vpop.xlane.xlu0 %2635 }
 0xb89   :  { %v2650_v2 = vsub.f32 %v2618_v13, %v2636_v22 }
 0xb8b   :  { %v2662_v39 = vmul.f32 1.442695, %v2650_v2 }
 0xb8c   :  { %v2630_v44 = vpop.xlane.xlu1 %2629 }
 0xb8d   :  { %6658 = vpow2.f32 %v2662_v39  ;;  %v2648_v19 = vsub.f32 %v2616_v59, %v2630_v44  ;;  %v2443_v58 = vpop.f32.mrf.mxu1 }
 0xb8e   :  { %v2615_v17 = vmul.f32 0.35355338, %v2443_v58 }
 0xb8f   :  { %v2658_v27 = vmul.f32 1.442695, %v2648_v19 }
 0xb90   :  { %v2625_v16 = vsel %vm805_vm8, %v2615_v17, -inf }
 0xb91   :  { %2626 = vmax.xlane.f32.xlu2 %v2625_v16  ;;  %6660 = vpow2.f32 %v2658_v27 }
 0xb93   :  { %v6659_v8 = vpop.eup %6658 }
 0xb94   :  { %v2642_v51 = vpop.xlane.xlu1 %2641  ;;  %v8178_v30 = vpop.f32.mrf.mxu3  ;;  %v2682_v55 = vsel %vm805_vm8, %v6659_v8, 0.0 }
 0xb95   :  { %v2652_v40 = vsub.f32 %v2620_v53, %v2642_v51  ;;  %2683 = vadd.xlane.f32.xlu0 %v2682_v55  ;;  %v9853_v55 = vld [vmem:[#allocation7_spill] sm:$0xff] }
 0xb97   :  { %v2666_v13 = vmul.f32 1.442695, %v2652_v40  ;;  %v6661_v2 = vpop.eup %6660 }
 0xb98   :  { %v2555_v22 = vpop.f32.mrf.mxu1  ;;  %v2676_v19 = vsel %vm805_vm8, %v6661_v2, 0.0 }
 0xb99   :  { %v2619_v39 = vmul.f32 0.35355338, %v2555_v22  ;;  %6662 = vpow2.f32 %v2666_v13 }
 0xb9b   :  { %v2637_v44 = vsel %vm805_vm8, %v2619_v39, -inf }
 0xb9c   :  { %v8182_v59 = vpop.f32.mrf.mxu3  ;;  %2638 = vmax.xlane.f32.xlu2 %v2637_v44 }
 0xb9d   :  { %2677 = vadd.xlane.f32.xlu0 %v2676_v19 }
 0xb9f   :  { %v6663_v27 = vpop.eup %6662 }
 0xba0   :  { %v2688_v58 = vsel %vm805_vm8, %v6663_v27, 0.0 }
 0xba4   :  { %v2499_v16 = vpop.f32.mrf.mxu3 }
 0xba5   :  { %2689 = vadd.xlane.f32.xlu0 %v2688_v58  ;;  %v8186_v51 = vmul.f32 0.35355338, %v2499_v16 }
 0xba7   :  { %v2631_v53 = vsel %vm805_vm8, %v8186_v51, -inf }
 0xbad   :  { %2632 = vmax.xlane.f32.xlu0 %v2631_v53 }
 0xbc1   :  { %2964 = vrot.lane.b32.xlu0 %v7336_v32, %s6897_s2 }
 0xbc9   :  { %3132 = vrot.lane.b32.xlu0 %v7409_v31, %s6897_s2 }
 0xbd1   :  { %2962 = vrot.lane.b32.xlu0 %v7366_v60, %s6897_s2 }
 0xbd9   :  { %3130 = vrot.lane.b32.xlu0 %v7421_v10, %s6897_s2 }
 0xbe1   :  { %3256 = vrot.lane.b32.xlu0 %v7661_v63, %s6898_s26 }
 0xbe9   :  { %3074 = vrot.lane.b32.xlu0 %v9853_v55, %s6897_s2 }
 0xbf1   :  { %3422 = vrot.lane.b32.xlu0 %v7416_v37, %s6898_s26 }
 0xbf8   :  { %v2672_v40 = vpop.xlane.xlu1 %2671 }
 0xbf9   :  { %6664 = vrcp.f32 %v2672_v40  ;;  %3452 = vrot.lane.b32.xlu0 %v7673_v15, %s6898_s26 }
 0xbff   :  { %v6665_v13 = vpop.eup %6664 }
 0xc00   :  { %v2702_v22 = vmul.f32 %v6665_v13, %v6657_v57 }
 0xc01   :  { %3450 = vrot.lane.b32.xlu0 %v7421_v10, %s6898_s26 }
 0xc02   :  { %6254 = vmatmul.msk.f32.vlgmr.msrb.gmra.mxu0 %vm805_vm8, %v2702_v22 }
 0xc03   :  { %6262 = vmatpush.xpose.msk.msrb.mxu0 %vm805_vm8, %v8158_v7  ;;  %v9854_v7 = vld [vmem:[#allocation10_spill] sm:$0xff] }
 0xc04   :  { %v2627_v44 = vpop.xlane.xlu2 %2626 }
 0xc05   :  { %v2647_v19 = vsub.f32 %v2615_v17, %v2627_v44  ;;  %v9855_v17 = vpack.i.bf16 %v7575_v1, %v9854_v7 }
 0xc07   :  { %v2656_v58 = vmul.f32 1.442695, %v2647_v19 }
 0xc08   :  { %v2684_v16 = vpop.xlane.xlu0 %2683 }
 0xc09   :  { %6666 = vpow2.f32 %v2656_v58  ;;  %6447 = vrot.lane.b32.xlu0 %v8063_v47, %s6898_s26 }
 0xc0a   :  { %6668 = vrcp.f32 %v2684_v16 }
 0xc0f   :  { %v6667_v37 = vpop.eup %6666  ;;  %v2639_v53 = vpop.xlane.xlu2 %2638 }
 0xc10   :  { %v6669_v57 = vpop.eup %6668  ;;  %v2651_v40 = vsub.f32 %v2619_v39, %v2639_v53  ;;  %v2678_v13 = vpop.xlane.xlu0 %2677  ;;  %v2673_v10 = vsel %vm805_vm8, %v6667_v37, 0.0 }
 0xc11   :  { %v2706_v22 = vmul.f32 %v6669_v57, %v6659_v8  ;;  %6670 = vrcp.f32 %v2678_v13  ;;  %6462 = vrot.lane.b32.xlu0 %v9855_v17, %s6897_s2  ;;  %2674 = vadd.xlane.f32.xlu2 %v2673_v10 }
 0xc12   :  { %v2664_v44 = vmul.f32 1.442695, %v2651_v40 }
 0xc13   :  { %6258 = vmatmul.msk.f32.vlgmr.msra.gmra.mxu0 %vm805_vm8, %v2706_v22 }
 0xc14   :  { %6672 = vpow2.f32 %v2664_v44 }
 0xc17   :  { %v6671_v19 = vpop.eup %6670 }
 0xc18   :  { %v2704_v58 = vmul.f32 %v6671_v19, %v6661_v2  ;;  %v2690_v16 = vpop.xlane.xlu0 %2689 }
 0xc19   :  { %6674 = vrcp.f32 %v2690_v16  ;;  %v9857_v16 = vld [vmem:[#allocation19_spill] sm:$0xff] }
 0xc1a   :  { %v6673_v39 = vpop.eup %6672  ;;  %6256 = vmatmul.msk.f32.vlgmr.msra.gmra.mxu2 %vm805_vm8, %v2704_v58 }
 0xc1b   :  { %6263 = vmatmul.msk.f32.vlgmr.msrb.gmra.mxu0 %vm805_vm8, %v8170_v45  ;;  %6266 = vmatpush.xpose.msk.msra.mxu2 %vm805_vm8, %v8151_v42  ;;  %v2685_v1 = vsel %vm805_vm8, %v6673_v39, 0.0  ;;  %v9856_v42 = vld [vmem:[#allocation6_spill] sm:$0xff] }
 0xc1c   :  { %2686 = vadd.xlane.f32.xlu1 %v2685_v1  ;;  %v1840_v1 = vsub.f32 %v9857_v16, %v8006_v62 }
 0xc1f   :  { %v6675_v8 = vpop.eup %6674 }
 0xc20   :  { %v2708_v53 = vmul.f32 %v6675_v8, %v6663_v27  ;;  %v2384_v8 = vsub.f32 %v1840_v1, %v8136_v54 }
 0xc22   :  { %6260 = vmatmul.msk.f32.vlgmr.msrb.gmra.mxu2 %vm805_vm8, %v2708_v53 }
 0xc23   :  { %6274 = vmatpush.xpose.msk.msrb.mxu2 %vm805_vm8, %v8160_v52 }
 0xc29   :  { %3048 = vrot.lane.b32.xlu2 %v7379_v14, %s6897_s2 }
 0xc2a   :  { %6267 = vmatmul.msk.f32.vlgmr.msra.gmra.mxu2 %vm805_vm8, %v8162_v48 }
 0xc31   :  { %3312 = vrot.lane.b32.xlu2 %v7545_v29, %s6898_s26 }
 0xc32   :  { %6275 = vmatmul.msk.f32.vlgmr.msrb.gmra.mxu2 %vm805_vm8, %v8172_v20  ;;  %v2611_v20 = vpop.f32.mrf.mxu3 }
 0xc33   :  { %v2621_v27 = vmul.f32 0.35355338, %v2611_v20 }
 0xc35   :  { %3310 = vrot.lane.b32.xlu1 %v9847_v34, %s6898_s26  ;;  %v2633_v34 = vpop.xlane.xlu0 %2632  ;;  %v2643_v57 = vsel %vm805_vm8, %v2621_v27, -inf }
 0xc36   :  { %v2649_v48 = vsub.f32 %v8186_v51, %v2633_v34 }
 0xc38   :  { %v2660_v45 = vmul.f32 1.442695, %v2649_v48 }
 0xc39   :  { %3046 = vrot.lane.b32.xlu2 %v9856_v42, %s6897_s2 }
 0xc3a   :  { %6676 = vpow2.f32 %v2660_v45 }
 0xc3d   :  { %3340 = vrot.lane.b32.xlu1 %v7552_v35, %s6898_s26  ;;  %v2965_v52 = vpop.permute.xlu0 %2964 }
 0xc41   :  { %3076 = vrot.lane.b32.xlu2 %v7389_v26, %s6897_s2 }
 0xc45   :  { %3254 = vrot.lane.b32.xlu1 %v7356_v61, %s6898_s26  ;;  %v8253_v2 = vpop.permute.xlu0 %3132  ;;  %v6677_v61 = vpop.eup %6676 }
 0xc46   :  { %v2679_v13 = vsel %vm805_vm8, %v6677_v61, 0.0 }
 0xc49   :  { %3424 = vrot.lane.b32.xlu2 %v7642_v12, %s6898_s26 }
 0xc4d   :  { %3284 = vrot.lane.b32.xlu1 %v7679_v38, %s6898_s26  ;;  %v2963_v40 = vpop.permute.xlu0 %2962 }
 0xc51   :  { %3338 = vrot.lane.b32.xlu2 %v9848_v49, %s6898_s26 }
 0xc55   :  { %v8257_v10 = vpop.permute.xlu0 %3130 }
 0xc5d   :  { %v3257_v17 = vpop.permute.xlu0 %3256 }
 0xc65   :  { %v3075_v62 = vpop.permute.xlu0 %3074 }
 0xc77   :  { %2644 = vmax.xlane.f32.xlu1 %v2643_v57 }
 0xc7a   :  { %2680 = vadd.xlane.f32.xlu2 %v2679_v13 }
 0xc7f   :  { %v8298_v1 = vpop.f32.mrf.mxu0 }
 0xc84   :  { %v2675_v49 = vpop.xlane.xlu2 %2674 }
 0xc85   :  { %6678 = vrcp.f32 %v2675_v49 }
 0xc8b   :  { %v6679_v22 = vpop.eup %6678 }
 0xc8c   :  { %v2703_v51 = vmul.f32 %v6679_v22, %v6667_v37  ;;  %v3049_v7 = vpop.permute.xlu2 %3048 }
 0xc8d   :  { %6270 = vmatpush.xpose.msk.msra.mxu0 %vm805_vm8, %v3049_v7 }
 0xc8e   :  { %6255 = vmatmul.msk.f32.vlgmr.msra.gmra.mxu1 %vm805_vm8, %v2703_v51 }
 0xc8f   :  { %6264 = vmatpush.xpose.msk.msra.mxu1 %vm805_vm8, %v2965_v52  ;;  %v2687_v44 = vpop.xlane.xlu1 %2686 }
 0xc90   :  { %6680 = vrcp.f32 %v2687_v44  ;;  %3282 = vrot.lane.b32.xlu1 %v7366_v60, %s6898_s26 }
 0xc91   :  { %6278 = vmatpush.xpose.msk.msrb.mxu0 %vm805_vm8, %v3257_v17 }
 0xc94   :  { %v3313_v19 = vpop.permute.xlu2 %3312 }
 0xc95   :  { %6282 = vmatpush.xpose.msk.msra.mxu2 %vm805_vm8, %v3313_v19 }
 0xc96   :  { %v6681_v58 = vpop.eup %6680 }
 0xc97   :  { %v2707_v37 = vmul.f32 %v6681_v58, %v6673_v39  ;;  %v9858_v39 = vld [vmem:[#allocation23_spill] sm:$0xff] }
 0xc98   :  { %3396 = vrot.lane.b32.xlu1 %v7723_v56, %s6898_s26  ;;  %v1844_v52 = vsub.f32 %v9858_v39, %v8008_v24 }
 0xc99   :  { %6259 = vmatmul.msk.f32.vlgmr.msrb.gmra.mxu1 %vm805_vm8, %v2707_v37 }
 0xc9a   :  { %v2388_v48 = vsub.f32 %v1844_v52, %v8138_v23 }
 0xc9c   :  { %v3047_v53 = vpop.permute.xlu2 %3046 }
 0xc9d   :  { %v2788_v34 = vpop.f32.mrf.mxu2  ;;  %6271 = vmatmul.msk.f32.vlgmr.msra.gmra.mxu0 %vm805_vm8, %v3047_v53 }
 0xc9e   :  { %v8273_v60 = vsub.f32 %v2384_v8, %v2788_v34 }
 0xca0   :  { %6452 = vrot.lane.b32.xlu1 %v8075_v50, %s6898_s26 }
 0xca1   :  { %6265 = vmatmul.msk.f32.vlgmr.msra.gmra.mxu1 %vm805_vm8, %v2963_v40  ;;  %v3423_v40 = vpop.permute.xlu0 %3422 }
 0xca4   :  { %v3077_v45 = vpop.permute.xlu2 %3076 }
 0xca5   :  { %v2896_v20 = vpop.f32.mrf.mxu2  ;;  %6272 = vmatpush.xpose.msk.msrb.mxu1 %vm805_vm8, %v3077_v45 }
 0xca6   :  { %v8282_v54 = vsub.f32 %v2388_v48, %v2896_v20 }
 0xca7   :  { %v3311_v57 = vpop.permute.xlu1 %3310 }
 0xca8   :  { %6283 = vmatmul.msk.f32.vlgmr.msra.gmra.mxu2 %vm805_vm8, %v3311_v57 }
 0xca9   :  { %6273 = vmatmul.msk.f32.vlgmr.msrb.gmra.mxu1 %vm805_vm8, %v3075_v62 }
 0xcac   :  { %v3425_v13 = vpop.permute.xlu2 %3424 }
 0xcad   :  { %6290 = vmatpush.xpose.msk.msrb.mxu2 %vm805_vm8, %v3425_v13 }
 0xcaf   :  { %v8287_v49 = vpop.permute.xlu1 %3340 }
 0xcb0   :  { %6291 = vmatmul.msk.f32.vlgmr.msrb.gmra.mxu2 %vm805_vm8, %v3423_v40 }
 0xcb4   :  { %v8292_v22 = vpop.permute.xlu2 %3338 }
 0xcb7   :  { %v3255_v24 = vpop.permute.xlu1 %3254 }
 0xcb8   :  { %6279 = vmatmul.msk.f32.vlgmr.msrb.gmra.mxu0 %vm805_vm8, %v3255_v24 }
 0xcbf   :  { %v3285_v23 = vpop.permute.xlu1 %3284 }
 0xcc0   :  { %6280 = vmatpush.xpose.msk.msra.mxu1 %vm805_vm8, %v3285_v23 }
 0xcea   :  { %v2645_v51 = vpop.xlane.xlu1 %2644 }
 0xceb   :  { %v2653_v7 = vsub.f32 %v2621_v27, %v2645_v51  ;;  %v8301_v27 = vpop.f32.mrf.mxu0 }
 0xced   :  { %v2668_v17 = vmul.f32 1.442695, %v2653_v7  ;;  %v2681_v44 = vpop.xlane.xlu2 %2680 }
 0xcee   :  { %6682 = vrcp.f32 %v2681_v44 }
 0xcef   :  { %6684 = vpow2.f32 %v2668_v17 }
 0xcf4   :  { %v6683_v19 = vpop.eup %6682 }
 0xcf5   :  { %v6685_v58 = vpop.eup %6684  ;;  %v2705_v37 = vmul.f32 %v6683_v19, %v6677_v61  ;;  %v2959_v61 = vpop.f32.mrf.mxu0 }
 0xcf6   :  { %v2691_v16 = vsel %vm805_vm8, %v6685_v58, 0.0  ;;  %v3158_v17 = vmul.f32 0.35355338, %v2959_v61 }
 0xcf7   :  { %2692 = vadd.xlane.f32.xlu2 %v2691_v16  ;;  %6257 = vmatmul.msk.f32.vlgmr.msrb.gmra.mxu3 %vm805_vm8, %v2705_v37 }
 0xcf8   :  { %6268 = vmatpush.xpose.msk.msrb.mxu3 %vm805_vm8, %v8166_v9 }
 0xd02   :  { %v3283_v8 = vpop.permute.xlu1 %3282 }
 0xd03   :  { %6281 = vmatmul.msk.f32.vlgmr.msra.gmra.mxu1 %vm805_vm8, %v3283_v8  ;;  %v3453_v8 = vpop.permute.xlu0 %3452 }
 0xd0a   :  { %v3397_v53 = vpop.permute.xlu1 %3396 }
 0xd0b   :  { %6288 = vmatpush.xpose.msk.msrb.mxu1 %vm805_vm8, %v3397_v53  ;;  %v8304_v34 = vpop.f32.mrf.mxu1 }
 0xd0f   :  { %3368 = vrot.lane.b32.xlu2 %v7710_v11, %s6898_s26 }
 0xd12   :  { %v8308_v39 = vpop.permute.xlu1 %6452 }
 0xd13   :  { %v6454_v9 = vunpack.i.l.bf16 %v8308_v39 }
 0xd15   :  { %3621 = vmatpush.msra.mxu1 %v6454_v9 }
 0xd16   :  { %v8311_v52 = vpop.f32.mrf.mxu1 }
 0xd17   :  { %3366 = vrot.lane.b32.xlu2 %v9856_v42, %s6898_s26 }
 0xd1a   :  { %v3071_v48 = vpop.f32.mrf.mxu0 }
 0xd1b   :  { %v8315_v45 = vmul.f32 0.35355338, %v3071_v48 }
 0xd1d   :  { %v3178_v62 = vsel %vm805_vm8, %v8315_v45, -inf }
 0xd1e   :  { %3179 = vmax.xlane.f32.xlu1 %v3178_v62  ;;  %v2987_v20 = vpop.f32.mrf.mxu1 }
 0xd1f   :  { %v8319_v57 = vmul.f32 0.35355338, %v2987_v20  ;;  %3394 = vrot.lane.b32.xlu2 %v9853_v55, %s6898_s26  ;;  %v3166_v55 = vsel %vm805_vm8, %v3158_v17, -inf }
 0xd21   :  { %v3169_v13 = vsel %vm805_vm8, %v8319_v57, -inf }
 0xd22   :  { %3170 = vmax.xlane.f32.xlu0 %v3169_v13 }
 0xd26   :  { %v3099_v40 = vpop.f32.mrf.mxu1 }
 0xd27   :  { %v8325_v24 = vmul.f32 0.35355338, %v3099_v40 }
 0xd29   :  { %v3181_v42 = vsel %vm805_vm8, %v8325_v24, -inf }
 0xd2a   :  { %3182 = vmax.xlane.f32.xlu0 %v3181_v42 }
 0xd35   :  { %v3279_v23 = vpop.f32.mrf.mxu0 }
 0xd36   :  { %v8329_v51 = vmul.f32 0.35355338, %v3279_v23 }
 0xd38   :  { %v3486_v7 = vsel %vm805_vm8, %v8329_v51, -inf }
 0xd39   :  { %3487 = vmax.xlane.f32.xlu1 %v3486_v7 }
 0xd48   :  { %3167 = vmax.xlane.f32.xlu2 %v3166_v55 }
 0xd60   :  { %6442 = vrot.lane.b32.xlu2 %v8069_v43, %s6898_s26  ;;  %v3451_v43 = vpop.permute.xlu0 %3450 }
 0xd68   :  { %6457 = vrot.lane.b32.xlu2 %v8121_v18, %s6898_s26 }
 0xd6a   :  { %v2693_v44 = vpop.xlane.xlu2 %2692 }
 0xd6b   :  { %6686 = vrcp.f32 %v2693_v44 }
 0xd71   :  { %v6687_v19 = vpop.eup %6686 }
 0xd72   :  { %v2709_v37 = vmul.f32 %v6687_v19, %v6685_v58  ;;  %v3369_v16 = vpop.permute.xlu2 %3368 }
 0xd73   :  { %6286 = vmatpush.xpose.msk.msra.mxu0 %vm805_vm8, %v3369_v16 }
 0xd74   :  { %6261 = vmatmul.msk.f32.vlgmr.msra.gmra.mxu3 %vm805_vm8, %v2709_v37  ;;  %v9859_v37 = vld [vmem:[#allocation24_spill] sm:$0xff] }
 0xd75   :  { %6276 = vmatpush.xpose.msk.msra.mxu3 %vm805_vm8, %v8253_v2  ;;  %v1845_v16 = vsub.f32 %v9859_v37, %v8048_v36 }
 0xd7a   :  { %v3367_v53 = vpop.permute.xlu2 %3366  ;;  %v8363_v44 = vpop.f32.mrf.mxu3 }
 0xd7b   :  { %6287 = vmatmul.msk.f32.vlgmr.msra.gmra.mxu0 %vm805_vm8, %v3367_v53 }
 0xd7c   :  { %6269 = vmatmul.msk.f32.vlgmr.msrb.gmra.mxu3 %vm805_vm8, %v8164_v6  ;;  %v6448_v6 = vpop.permute.xlu0 %6447 }
 0xd7d   :  { %6284 = vmatpush.xpose.msk.msrb.mxu3 %vm805_vm8, %v8287_v49  ;;  %v6449_v2 = vunpack.i.l.bf16 %v6448_v6  ;;  %v6450_v42 = vunpack.i.h.bf16 %v6448_v6 }
 0xd80   :  { %v3307_v18 = vpop.f32.mrf.mxu1 }
 0xd81   :  { %v8347_v58 = vmul.f32 0.35355338, %v3307_v18 }
 0xd82   :  { %v3395_v61 = vpop.permute.xlu2 %3394 }
 0xd83   :  { %6289 = vmatmul.msk.f32.vlgmr.msrb.gmra.mxu1 %vm805_vm8, %v3395_v61  ;;  %v3489_v9 = vsel %vm805_vm8, %v8347_v58, -inf }
 0xd84   :  { %3490 = vmax.xlane.f32.xlu1 %v3489_v9  ;;  %6277 = vmatmul.msk.f32.vlgmr.msra.gmra.mxu3 %vm805_vm8, %v8257_v10  ;;  %v6455_v10 = vunpack.i.h.bf16 %v8308_v39  ;;  %v3015_v39 = vpop.f32.mrf.mxu2 }
 0xd85   :  { %6292 = vmatpush.xpose.msk.msra.mxu3 %vm805_vm8, %v3453_v8  ;;  %v2389_v8 = vsub.f32 %v1845_v16, %v8182_v59 }
 0xd8c   :  { %6285 = vmatmul.msk.f32.vlgmr.msrb.gmra.mxu3 %vm805_vm8, %v8292_v22 }
 0xd8d   :  { %3673 = vmatpush.msrb.mxu3 %v6449_v2 }
 0xd91   :  { %v8365_v19 = vpop.xlane.xlu1 %3179 }
 0xd94   :  { %6293 = vmatmul.msk.f32.vlgmr.msra.gmra.mxu3 %vm805_vm8, %v3451_v43 }
 0xdac   :  { %v3488_v53 = vpop.xlane.xlu1 %3487 }
 0xdad   :  { %v3510_v6 = vsub.f32 %v8329_v51, %v3488_v53 }
 0xdbb   :  { %v3168_v49 = vpop.xlane.xlu2 %3167 }
 0xdbc   :  { %v3190_v48 = vsub.f32 %v3158_v17, %v3168_v49  ;;  %v3127_v49 = vpop.f32.mrf.mxu2 }
 0xdbe   :  { %v3198_v62 = vmul.f32 1.442695, %v3190_v48  ;;  %v3518_v48 = vmul.f32 1.442695, %v3510_v6  ;;  %v8385_v6 = vpop.permute.xlu0 %6462 }
 0xdc0   :  { %6688 = vpow2.f32 %v3198_v62  ;;  %v3164_v62 = vmul.f32 0.35355338, %v3127_v49 }
 0xdc1   :  { %6690 = vpow2.f32 %v3518_v48 }
 0xdc2   :  { %v3184_v59 = vsel %vm805_vm8, %v3164_v62, -inf }
 0xdc3   :  { %v6443_v20 = vpop.permute.xlu2 %6442 }
 0xdc4   :  { %v6445_v13 = vunpack.i.h.bf16 %v6443_v20  ;;  %v6444_v40 = vunpack.i.l.bf16 %v6443_v20 }
 0xdc6   :  { %v8359_v23 = vpop.eup %6688  ;;  %3595 = vmatpush.msrb.mxu0 %v6445_v13  ;;  %3647 = vmatpush.msra.mxu2 %v6444_v40  ;;  %v3160_v40 = vmul.f32 0.35355338, %v3015_v39 }
 0xdc7   :  { %v3214_v22 = vsel %vm805_vm8, %v8359_v23, 0.0 }
 0xdc8   :  { %3699 = vmatpush.msra.mxu0 %v6455_v10  ;;  %3751 = vmatpush.msrb.mxu2 %v6450_v42  ;;  %v6691_v42 = vpop.eup %6690  ;;  %v3335_v10 = vpop.f32.mrf.mxu2  ;;  %v3172_v51 = vsel %vm805_vm8, %v3160_v40, -inf }
 0xdc9   :  { %3215 = vadd.xlane.f32.xlu1 %v3214_v22  ;;  %v3534_v22 = vsel %vm805_vm8, %v6691_v42, 0.0 }
 0xdcb   :  { %v6458_v7 = vpop.permute.xlu2 %6457 }
 0xdcc   :  { %v6460_v17 = vunpack.i.h.bf16 %v6458_v7  ;;  %v6459_v55 = vunpack.i.l.bf16 %v6458_v7  ;;  %v3480_v7 = vmul.f32 0.35355338, %v3335_v10 }
 0xdce   :  { %3725 = vmatpush.msrb.mxu1 %v6460_v17  ;;  %3777 = vmatpush.msra.mxu3 %v6459_v55  ;;  %v3492_v37 = vsel %vm805_vm8, %v3480_v7, -inf }
 0xdd0   :  { %v3447_v16 = vpop.f32.mrf.mxu2 }
 0xdd1   :  { %v3484_v53 = vmul.f32 0.35355338, %v3447_v16 }
 0xdd3   :  { %v3504_v39 = vsel %vm805_vm8, %v3484_v53, -inf }
 0xdf7   :  { %v2923_v43 = vpop.f32.mrf.mxu3  ;;  %v3491_v17 = vpop.xlane.xlu1 %3490 }
 0xdf8   :  { %v8370_v18 = vsub.f32 %v2389_v8, %v2923_v43  ;;  %v3391_v61 = vpop.f32.mrf.mxu0  ;;  %v3511_v55 = vsub.f32 %v8347_v58, %v3491_v17 }
 0xdf9   :  { %v3482_v9 = vmul.f32 0.35355338, %v3391_v61 }
 0xdfa   :  { %v3520_v8 = vmul.f32 1.442695, %v3511_v55 }
 0xdfb   :  { %v3498_v2 = vsel %vm805_vm8, %v3482_v9, -inf }
 0xdfc   :  { %3499 = vmax.xlane.f32.xlu2 %v3498_v2  ;;  %6692 = vpow2.f32 %v3520_v8  ;;  %v3171_v2 = vpop.xlane.xlu0 %3170 }
 0xdff   :  { %v3043_v10 = vpop.f32.mrf.mxu3 }
 0xe00   :  { %v3419_v20 = vpop.f32.mrf.mxu1 }
 0xe01   :  { %v3483_v13 = vmul.f32 0.35355338, %v3419_v20 }
 0xe02   :  { %v8381_v43 = vpop.eup %6692 }
 0xe03   :  { %v3501_v36 = vsel %vm805_vm8, %v3483_v13, -inf  ;;  %v3537_v61 = vsel %vm805_vm8, %v8381_v43, 0.0 }
 0xe04   :  { %3502 = vmax.xlane.f32.xlu0 %v3501_v36  ;;  %3185 = vmax.xlane.f32.xlu2 %v3184_v59  ;;  %v8387_v58 = vpop.xlane.xlu0 %3182 }
 0xe0c   :  { %3173 = vmax.xlane.f32.xlu0 %v3172_v51  ;;  %3535 = vadd.xlane.f32.xlu2 %v3534_v22 }
 0xe14   :  { %3493 = vmax.xlane.f32.xlu0 %v3492_v37 }
 0xe1c   :  { %3505 = vmax.xlane.f32.xlu0 %v3504_v39 }
 0xe24   :  { %3538 = vadd.xlane.f32.xlu0 %v3537_v61 }
 0xe6f   :  { %v3500_v49 = vpop.xlane.xlu2 %3499 }
 0xe70   :  { %v3514_v48 = vsub.f32 %v3482_v9, %v3500_v49  ;;  %v3155_v49 = vpop.f32.mrf.mxu3 }
 0xe72   :  { %v3526_v20 = vmul.f32 1.442695, %v3514_v48 }
 0xe74   :  { %6694 = vpow2.f32 %v3526_v20 }
 0xe77   :  { %v3503_v36 = vpop.xlane.xlu0 %3502  ;;  %v3186_v59 = vpop.xlane.xlu2 %3185 }
 0xe78   :  { %v3515_v51 = vsub.f32 %v3483_v13, %v3503_v36  ;;  %v3196_v22 = vsub.f32 %v3164_v62, %v3186_v59  ;;  %v8401_v59 = vmul.f32 0.35355338, %v3155_v49  ;;  %v3363_v49 = vpop.f32.mrf.mxu3 }
 0xe7a   :  { %v8389_v17 = vpop.eup %6694  ;;  %v3528_v55 = vmul.f32 1.442695, %v3515_v51  ;;  %v3210_v37 = vmul.f32 1.442695, %v3196_v22  ;;  %v6465_v22 = vunpack.i.h.bf16 %v8385_v6 }
 0xe7b   :  { %v3546_v16 = vsel %vm805_vm8, %v8389_v17, 0.0 }
 0xe7c   :  { %6696 = vpow2.f32 %v3528_v55  ;;  %3547 = vadd.xlane.f32.xlu1 %v3546_v16  ;;  %v3191_v16 = vsub.f32 %v8319_v57, %v3171_v2 }
 0xe7d   :  { %6698 = vpow2.f32 %v3210_v37 }
 0xe7f   :  { %v3174_v8 = vpop.xlane.xlu0 %3173  ;;  %v3536_v39 = vpop.xlane.xlu2 %3535 }
 0xe80   :  { %v3192_v9 = vsub.f32 %v3160_v40, %v3174_v8  ;;  %6700 = vrcp.f32 %v3536_v39 }
 0xe82   :  { %v8393_v61 = vpop.eup %6696  ;;  %v3202_v48 = vmul.f32 1.442695, %v3192_v9  ;;  %v3187_v9 = vsel %vm805_vm8, %v8401_v59, -inf }
 0xe83   :  { %v8395_v13 = vpop.eup %6698  ;;  %v3549_v62 = vsel %vm805_vm8, %v8393_v61, 0.0 }
 0xe84   :  { %6702 = vpow2.f32 %v3202_v48  ;;  %3550 = vadd.xlane.f32.xlu2 %v3549_v62  ;;  %v3232_v20 = vsel %vm805_vm8, %v8395_v13, 0.0 }
 0xe85   :  { %3233 = vadd.xlane.f32.xlu1 %v3232_v20 }
 0xe86   :  { %v6701_v36 = vpop.eup %6700 }
 0xe87   :  { %v3566_v40 = vmul.f32 %v6701_v36, %v6691_v42  ;;  %v3494_v51 = vpop.xlane.xlu0 %3493  ;;  %v3200_v42 = vmul.f32 1.442695, %v3191_v16 }
 0xe88   :  { %v3512_v55 = vsub.f32 %v3480_v7, %v3494_v51  ;;  %v8412_v7 = vmul.f32 0.35355338, %v3363_v49 }
 0xe89   :  { %6294 = vmatmul.msk.f32.vlgmr.msrb.gmra.mxu0 %vm805_vm8, %v3566_v40 }
 0xe8a   :  { %v8405_v37 = vpop.eup %6702  ;;  %v3522_v8 = vmul.f32 1.442695, %v3512_v55  ;;  %3803 = vmatpush.msrb.mxu0 %v6465_v22  ;;  %v3495_v36 = vsel %vm805_vm8, %v8412_v7, -inf }
 0xe8b   :  { %v3220_v39 = vsel %vm805_vm8, %v8405_v37, 0.0 }
 0xe8c   :  { %6704 = vpow2.f32 %v3522_v8  ;;  %3221 = vadd.xlane.f32.xlu0 %v3220_v39  ;;  %3188 = vmax.xlane.f32.xlu2 %v3187_v9  ;;  %v8430_v9 = vmul.f32 0.35355338, %v3043_v10 }
 0xe8d   :  { %6706 = vpow2.f32 %v3200_v42  ;;  %v9860_v42 = vld [vmem:[#allocation29_spill] sm:$0xff] }
 0xe8f   :  { %v3506_v48 = vpop.xlane.xlu0 %3505 }
 0xe90   :  { %v3516_v62 = vsub.f32 %v3484_v53, %v3506_v48  ;;  %v3194_v53 = vsub.f32 %v8315_v45, %v8365_v19  ;;  %v3175_v45 = vsel %vm805_vm8, %v8430_v9, -inf }
 0xe92   :  { %v8414_v20 = vpop.eup %6704  ;;  %v3530_v57 = vmul.f32 1.442695, %v3516_v62  ;;  %v3206_v39 = vmul.f32 1.442695, %v3194_v53  ;;  %v9864_v62 = vld [vmem:[#allocation26_spill] sm:$0xff] }
 0xe93   :  { %v3540_v2 = vsel %vm805_vm8, %v8414_v20, 0.0  ;;  %v8420_v51 = vpop.eup %6706 }
 0xe94   :  { %6708 = vpow2.f32 %v3530_v57  ;;  %3541 = vadd.xlane.f32.xlu1 %v3540_v2  ;;  %3496 = vmax.xlane.f32.xlu2 %v3495_v36  ;;  %v3217_v16 = vsel %vm805_vm8, %v8420_v51, 0.0  ;;  %v9865_v57 = vld [vmem:[#allocation14_spill] sm:$0xff]  ;;  %v9866_v36 = vld [vmem:[#allocation11_spill] sm:$0xff] }
 0xe95   :  { %v6476_v2 = vpack.i.bf16 %v9865_v57, %v9864_v62 }
 0xe97   :  { %v3539_v40 = vpop.xlane.xlu0 %3538 }
 0xe98   :  { %6710 = vrcp.f32 %v3539_v40  ;;  %v9867_v40 = vld [vmem:[#allocation27_spill] sm:$0xff] }
 0xe99   :  { %6712 = vpow2.f32 %v3206_v39  ;;  %v6466_v53 = vpack.i.bf16 %v9867_v40, %v9866_v36 }
 0xe9a   :  { %v8422_v22 = vpop.eup %6708 }
 0xe9b   :  { %v3552_v55 = vsel %vm805_vm8, %v8422_v22, 0.0 }
 0xe9c   :  { %3553 = vadd.xlane.f32.xlu1 %v3552_v55  ;;  %3218 = vadd.xlane.f32.xlu2 %v3217_v16 }
 0xe9e   :  { %v6711_v8 = vpop.eup %6710 }
 0xe9f   :  { %v3567_v49 = vmul.f32 %v6711_v8, %v8381_v43  ;;  %v8438_v19 = vpop.eup %6712  ;;  %v9862_v43 = vld [vmem:[#allocation8_spill] sm:$0xff] }
 0xea0   :  { %4048 = vrot.lane.b32.xlu0 %v7359_v0, %s6899_s28  ;;  %v3226_v10 = vsel %vm805_vm8, %v8438_v19, 0.0  ;;  %v9861_v0 = vld [vmem:[#allocation13_spill] sm:$0xff] }
 0xea1   :  { %6295 = vmatmul.msk.f32.vlgmr.msra.gmra.mxu1 %vm805_vm8, %v3567_v49  ;;  %v9863_v48 = vpack.i.bf16 %v9861_v0, %v9862_v43 }
 0xea4   :  { %3176 = vmax.xlane.f32.xlu1 %v3175_v45 }
 0xea8   :  { %4046 = vrot.lane.b32.xlu0 %v9860_v42, %s6899_s28 }
 0xeac   :  { %3227 = vadd.xlane.f32.xlu1 %v3226_v10 }
 0xeb0   :  { %4160 = vrot.lane.b32.xlu0 %v7399_v25, %s6899_s28  ;;  %v3195_v25 = vsub.f32 %v8325_v24, %v8387_v58  ;;  %v6481_v24 = vpack.i.bf16 %v7696_v4, %v7533_v28 }
 0xeb2   :  { %v3208_v55 = vmul.f32 1.442695, %v3195_v25 }
 0xeb4   :  { %6472 = vrot.lane.b32.xlu2 %v9863_v48, %s6897_s2  ;;  %6714 = vpow2.f32 %v3208_v55 }
 0xeb8   :  { %4104 = vrot.lane.b32.xlu0 %v7379_v14, %s6899_s28  ;;  %v9868_v14 = vld [vmem:[#allocation31_spill] sm:$0xff] }
 0xeba   :  { %v8470_v16 = vpop.eup %6714 }
 0xebc   :  { %6477 = vrot.lane.b32.xlu2 %v6476_v2, %s6897_s2  ;;  %v6464_v2 = vunpack.i.l.bf16 %v8385_v6 }
 0xec4   :  { %3992 = vrot.lane.b32.xlu2 %v7293_v5, %s6899_s28  ;;  %v3216_v5 = vpop.xlane.xlu1 %3215 }
 0xec5   :  { %6467 = vrot.lane.b32.xlu1 %v6466_v53, %s6897_s2 }
 0xecc   :  { %4076 = vrot.lane.b32.xlu2 %v7369_v3, %s6899_s28 }
 0xed4   :  { %4020 = vrot.lane.b32.xlu2 %v7336_v32, %s6899_s28  ;;  %v3229_v32 = vsel %vm805_vm8, %v8470_v16, 0.0 }
 0xedc   :  { %4074 = vrot.lane.b32.xlu2 %v9868_v14, %s6899_s28 }
 0xee4   :  { %4018 = vrot.lane.b32.xlu2 %v7920_v21, %s6899_s28 }
 0xeec   :  { %4132 = vrot.lane.b32.xlu2 %v7389_v26, %s6899_s28 }
 0xeef   :  { %v3548_v3 = vpop.xlane.xlu1 %3547  ;;  %3230 = vadd.xlane.f32.xlu1 %v3229_v32 }
 0xef0   :  { %6716 = vrcp.f32 %v3548_v3 }
 0xef1   :  { %6718 = vrcp.f32 %v3216_v5 }
 0xef4   :  { %6482 = vrot.lane.b32.xlu2 %v6481_v24, %s6899_s28 }
 0xef6   :  { %v6717_v58 = vpop.eup %6716 }
 0xef7   :  { %v3570_v8 = vmul.f32 %v6717_v58, %v8389_v17  ;;  %v3551_v39 = vpop.xlane.xlu2 %3550  ;;  %v6719_v26 = vpop.eup %6718  ;;  %v9869_v17 = vld [vmem:[#allocation30_spill] sm:$0xff] }
 0xef8   :  { %6720 = vrcp.f32 %v3551_v39  ;;  %v3246_v45 = vmul.f32 %v6719_v26, %v8359_v23  ;;  %v8484_v10 = vpop.xlane.xlu1 %3233 }
 0xef9   :  { %6298 = vmatmul.msk.f32.vlgmr.msra.gmra.mxu0 %vm805_vm8, %v3570_v8 }
 0xefc   :  { %6492 = vrot.lane.b32.xlu2 %v8063_v47, %s6899_s28 }
 0xefe   :  { %v6721_v49 = vpop.eup %6720 }
 0xeff   :  { %v3571_v28 = vmul.f32 %v6721_v49, %v8393_v61  ;;  %v3189_v4 = vpop.xlane.xlu2 %3188  ;;  %v3222_v47 = vpop.xlane.xlu0 %3221 }
 0xf00   :  { %v3197_v58 = vsub.f32 %v8401_v59, %v3189_v4 }
 0xf01   :  { %6299 = vmatmul.msk.f32.vlgmr.msrb.gmra.mxu1 %vm805_vm8, %v3571_v28  ;;  %6302 = vmatmul.msk.f32.vlgmr.msrb.gmra.mxu0 %vm805_vm8, %v3246_v45 }
 0xf04   :  { %4526 = vrot.lane.b32.xlu2 %v9869_v17, %s6900_s29 }
 0xf07   :  { %v3542_v0 = vpop.xlane.xlu1 %3541  ;;  %v3497_v43 = vpop.xlane.xlu2 %3496 }
 0xf08   :  { %6722 = vrcp.f32 %v3542_v0  ;;  %3990 = vrot.lane.b32.xlu1 %v9869_v17, %s6899_s28  ;;  %v3513_v28 = vsub.f32 %v8412_v7, %v3497_v43 }
 0xf0a   :  { %v3524_v0 = vmul.f32 1.442695, %v3513_v28 }
 0xf0e   :  { %v6723_v23 = vpop.eup %6722 }
 0xf0f   :  { %v3568_v48 = vmul.f32 %v6723_v23, %v8414_v20  ;;  %v3554_v61 = vpop.xlane.xlu1 %3553  ;;  %v3219_v57 = vpop.xlane.xlu2 %3218 }
 0xf10   :  { %6724 = vrcp.f32 %v3554_v61  ;;  %v3475_v61 = vpop.f32.mrf.mxu3 }
 0xf11   :  { %6726 = vrcp.f32 %v3219_v57  ;;  %6296 = vmatmul.msk.f32.vlgmr.msra.gmra.mxu2 %vm805_vm8, %v3568_v48  ;;  %v3485_v57 = vmul.f32 0.35355338, %v3475_v61 }
 0xf12   :  { %3855 = vmatpush.msra.mxu2 %v6464_v2  ;;  %v8496_v36 = vpop.permute.xlu0 %4048  ;;  %6728 = vrcp.f32 %v3222_v47 }
 0xf16   :  { %v6725_v53 = vpop.eup %6724 }
 0xf17   :  { %v6727_v25 = vpop.eup %6726  ;;  %v3572_v55 = vmul.f32 %v6725_v53, %v8422_v22  ;;  %v3177_v5 = vpop.xlane.xlu1 %3176  ;;  %v3212_v22 = vmul.f32 1.442695, %v3197_v58  ;;  %v3507_v53 = vsel %vm805_vm8, %v3485_v57, -inf }
 0xf18   :  { %v6473_v32 = vpop.permute.xlu2 %6472  ;;  %v3193_v20 = vsub.f32 %v8430_v9, %v3177_v5  ;;  %v3247_v6 = vmul.f32 %v6727_v25, %v8420_v51  ;;  %v6729_v26 = vpop.eup %6728 }
 0xf19   :  { %v6475_v3 = vunpack.i.h.bf16 %v6473_v32  ;;  %v6474_v24 = vunpack.i.l.bf16 %v6473_v32  ;;  %6300 = vmatmul.msk.f32.vlgmr.msrb.gmra.mxu2 %vm805_vm8, %v3572_v55  ;;  %v3248_v49 = vmul.f32 %v6729_v26, %v8405_v37 }
 0xf1a   :  { %v3204_v8 = vmul.f32 1.442695, %v3193_v20  ;;  %v4047_v39 = vpop.permute.xlu0 %4046 }
 0xf1b   :  { %3829 = vmatpush.msra.mxu1 %v6474_v24  ;;  %3907 = vmatpush.msra.mxu0 %v6475_v3 }
 0xf1c   :  { %6303 = vmatmul.msk.f32.vlgmr.msra.gmra.mxu1 %vm805_vm8, %v3247_v6  ;;  %6730 = vpow2.f32 %v3204_v8  ;;  %v9870_v6 = vld [vmem:[#allocation25_spill] sm:$0xff] }
 0xf1f   :  { %v3228_v9 = vpop.xlane.xlu1 %3227 }
 0xf20   :  { %v8505_v45 = vpop.permute.xlu2 %6477  ;;  %6732 = vrcp.f32 %v3228_v9 }
 0xf21   :  { %v6480_v51 = vunpack.i.h.bf16 %v8505_v45  ;;  %6304 = vmatmul.msk.f32.vlgmr.msra.gmra.mxu2 %vm805_vm8, %v3248_v49  ;;  %6734 = vpow2.f32 %v3212_v22 }
 0xf22   :  { %v8509_v59 = vpop.eup %6730  ;;  %v4161_v4 = vpop.permute.xlu0 %4160  ;;  %6736 = vpow2.f32 %v3524_v0 }
 0xf23   :  { %3933 = vmatpush.msrb.mxu1 %v6480_v51  ;;  %v3223_v17 = vsel %vm805_vm8, %v8509_v59, 0.0  ;;  %6738 = vrcp.f32 %v8484_v10 }
 0xf24   :  { %3224 = vadd.xlane.f32.xlu0 %v3223_v17 }
 0xf26   :  { %v6733_v37 = vpop.eup %6732 }
 0xf27   :  { %v3250_v47 = vmul.f32 %v6733_v37, %v8438_v19  ;;  %v8515_v48 = vpop.eup %6734 }
 0xf28   :  { %v3993_v23 = vpop.permute.xlu2 %3992  ;;  %v3235_v43 = vsel %vm805_vm8, %v8515_v48, 0.0  ;;  %v6737_v19 = vpop.eup %6736 }
 0xf29   :  { %6310 = vmatpush.xpose.msk.msrb.mxu0 %vm805_vm8, %v3993_v23  ;;  %v3543_v25 = vsel %vm805_vm8, %v6737_v19, 0.0  ;;  %v6739_v55 = vpop.eup %6738 }
 0xf2a   :  { %6306 = vmatmul.msk.f32.vlgmr.msra.gmra.mxu0 %vm805_vm8, %v3250_v47  ;;  %v4105_v7 = vpop.permute.xlu0 %4104  ;;  %v3252_v3 = vmul.f32 %v6739_v55, %v8395_v13 }
 0xf2c   :  { %3236 = vadd.xlane.f32.xlu0 %v3235_v43 }
 0xf2d   :  { %6318 = vmatpush.xpose.msk.msra.mxu0 %vm805_vm8, %v4105_v7 }
 0xf30   :  { %v8522_v2 = vpop.permute.xlu2 %4076 }
 0xf32   :  { %3508 = vmax.xlane.f32.xlu1 %v3507_v53 }
 0xf34   :  { %3544 = vadd.xlane.f32.xlu0 %v3543_v25 }
 0xf37   :  { %v6468_v5 = vpop.permute.xlu1 %6467 }
 0xf38   :  { %v4021_v32 = vpop.permute.xlu2 %4020  ;;  %v6470_v20 = vunpack.i.h.bf16 %v6468_v5  ;;  %v6469_v55 = vunpack.i.l.bf16 %v6468_v5 }
 0xf39   :  { %6312 = vmatpush.xpose.msk.msra.mxu1 %vm805_vm8, %v4021_v32 }
 0xf3a   :  { %3959 = vmatpush.msrb.mxu2 %v6470_v20 }
 0xf3b   :  { %6308 = vmatmul.msk.f32.vlgmr.msrb.gmra.mxu2 %vm805_vm8, %v3252_v3 }
 0xf3c   :  { %6314 = vmatpush.xpose.msk.msra.mxu2 %vm805_vm8, %v8496_v36 }
 0xf40   :  { %6322 = vmatpush.xpose.msk.msrb.mxu2 %vm805_vm8, %v4161_v4  ;;  %v8533_v10 = vpop.permute.xlu2 %4074 }
 0xf43   :  { %6315 = vmatmul.msk.f32.vlgmr.msra.gmra.mxu2 %vm805_vm8, %v4047_v39  ;;  %v9871_v39 = vld [vmem:[#allocation16_spill] sm:$0xff] }
 0xf44   :  { %v6496_v26 = vpack.i.bf16 %v9871_v39, %v7731_v41 }
 0xf48   :  { %v4019_v24 = vpop.permute.xlu2 %4018  ;;  %4158 = vrot.lane.b32.xlu0 %v9870_v6, %s6899_s28 }
 0xf4b   :  { %4102 = vrot.lane.b32.xlu1 %v7901_v46, %s6899_s28 }
 0xf50   :  { %v4133_v13 = vpop.permute.xlu2 %4132  ;;  %4188 = vrot.lane.b32.xlu0 %v7409_v31, %s6899_s28  ;;  %v3597_v31 = vpop.f32.mrf.mxu0 }
 0xf58   :  { %v6483_v58 = vpop.permute.xlu2 %6482  ;;  %4130 = vrot.lane.b32.xlu0 %v7930_v33, %s6899_s28 }
 0xf59   :  { %v6485_v8 = vunpack.i.h.bf16 %v6483_v58  ;;  %v6484_v9 = vunpack.i.l.bf16 %v6483_v58 }
 0xf5b   :  { %4383 = vmatpush.msra.mxu2 %v6485_v8  ;;  %v9872_v8 = vld [vmem:[#allocation28_spill] sm:$0xff] }
 0xf60   :  { %6487 = vrot.lane.b32.xlu0 %v8075_v50, %s6899_s28  ;;  %v8566_v20 = vpop.permute.xlu2 %6492 }
 0xf61   :  { %v6495_v3 = vunpack.i.h.bf16 %v8566_v20 }
 0xf62   :  { %v3231_v36 = vpop.xlane.xlu1 %3230 }
 0xf63   :  { %6740 = vrcp.f32 %v3231_v36  ;;  %v8576_v36 = vpop.f32.mrf.mxu1 }
 0xf68   :  { %6497 = vrot.lane.b32.xlu0 %v6496_v26, %s6899_s28 }
 0xf69   :  { %v6741_v22 = vpop.eup %6740 }
 0xf6a   :  { %v3251_v49 = vmul.f32 %v6741_v22, %v8470_v16 }
 0xf6c   :  { %6307 = vmatmul.msk.f32.vlgmr.msrb.gmra.mxu1 %vm805_vm8, %v3251_v49 }
 0xf6d   :  { %6320 = vmatpush.xpose.msk.msrb.mxu1 %vm805_vm8, %v4133_v13 }
 0xf70   :  { %4584 = vrot.lane.b32.xlu0 %v7545_v29, %s6900_s29 }
 0xf74   :  { %6313 = vmatmul.msk.f32.vlgmr.msra.gmra.mxu1 %vm805_vm8, %v4019_v24 }
 0xf76   :  { %v8555_v50 = vpop.f32.mrf.mxu0 }
 0xf7a   :  { %v3991_v51 = vpop.permute.xlu1 %3990 }
 0xf7b   :  { %6311 = vmatmul.msk.f32.vlgmr.msrb.gmra.mxu0 %vm805_vm8, %v3991_v51 }
 0xf7c   :  { %4331 = vmatpush.msrb.mxu0 %v6484_v9 }
 0xf7e   :  { %v3805_v41 = vpop.f32.mrf.mxu0  ;;  %v8580_v49 = vpop.f32.mrf.mxu1 }
 0xf7f   :  { %v8558_v28 = vadd.f32 %v3805_v41, %v3597_v31 }
 0xf94   :  { %v3649_v16 = vpop.f32.mrf.mxu2 }
 0xf97   :  { %v3225_v4 = vpop.xlane.xlu0 %3224 }
 0xf99   :  { %v8582_v51 = vpop.f32.mrf.mxu1 }
 0xf9c   :  { %v3753_v17 = vpop.f32.mrf.mxu2 }
 0xf9f   :  { %v8560_v37 = vpop.xlane.xlu0 %3236 }
 0xfa4   :  { %v3857_v0 = vpop.f32.mrf.mxu2 }
 0xfa5   :  { %v8562_v47 = vadd.f32 %v3857_v0, %v3649_v16  ;;  %v3509_v29 = vpop.xlane.xlu1 %3508 }
 0xfa6   :  { %v3517_v23 = vsub.f32 %v3485_v57, %v3509_v29 }
 0xfa7   :  { %v3545_v61 = vpop.xlane.xlu0 %3544  ;;  %v8586_v16 = vpop.f32.mrf.mxu0 }
 0xfa8   :  { %v3532_v7 = vmul.f32 1.442695, %v3517_v23  ;;  %6742 = vrcp.f32 %v3545_v61 }
 0xfaa   :  { %6744 = vpow2.f32 %v3532_v7 }
 0xfae   :  { %v6743_v43 = vpop.eup %6742 }
 0xfaf   :  { %v3569_v53 = vmul.f32 %v6743_v43, %v6737_v19 }
 0xfb0   :  { %v6745_v25 = vpop.eup %6744 }
 0xfb1   :  { %6297 = vmatmul.msk.f32.vlgmr.msrb.gmra.mxu3 %vm805_vm8, %v3569_v53  ;;  %v3555_v32 = vsel %vm805_vm8, %v6745_v25, 0.0 }
 0xfb2   :  { %3881 = vmatpush.msrb.mxu3 %v6469_v55  ;;  %3556 = vadd.xlane.f32.xlu1 %v3555_v32 }
 0xfba   :  { %v4159_v24 = vpop.permute.xlu0 %4158 }
 0xfbb   :  { %6323 = vmatmul.msk.f32.vlgmr.msrb.gmra.mxu2 %vm805_vm8, %v4159_v24  ;;  %v6479_v24 = vunpack.i.l.bf16 %v8505_v45 }
 0xfbc   :  { %4487 = vmatpush.msrb.mxu2 %v6495_v3 }
 0xfbd   :  { %v4103_v57 = vpop.permute.xlu1 %4102 }
 0xfbe   :  { %v3961_v13 = vpop.f32.mrf.mxu2  ;;  %6319 = vmatmul.msk.f32.vlgmr.msra.gmra.mxu0 %vm805_vm8, %v4103_v57 }
 0xfbf   :  { %v8571_v19 = vadd.f32 %v3961_v13, %v3753_v17 }
 0xfc2   :  { %v4189_v5 = vpop.permute.xlu0 %4188 }
 0xfc6   :  { %v4071_v23 = vpop.f32.mrf.mxu2 }
 0xfca   :  { %v4131_v58 = vpop.permute.xlu0 %4130 }
 0xfcb   :  { %4186 = vrot.lane.b32.xlu1 %v9872_v8, %s6899_s28  ;;  %6321 = vmatmul.msk.f32.vlgmr.msrb.gmra.mxu1 %vm805_vm8, %v4131_v58 }
 0xfd2   :  { %v6488_v39 = vpop.permute.xlu0 %6487 }
 0xfd3   :  { %v6490_v26 = vunpack.i.h.bf16 %v6488_v39  ;;  %v6489_v22 = vunpack.i.l.bf16 %v6488_v39  ;;  %4528 = vrot.lane.b32.xlu1 %v7661_v63, %s6900_s29  ;;  %v4216_v63 = vmul.f32 0.35355338, %v4071_v23 }
 0xfd5   :  { %4357 = vmatpush.msra.mxu1 %v6489_v22  ;;  %4435 = vmatpush.msra.mxu0 %v6490_v26  ;;  %v4228_v53 = vsel %vm805_vm8, %v4216_v63, -inf }
 0xfda   :  { %v6498_v31 = vpop.permute.xlu0 %6497 }
 0xfdb   :  { %v6499_v9 = vunpack.i.l.bf16 %v6498_v31 }
 0xfdd   :  { %4461 = vmatpush.msrb.mxu1 %v6499_v9 }
 0xfe9   :  { %v8584_v41 = vpop.f32.mrf.mxu1 }
 0xff1   :  { %v4043_v17 = vpop.f32.mrf.mxu1 }
 0xff2   :  { %v4215_v0 = vmul.f32 0.35355338, %v4043_v17  ;;  %v6500_v17 = vunpack.i.h.bf16 %v6498_v31 }
 0xff4   :  { %v4225_v29 = vsel %vm805_vm8, %v4215_v0, -inf }
 0xff5   :  { %4226 = vmax.xlane.f32.xlu0 %v4225_v29 }
 0xff8   :  { %v4015_v61 = vpop.f32.mrf.mxu0 }
 0xff9   :  { %v4214_v7 = vmul.f32 0.35355338, %v4015_v61 }
 0xffb   :  { %v4222_v43 = vsel %vm805_vm8, %v4214_v7, -inf }
 0xffc   :  { %4223 = vmax.xlane.f32.xlu2 %v4222_v43 }
 0xffd   :  { %4229 = vmax.xlane.f32.xlu1 %v4228_v53 }
0x1025   :  { %v3557_v55 = vpop.xlane.xlu1 %3556 }
0x1026   :  { %6746 = vrcp.f32 %v3557_v55 }
0x1027   :  { %6748 = vrcp.f32 %v3225_v4 }
0x1028   :  { %6750 = vrcp.f32 %v8560_v37  ;;  %v6494_v37 = vunpack.i.l.bf16 %v8566_v20 }
0x102c   :  { %v6747_v32 = vpop.eup %6746 }
0x102d   :  { %v3573_v3 = vmul.f32 %v6747_v32, %v6745_v25  ;;  %v6749_v57 = vpop.eup %6748 }
0x102e   :  { %v3249_v13 = vmul.f32 %v6749_v57, %v8509_v59  ;;  %v6751_v58 = vpop.eup %6750 }
0x102f   :  { %6301 = vmatmul.msk.f32.vlgmr.msra.gmra.mxu3 %vm805_vm8, %v3573_v3  ;;  %v3253_v4 = vmul.f32 %v6751_v58, %v8515_v48 }
0x1030   :  { %3985 = vmatpush.msra.mxu3 %v6479_v24 }
0x1037   :  { %6305 = vmatmul.msk.f32.vlgmr.msrb.gmra.mxu3 %vm805_vm8, %v3249_v13 }
0x1038   :  { %6316 = vmatpush.xpose.msk.msrb.mxu3 %vm805_vm8, %v8522_v2 }
0x103b   :  { %v4127_v39 = vpop.f32.mrf.mxu0 }
0x103c   :  { %v4218_v26 = vmul.f32 0.35355338, %v4127_v39 }
0x103d   :  { %v4187_v29 = vpop.permute.xlu1 %4186 }
0x103e   :  { %v4183_v25 = vpop.f32.mrf.mxu2  ;;  %v4234_v45 = vsel %vm805_vm8, %v4218_v26, -inf }
0x103f   :  { %v4220_v22 = vmul.f32 0.35355338, %v4183_v25  ;;  %6309 = vmatmul.msk.f32.vlgmr.msra.gmra.mxu3 %vm805_vm8, %v3253_v4  ;;  %4235 = vmax.xlane.f32.xlu2 %v4234_v45 }
0x1040   :  { %6324 = vmatpush.xpose.msk.msra.mxu3 %vm805_vm8, %v4189_v5  ;;  %v8610_v5 = vpop.permute.xlu0 %4584 }
0x1041   :  { %v4240_v59 = vsel %vm805_vm8, %v4220_v22, -inf }
0x1042   :  { %4241 = vmax.xlane.f32.xlu0 %v4240_v59 }
0x1045   :  { %v8616_v31 = vpop.permute.xlu1 %4528 }
0x1047   :  { %6317 = vmatmul.msk.f32.vlgmr.msrb.gmra.mxu3 %vm805_vm8, %v8533_v10  ;;  %v8614_v10 = vpop.permute.xlu2 %4526 }
0x1048   :  { %4409 = vmatpush.msrb.mxu3 %v6494_v37  ;;  %v4155_v2 = vpop.f32.mrf.mxu1 }
0x1049   :  { %v4219_v48 = vmul.f32 0.35355338, %v4155_v2 }
0x104b   :  { %v4237_v9 = vsel %vm805_vm8, %v4219_v48, -inf }
0x104c   :  { %4238 = vmax.xlane.f32.xlu2 %v4237_v9 }
0x104f   :  { %6325 = vmatmul.msk.f32.vlgmr.msra.gmra.mxu3 %vm805_vm8, %v4187_v29 }
0x1050   :  { %4513 = vmatpush.msra.mxu3 %v6500_v17 }
0x1056   :  { %4556 = vrot.lane.b32.xlu0 %v7679_v38, %s6900_s29 }
0x1064   :  { %4582 = vrot.lane.b32.xlu2 %v9860_v42, %s6900_s29 }
0x1068   :  { %v4227_v20 = vpop.xlane.xlu0 %4226 }
0x1069   :  { %v4247_v23 = vsub.f32 %v4215_v0, %v4227_v20 }
0x106b   :  { %v4256_v61 = vmul.f32 1.442695, %v4247_v23 }
0x106d   :  { %6752 = vpow2.f32 %v4256_v61 }
0x106f   :  { %v4224_v43 = vpop.xlane.xlu2 %4223 }
0x1070   :  { %v4246_v53 = vsub.f32 %v4214_v7, %v4224_v43  ;;  %v4230_v38 = vpop.xlane.xlu1 %4229  ;;  %v3675_v7 = vpop.f32.mrf.mxu3 }
0x1071   :  { %v4248_v24 = vsub.f32 %v4216_v63, %v4230_v38 }
0x1072   :  { %v4254_v55 = vmul.f32 1.442695, %v4246_v53 }
0x1073   :  { %v6753_v32 = vpop.eup %6752  ;;  %v4258_v42 = vmul.f32 1.442695, %v4248_v24 }
0x1074   :  { %v4273_v3 = vsel %vm805_vm8, %v6753_v32, 0.0  ;;  %6754 = vpow2.f32 %v4254_v55 }
0x1075   :  { %4274 = vadd.xlane.f32.xlu1 %v4273_v3  ;;  %6756 = vpow2.f32 %v4258_v42 }
0x107a   :  { %v6755_v57 = vpop.eup %6754 }
0x107b   :  { %v4270_v13 = vsel %vm805_vm8, %v6755_v57, 0.0  ;;  %v6757_v0 = vpop.eup %6756 }
0x107c   :  { %v4276_v58 = vsel %vm805_vm8, %v6757_v0, 0.0 }
0x1080   :  { %4271 = vadd.xlane.f32.xlu0 %v4270_v13 }
0x108d   :  { %4277 = vadd.xlane.f32.xlu2 %v4276_v58 }
0x10a5   :  { %4554 = vrot.lane.b32.xlu2 %v7920_v21, %s6900_s29 }
0x10ad   :  { %4640 = vrot.lane.b32.xlu2 %v7710_v11, %s6900_s29 }
0x10b2   :  { %v3779_v39 = vpop.f32.mrf.mxu3  ;;  %v4236_v4 = vpop.xlane.xlu2 %4235 }
0x10b3   :  { %v4250_v63 = vsub.f32 %v4218_v26, %v4236_v4 }
0x10b5   :  { %v4262_v25 = vmul.f32 1.442695, %v4250_v63  ;;  %v4242_v45 = vpop.xlane.xlu0 %4241  ;;  %4694 = vrot.lane.b32.xlu2 %v9870_v6, %s6900_s29 }
0x10b6   :  { %v4252_v59 = vsub.f32 %v4220_v22, %v4242_v45 }
0x10b7   :  { %6758 = vpow2.f32 %v4262_v25 }
0x10b8   :  { %v4266_v37 = vmul.f32 1.442695, %v4252_v59 }
0x10ba   :  { %v3883_v2 = vpop.f32.mrf.mxu3  ;;  %6760 = vpow2.f32 %v4266_v37 }
0x10bb   :  { %v8627_v9 = vadd.f32 %v3883_v2, %v3675_v7 }
0x10bd   :  { %v6759_v17 = vpop.eup %6758  ;;  %4724 = vrot.lane.b32.xlu2 %v7673_v15, %s6900_s29 }
0x10be   :  { %v4282_v11 = vsel %vm805_vm8, %v6759_v17, 0.0 }
0x10bf   :  { %4283 = vadd.xlane.f32.xlu0 %v4282_v11  ;;  %v4239_v21 = vpop.xlane.xlu2 %4238 }
0x10c0   :  { %v4251_v26 = vsub.f32 %v4219_v48, %v4239_v21  ;;  %v6761_v23 = vpop.eup %6760 }
0x10c1   :  { %v4288_v22 = vsel %vm805_vm8, %v6761_v23, 0.0 }
0x10c2   :  { %v4264_v29 = vmul.f32 1.442695, %v4251_v26  ;;  %v3987_v20 = vpop.f32.mrf.mxu3 }
0x10c3   :  { %v8632_v6 = vadd.f32 %v3987_v20, %v3779_v39 }
0x10c4   :  { %6762 = vpow2.f32 %v4264_v29 }
0x10c7   :  { %4289 = vadd.xlane.f32.xlu0 %v4288_v22 }
0x10c8   :  { %v4557_v48 = vpop.permute.xlu0 %4556 }
0x10ca   :  { %v6763_v61 = vpop.eup %6762  ;;  %v4099_v24 = vpop.f32.mrf.mxu3 }
0x10cb   :  { %v4285_v43 = vsel %vm805_vm8, %v6763_v61, 0.0 }
0x10cc   :  { %4286 = vadd.xlane.f32.xlu1 %v4285_v43 }
0x10d2   :  { %v4211_v58 = vpop.f32.mrf.mxu3 }
0x10db   :  { %4610 = vrot.lane.b32.xlu0 %v9868_v14, %s6900_s29  ;;  %v4583_v14 = vpop.permute.xlu2 %4582 }
0x10e3   :  { %4696 = vrot.lane.b32.xlu0 %v7642_v12, %s6900_s29 }
0x10e5   :  { %4612 = vrot.lane.b32.xlu1 %v7552_v35, %s6900_s29 }
0x10e8   :  { %v4275_v15 = vpop.xlane.xlu1 %4274 }
0x10e9   :  { %6764 = vrcp.f32 %v4275_v15 }
0x10eb   :  { %4666 = vrot.lane.b32.xlu0 %v7930_v33, %s6900_s29 }
0x10ef   :  { %v6765_v53 = vpop.eup %6764 }
0x10f0   :  { %v4303_v55 = vmul.f32 %v6765_v53, %v6753_v32  ;;  %v4217_v32 = vmul.f32 0.35355338, %v4099_v24 }
0x10f2   :  { %6327 = vmatmul.msk.f32.vlgmr.msra.gmra.mxu1 %vm805_vm8, %v4303_v55  ;;  %v4231_v13 = vsel %vm805_vm8, %v4217_v32, -inf }
0x10f3   :  { %6336 = vmatpush.xpose.msk.msra.mxu1 %vm805_vm8, %v4557_v48  ;;  %v4272_v3 = vpop.xlane.xlu0 %4271 }
0x10f4   :  { %6766 = vrcp.f32 %v4272_v3 }
0x10fa   :  { %v6767_v38 = vpop.eup %6766 }
0x10fb   :  { %v4302_v12 = vmul.f32 %v6767_v38, %v6755_v57  ;;  %v4221_v57 = vmul.f32 0.35355338, %v4211_v58  ;;  %v3910_v38 = vadd.f32 %v8586_v16, %v8555_v50 }
0x10fd   :  { %6326 = vmatmul.msk.f32.vlgmr.msrb.gmra.mxu0 %vm805_vm8, %v4302_v12  ;;  %v4243_v7 = vsel %vm805_vm8, %v4221_v57, -inf }
0x10fe   :  { %6334 = vmatpush.xpose.msk.msrb.mxu0 %vm805_vm8, %v8616_v31 }
0x1100   :  { %v4278_v35 = vpop.xlane.xlu2 %4277 }
0x1101   :  { %6768 = vrcp.f32 %v4278_v35 }
0x1107   :  { %v6769_v33 = vpop.eup %6768 }
0x1108   :  { %v4304_v42 = vmul.f32 %v6769_v33, %v6757_v0  ;;  %v4555_v31 = vpop.permute.xlu2 %4554 }
0x110a   :  { %6328 = vmatmul.msk.f32.vlgmr.msra.gmra.mxu2 %vm805_vm8, %v4304_v42 }
0x110b   :  { %6338 = vmatpush.xpose.msk.msra.mxu2 %vm805_vm8, %v8610_v5 }
0x110f   :  { %4232 = vmax.xlane.f32.xlu1 %v4231_v13 }
0x1110   :  { %v4641_v25 = vpop.permute.xlu2 %4640 }
0x1117   :  { %4244 = vmax.xlane.f32.xlu1 %v4243_v7 }
0x1118   :  { %v4695_v11 = vpop.permute.xlu2 %4694 }
0x1130   :  { %4638 = vrot.lane.b32.xlu1 %v7901_v46, %s6900_s29 }
0x1132   :  { %v4284_v39 = vpop.xlane.xlu0 %4283 }
0x1133   :  { %6770 = vrcp.f32 %v4284_v39 }
0x1139   :  { %v6771_v0 = vpop.eup %6770 }
0x113a   :  { %v4306_v4 = vmul.f32 %v6771_v0, %v6759_v17  ;;  %v4290_v63 = vpop.xlane.xlu0 %4289 }
0x113b   :  { %6772 = vrcp.f32 %v4290_v63 }
0x113c   :  { %6330 = vmatmul.msk.f32.vlgmr.msra.gmra.mxu0 %vm805_vm8, %v4306_v4 }
0x113d   :  { %6342 = vmatpush.xpose.msk.msra.mxu0 %vm805_vm8, %v4641_v25  ;;  %v4725_v25 = vpop.permute.xlu2 %4724 }
0x113f   :  { %v4287_v5 = vpop.xlane.xlu1 %4286 }
0x1140   :  { %6774 = vrcp.f32 %v4287_v5 }
0x1141   :  { %v6773_v45 = vpop.eup %6772 }
0x1142   :  { %v4308_v59 = vmul.f32 %v6773_v45, %v6761_v23 }
0x1144   :  { %6332 = vmatmul.msk.f32.vlgmr.msrb.gmra.mxu2 %vm805_vm8, %v4308_v59  ;;  %6335 = vmatmul.msk.f32.vlgmr.msrb.gmra.mxu0 %vm805_vm8, %v8614_v10 }
0x1146   :  { %v6775_v46 = vpop.eup %6774 }
0x1147   :  { %v4307_v37 = vmul.f32 %v6775_v46, %v6763_v61 }
0x1149   :  { %6331 = vmatmul.msk.f32.vlgmr.msrb.gmra.mxu1 %vm805_vm8, %v4307_v37 }
0x114c   :  { %6339 = vmatmul.msk.f32.vlgmr.msra.gmra.mxu2 %vm805_vm8, %v4583_v14 }
0x114d   :  { %v8663_v2 = vpop.permute.xlu0 %4610 }
0x1151   :  { %6337 = vmatmul.msk.f32.vlgmr.msra.gmra.mxu1 %vm805_vm8, %v4555_v31 }
0x1155   :  { %v4697_v17 = vpop.permute.xlu0 %4696 }
0x1156   :  { %6346 = vmatpush.xpose.msk.msrb.mxu2 %vm805_vm8, %v4697_v17 }
0x1157   :  { %v4613_v21 = vpop.permute.xlu1 %4612 }
0x1159   :  { %6347 = vmatmul.msk.f32.vlgmr.msrb.gmra.mxu2 %vm805_vm8, %v4695_v11  ;;  %v9873_v11 = vld [vmem:[#allocation9_spill] sm:$0xff] }
0x115d   :  { %v4667_v37 = vpop.permute.xlu0 %4666 }
0x116f   :  { %v8685_v35 = vpop.f32.mrf.mxu1 }
0x117a   :  { %v4333_v26 = vpop.f32.mrf.mxu0 }
0x117b   :  { %v8669_v10 = vadd.f32 %v4333_v26, %v8558_v28 }
0x1182   :  { %v4233_v29 = vpop.xlane.xlu1 %4232 }
0x1183   :  { %v4249_v20 = vsub.f32 %v4217_v32, %v4233_v29  ;;  %v3936_v32 = vadd.f32 %v8584_v41, %v8580_v49 }
0x1185   :  { %v4260_v23 = vmul.f32 1.442695, %v4249_v20 }
0x1187   :  { %6776 = vpow2.f32 %v4260_v23 }
0x118a   :  { %v4245_v22 = vpop.xlane.xlu1 %4244 }
0x118b   :  { %v4253_v61 = vsub.f32 %v4221_v57, %v4245_v22 }
0x118d   :  { %v6777_v43 = vpop.eup %6776  ;;  %v4268_v15 = vmul.f32 1.442695, %v4253_v61  ;;  %v4385_v48 = vpop.f32.mrf.mxu2 }
0x118e   :  { %v8672_v53 = vadd.f32 %v4385_v48, %v8562_v47  ;;  %v4279_v55 = vsel %vm805_vm8, %v6777_v43, 0.0 }
0x118f   :  { %6778 = vpow2.f32 %v4268_v15  ;;  %4280 = vadd.xlane.f32.xlu1 %v4279_v55 }
0x1195   :  { %v6779_v3 = vpop.eup %6778 }
0x1196   :  { %v4291_v28 = vsel %vm805_vm8, %v6779_v3, 0.0 }
0x1197   :  { %4292 = vadd.xlane.f32.xlu1 %v4291_v28 }
0x11a2   :  { %v4639_v14 = vpop.permute.xlu1 %4638 }
0x11a3   :  { %6343 = vmatmul.msk.f32.vlgmr.msra.gmra.mxu0 %vm805_vm8, %v4639_v14 }
0x11b0   :  { %4668 = vrot.lane.b32.xlu1 %v7723_v56, %s6900_s29 }
0x11b8   :  { %4722 = vrot.lane.b32.xlu1 %v9872_v8, %s6900_s29 }
0x11b9   :  { %v4437_v47 = vpop.f32.mrf.mxu0 }
0x11ba   :  { %v8683_v12 = vadd.f32 %v4437_v47, %v3910_v38 }
0x11c1   :  { %v4551_v24 = vpop.f32.mrf.mxu0 }
0x11c2   :  { %v4750_v33 = vmul.f32 0.35355338, %v4551_v24 }
0x11c4   :  { %v4758_v42 = vsel %vm805_vm8, %v4750_v33, -inf }
0x11c5   :  { %4759 = vmax.xlane.f32.xlu0 %v4758_v42 }
0x11c6   :  { %v4463_v56 = vpop.f32.mrf.mxu1 }
0x11c7   :  { %v8690_v13 = vadd.f32 %v4463_v56, %v3936_v32  ;;  %v4489_v50 = vpop.f32.mrf.mxu2 }
0x11c8   :  { %v8693_v16 = vadd.f32 %v4489_v50, %v8571_v19 }
0x11ce   :  { %v4579_v8 = vpop.f32.mrf.mxu1 }
0x11cf   :  { %v4751_v58 = vmul.f32 0.35355338, %v4579_v8  ;;  %v4607_v7 = vpop.f32.mrf.mxu2 }
0x11d0   :  { %v4752_v31 = vmul.f32 0.35355338, %v4607_v7 }
0x11d1   :  { %v4761_v57 = vsel %vm805_vm8, %v4751_v58, -inf }
0x11d2   :  { %4762 = vmax.xlane.f32.xlu2 %v4761_v57  ;;  %v4764_v39 = vsel %vm805_vm8, %v4752_v31, -inf }
0x11dc   :  { %v4719_v47 = vpop.f32.mrf.mxu2 }
0x11dd   :  { %v4756_v32 = vmul.f32 0.35355338, %v4719_v47 }
0x11e2   :  { %4765 = vmax.xlane.f32.xlu1 %v4764_v39 }
0x1202   :  { %v4281_v0 = vpop.xlane.xlu1 %4280 }
0x1203   :  { %6780 = vrcp.f32 %v4281_v0 }
0x1209   :  { %v6781_v49 = vpop.eup %6780 }
0x120a   :  { %v4305_v41 = vmul.f32 %v6781_v49, %v6777_v43  ;;  %v4293_v4 = vpop.xlane.xlu1 %4292 }
0x120b   :  { %6782 = vrcp.f32 %v4293_v4 }
0x120c   :  { %6329 = vmatmul.msk.f32.vlgmr.msrb.gmra.mxu3 %vm805_vm8, %v4305_v41 }
0x120d   :  { %6340 = vmatpush.xpose.msk.msrb.mxu3 %vm805_vm8, %v4613_v21 }
0x1211   :  { %v6783_v19 = vpop.eup %6782 }
0x1212   :  { %v4309_v63 = vmul.f32 %v6783_v19, %v6779_v3 }
0x1214   :  { %6333 = vmatmul.msk.f32.vlgmr.msra.gmra.mxu3 %vm805_vm8, %v4309_v63 }
0x1215   :  { %6348 = vmatpush.xpose.msk.msra.mxu3 %vm805_vm8, %v4725_v25 }
0x121c   :  { %6341 = vmatmul.msk.f32.vlgmr.msrb.gmra.mxu3 %vm805_vm8, %v8663_v2 }
0x1220   :  { %v4663_v5 = vpop.f32.mrf.mxu0 }
0x1221   :  { %v4754_v45 = vmul.f32 0.35355338, %v4663_v5 }
0x1222   :  { %v4669_v59 = vpop.permute.xlu1 %4668 }
0x1223   :  { %6344 = vmatpush.xpose.msk.msrb.mxu1 %vm805_vm8, %v4669_v59  ;;  %v4770_v46 = vsel %vm805_vm8, %v4754_v45, -inf  ;;  %v9875_v59 = vld [vmem:[#allocation12_spill] sm:$0xff] }
0x1224   :  { %4771 = vmax.xlane.f32.xlu2 %v4770_v46 }
0x1226   :  { %6345 = vmatmul.msk.f32.vlgmr.msrb.gmra.mxu1 %vm805_vm8, %v4667_v37 }
0x122a   :  { %v4723_v17 = vpop.permute.xlu1 %4722 }
0x122b   :  { %6349 = vmatmul.msk.f32.vlgmr.msra.gmra.mxu3 %vm805_vm8, %v4723_v17 }
0x1238   :  { %v4760_v22 = vpop.xlane.xlu0 %4759 }
0x1239   :  { %v4782_v61 = vsub.f32 %v4750_v33, %v4760_v22 }
0x123b   :  { %v4790_v28 = vmul.f32 1.442695, %v4782_v61 }
0x123c   :  { %6502 = vrot.lane.b32.xlu2 %v9873_v11, %s6900_s29 }
0x123d   :  { %6784 = vpow2.f32 %v4790_v28 }
0x1243   :  { %v6785_v57 = vpop.eup %6784 }
0x1244   :  { %v4806_v0 = vsel %vm805_vm8, %v6785_v57, 0.0 }
0x1245   :  { %v4763_v21 = vpop.xlane.xlu2 %4762 }
0x1246   :  { %v4783_v14 = vsub.f32 %v4751_v58, %v4763_v21  ;;  %v4776_v58 = vsel %vm805_vm8, %v4756_v32, -inf }
0x1248   :  { %v4792_v33 = vmul.f32 1.442695, %v4783_v14 }
0x124a   :  { %6786 = vpow2.f32 %v4792_v33 }
0x1250   :  { %v6787_v49 = vpop.eup %6786 }
0x1251   :  { %v4809_v4 = vsel %vm805_vm8, %v6787_v49, 0.0 }
0x1255   :  { %v4766_v38 = vpop.xlane.xlu1 %4765 }
0x1256   :  { %v4784_v42 = vsub.f32 %v4752_v31, %v4766_v38 }
0x1258   :  { %v4794_v50 = vmul.f32 1.442695, %v4784_v42 }
0x125a   :  { %6788 = vpow2.f32 %v4794_v50  ;;  %v9876_v50 = vld [vmem:[#allocation32_spill] sm:$0xff] }
0x1260   :  { %v8724_v19 = vpop.eup %6788 }
0x1261   :  { %v4812_v63 = vsel %vm805_vm8, %v8724_v19, 0.0 }
0x128f   :  { %v4411_v26 = vpop.f32.mrf.mxu3 }
0x1290   :  { %v8710_v2 = vadd.f32 %v4411_v26, %v8627_v9 }
0x1297   :  { %v4515_v29 = vpop.f32.mrf.mxu3  ;;  %v4772_v20 = vpop.xlane.xlu2 %4771 }
0x1298   :  { %v8713_v23 = vadd.f32 %v4515_v29, %v8632_v6  ;;  %v4786_v8 = vsub.f32 %v4754_v45, %v4772_v20  ;;  %v9874_v45 = vld [vmem:[#allocation15_spill] sm:$0xff] }
0x129a   :  { %v4798_v7 = vmul.f32 1.442695, %v4786_v8  ;;  %v9877_v8 = vld [vmem:[#allocation17_spill] sm:$0xff] }
0x129c   :  { %6790 = vpow2.f32 %v4798_v7 }
0x129f   :  { %v4635_v43 = vpop.f32.mrf.mxu3  ;;  %v6503_v15 = vpop.permute.xlu2 %6502 }
0x12a0   :  { %v8715_v48 = vmul.f32 0.35355338, %v4635_v43  ;;  %v6505_v55 = vunpack.i.h.bf16 %v6503_v15  ;;  %v6504_v3 = vunpack.i.l.bf16 %v6503_v15 }
0x12a2   :  { %4867 = vmatpush.msrb.mxu0 %v6504_v3  ;;  %4893 = vmatpush.msra.mxu1 %v6505_v55  ;;  %v4767_v9 = vsel %vm805_vm8, %v8715_v48, -inf  ;;  %v6791_v25 = vpop.eup %6790 }
0x12a3   :  { %4768 = vmax.xlane.f32.xlu0 %v4767_v9  ;;  %v4691_v6 = vpop.f32.mrf.mxu1  ;;  %v4818_v5 = vsel %vm805_vm8, %v6791_v25, 0.0 }
0x12a4   :  { %v4755_v24 = vmul.f32 0.35355338, %v4691_v6 }
0x12a6   :  { %v4773_v56 = vsel %vm805_vm8, %v4755_v24, -inf }
0x12a7   :  { %4774 = vmax.xlane.f32.xlu1 %v4773_v56 }
0x12ab   :  { %4777 = vmax.xlane.f32.xlu0 %v4776_v58  ;;  %v1838_v58 = vsub.f32 %v9877_v8, %v9876_v50 }
0x12ae   :  { %v4747_v39 = vpop.f32.mrf.mxu3 }
0x12af   :  { %v4757_v41 = vmul.f32 0.35355338, %v4747_v39  ;;  %4807 = vadd.xlane.f32.xlu1 %v4806_v0  ;;  %v9878_v39 = vld [vmem:[#allocation4_spill] sm:$0xff] }
0x12b0   :  { %v2382_v0 = vsub.f32 %v1838_v58, %v9878_v39 }
0x12b1   :  { %v4779_v31 = vsel %vm805_vm8, %v4757_v41, -inf }
0x12b2   :  { %4780 = vmax.xlane.f32.xlu2 %v4779_v31 }
0x12b3   :  { %4810 = vadd.xlane.f32.xlu0 %v4809_v4 }
0x12b7   :  { %4813 = vadd.xlane.f32.xlu1 %v4812_v63 }
0x12bb   :  { %4819 = vadd.xlane.f32.xlu0 %v4818_v5  ;;  %v9879_v5 = vld [vmem:[#allocation34_spill] sm:$0xff] }
0x12ca   :  { %6512 = vrot.lane.b32.xlu2 %v9874_v45, %s6900_s29  ;;  %v9880_v45 = vld [vmem:[#allocation18_spill] sm:$0xff] }
0x12d0   :  { %6507 = vrot.lane.b32.xlu1 %v9875_v59, %s6900_s29  ;;  %v1839_v59 = vsub.f32 %v9880_v45, %v9879_v5 }
0x12d8   :  { %5002 = vrot.lane.b32.xlu1 %v9867_v40, %s6900_s29 }
0x1316   :  { %v4769_v46 = vpop.xlane.xlu0 %4768 }
0x1317   :  { %v4785_v61 = vsub.f32 %v8715_v48, %v4769_v46 }
0x1319   :  { %v4796_v28 = vmul.f32 1.442695, %v4785_v61  ;;  %v5070_v61 = vsel %vm805_vm8, %v8273_v60, 0.0 }
0x131a   :  { %v4775_v37 = vpop.xlane.xlu1 %4774 }
0x131b   :  { %v4787_v17 = vsub.f32 %v4755_v24, %v4775_v37  ;;  %v9881_v37 = vld [vmem:[#allocation37_spill] sm:$0xff] }
0x131d   :  { %v4800_v11 = vmul.f32 1.442695, %v4787_v17  ;;  %v2383_v17 = vsub.f32 %v1839_v59, %v9881_v37 }
0x131e   :  { %v4778_v21 = vpop.xlane.xlu0 %4777 }
0x131f   :  { %6792 = vpow2.f32 %v4800_v11  ;;  %v4788_v26 = vsub.f32 %v4756_v32, %v4778_v21 }
0x1321   :  { %v4802_v29 = vmul.f32 1.442695, %v4788_v26 }
0x1322   :  { %v4808_v20 = vpop.xlane.xlu1 %4807 }
0x1323   :  { %6794 = vrcp.f32 %v4808_v20 }
0x1324   :  { %6796 = vpow2.f32 %v4802_v29 }
0x1325   :  { %v8735_v22 = vpop.eup %6792  ;;  %v4781_v43 = vpop.xlane.xlu2 %4780 }
0x1326   :  { %v4789_v15 = vsub.f32 %v4757_v41, %v4781_v43  ;;  %v4811_v55 = vpop.xlane.xlu0 %4810  ;;  %v4821_v40 = vsel %vm805_vm8, %v8735_v22, 0.0  ;;  %v8751_v41 = vsub.f32 %v2382_v0, %v8298_v1  ;;  %v8761_v1 = vsub.f32 %v2383_v17, %v8304_v34 }
0x1327   :  { %6798 = vrcp.f32 %v4811_v55  ;;  %4822 = vadd.xlane.f32.xlu0 %v4821_v40 }
0x1328   :  { %v4804_v3 = vmul.f32 1.442695, %v4789_v15  ;;  %v5064_v46 = vsel %vm805_vm8, %v8751_v41, 0.0  ;;  %v5067_v11 = vsel %vm805_vm8, %v8761_v1, 0.0 }
0x1329   :  { %v6795_v14 = vpop.eup %6794 }
0x132a   :  { %6800 = vpow2.f32 %v4804_v3  ;;  %v6797_v38 = vpop.eup %6796  ;;  %v4838_v9 = vmul.f32 %v6795_v14, %v6785_v57  ;;  %v4814_v63 = vpop.xlane.xlu1 %4813  ;;  %v3832_v3 = vadd.f32 %v8582_v51, %v8576_v36 }
0x132b   :  { %6802 = vpow2.f32 %v4796_v28  ;;  %v4824_v32 = vsel %vm805_vm8, %v6797_v38, 0.0 }
0x132c   :  { %6350 = vmatmul.msk.f32.vlgmr.msrb.gmra.mxu0 %vm805_vm8, %v4838_v9 }
0x132d   :  { %v6799_v47 = vpop.eup %6798  ;;  %v6513_v48 = vpop.permute.xlu2 %6512 }
0x132e   :  { %v4839_v6 = vmul.f32 %v6799_v47, %v6787_v49  ;;  %v6515_v24 = vunpack.i.h.bf16 %v6513_v48  ;;  %v6514_v33 = vunpack.i.l.bf16 %v6513_v48  ;;  %v4820_v42 = vpop.xlane.xlu0 %4819 }
0x132f   :  { %6804 = vrcp.f32 %v4820_v42  ;;  %4825 = vadd.xlane.f32.xlu0 %v4824_v32 }
0x1330   :  { %v8742_v56 = vpop.eup %6800  ;;  %6351 = vmatmul.msk.f32.vlgmr.msra.gmra.mxu1 %vm805_vm8, %v4839_v6  ;;  %4971 = vmatpush.msra.mxu0 %v6514_v33  ;;  %6806 = vrcp.f32 %v4814_v63 }
0x1331   :  { %4997 = vmatpush.msrb.mxu1 %v6515_v24  ;;  %v4827_v57 = vsel %vm805_vm8, %v8742_v56, 0.0  ;;  %v6803_v7 = vpop.eup %6802 }
0x1332   :  { %4828 = vadd.xlane.f32.xlu2 %v4827_v57  ;;  %v4815_v4 = vsel %vm805_vm8, %v6803_v7, 0.0 }
0x1335   :  { %v6805_v49 = vpop.eup %6804 }
0x1336   :  { %v4842_v31 = vmul.f32 %v6805_v49, %v6791_v25  ;;  %v6807_v25 = vpop.eup %6806 }
0x1337   :  { %4816 = vadd.xlane.f32.xlu0 %v4815_v4  ;;  %v4840_v20 = vmul.f32 %v6807_v25, %v8724_v19 }
0x1338   :  { %6354 = vmatmul.msk.f32.vlgmr.msra.gmra.mxu0 %vm805_vm8, %v4842_v31 }
0x133a   :  { %5065 = vadd.xlane.f32.xlu2 %v5064_v46 }
0x1342   :  { %v6508_v21 = vpop.permute.xlu1 %6507  ;;  %5068 = vadd.xlane.f32.xlu2 %v5067_v11 }
0x1343   :  { %v6510_v26 = vunpack.i.h.bf16 %v6508_v21  ;;  %v6509_v29 = vunpack.i.l.bf16 %v6508_v21 }
0x1345   :  { %4919 = vmatpush.msra.mxu2 %v6509_v29  ;;  %4945 = vmatpush.msrb.mxu3 %v6510_v26 }
0x1346   :  { %6352 = vmatmul.msk.f32.vlgmr.msra.gmra.mxu2 %vm805_vm8, %v4840_v20 }
0x134a   :  { %v5003_v43 = vpop.permute.xlu1 %5002  ;;  %5071 = vadd.xlane.f32.xlu2 %v5070_v61 }
0x134b   :  { %5023 = vmatpush.msrb.mxu2 %v5003_v43  ;;  %5028 = vrot.lane.b32.xlu0 %v9864_v62, %s6900_s29  ;;  %v4519_v62 = vadd.f32 %v8685_v35, %v3832_v3  ;;  %v9882_v43 = vld [vmem:[#allocation33_spill] sm:$0xff] }
0x139a   :  { %v4823_v34 = vpop.xlane.xlu0 %4822 }
0x139b   :  { %6808 = vrcp.f32 %v4823_v34  ;;  %v9883_v34 = vld [vmem:[#allocation21_spill] sm:$0xff] }
0x13a1   :  { %v6809_v15 = vpop.eup %6808 }
0x13a2   :  { %v4843_v55 = vmul.f32 %v6809_v15, %v8735_v22  ;;  %v4826_v40 = vpop.xlane.xlu0 %4825  ;;  %v1842_v15 = vsub.f32 %v9883_v34, %v9882_v43 }
0x13a3   :  { %6810 = vrcp.f32 %v4826_v40 }
0x13a4   :  { %6355 = vmatmul.msk.f32.vlgmr.msrb.gmra.mxu1 %vm805_vm8, %v4843_v55 }
0x13a5   :  { %v4829_v42 = vpop.xlane.xlu2 %4828 }
0x13a9   :  { %v6811_v19 = vpop.eup %6810  ;;  %v4869_v14 = vpop.f32.mrf.mxu0 }
0x13aa   :  { %v4844_v28 = vmul.f32 %v6811_v19, %v6797_v38  ;;  %v4817_v9 = vpop.xlane.xlu0 %4816  ;;  %v5054_v47 = vsub.f32 %v8669_v10, %v4869_v14  ;;  %v9884_v19 = vld [vmem:[#allocation5_spill] sm:$0xff] }
0x13ab   :  { %6812 = vrcp.f32 %v4817_v9  ;;  %v2386_v3 = vsub.f32 %v1842_v15, %v9884_v19 }
0x13ac   :  { %6356 = vmatmul.msk.f32.vlgmr.msrb.gmra.mxu2 %vm805_vm8, %v4844_v28  ;;  %v5265_v22 = vsel %vm805_vm8, %v5054_v47, 0.0  ;;  %6814 = vrcp.f32 %v4829_v42 }
0x13ad   :  { %v4895_v48 = vpop.f32.mrf.mxu1  ;;  %5266 = vadd.xlane.f32.xlu1 %v5265_v22  ;;  %v8815_v28 = vsub.f32 %v2386_v3, %v8301_v27 }
0x13ae   :  { %v5055_v6 = vsub.f32 %v4519_v62, %v4895_v48  ;;  %v9885_v62 = vld [vmem:[#allocation36_spill] sm:$0xff] }
0x13af   :  { %v9886_v48 = vld [vmem:[#allocation20_spill] sm:$0xff] }
0x13b0   :  { %v5268_v24 = vsel %vm805_vm8, %v5055_v6, 0.0  ;;  %v1841_v22 = vsub.f32 %v9886_v48, %v9885_v62 }
0x13b1   :  { %v6813_v33 = vpop.eup %6812  ;;  %5269 = vadd.xlane.f32.xlu0 %v5268_v24 }
0x13b2   :  { %v4841_v36 = vmul.f32 %v6813_v33, %v6803_v7  ;;  %v6815_v38 = vpop.eup %6814  ;;  %v6901_v7 = vmov 8.0   ;;  %v5076_v33 = vsel %vm805_vm8, %v8815_v28, 0.0  ;;  %v2385_v27 = vsub.f32 %v1841_v22, %v8178_v30 }
0x13b3   :  { %v4845_v32 = vmul.f32 %v6815_v38, %v8742_v56  ;;  %6816 = vrcp.f32 %v6901_v7 }
0x13b4   :  { %6353 = vmatmul.msk.f32.vlgmr.msrb.gmra.mxu3 %vm805_vm8, %v4841_v36  ;;  %v8831_v42 = vsub.f32 %v2385_v27, %v8363_v44 }
0x13b5   :  { %v4973_v51 = vpop.f32.mrf.mxu0 }
0x13b6   :  { %v5058_v10 = vsub.f32 %v8683_v12, %v4973_v51  ;;  %v5073_v38 = vsel %vm805_vm8, %v8831_v42, 0.0 }
0x13b8   :  { %v5277_v35 = vsel %vm805_vm8, %v5058_v10, 0.0 }
0x13b9   :  { %5278 = vadd.xlane.f32.xlu1 %v5277_v35  ;;  %v6817_v39 = vpop.eup %6816 }
0x13ba   :  { %v5089_v12 = vmul.f32 8.0, %v6817_v39  ;;  %vm5093_vm5 = vweird.f32 %v6817_v39 }
0x13bc   :  { %v5090_v0 = vsub.f32 1.0, %v5089_v12  ;;  %v9889_v12 = vld [vmem:[#allocation38_spill] sm:$0xff] }
0x13bd   :  { %v5029_v50 = vpop.permute.xlu0 %5028 }
0x13be   :  { %5049 = vmatpush.msra.mxu3 %v5029_v50  ;;  %v5091_v49 = vmul.f32 %v6817_v39, %v5090_v0 }
0x13bf   :  { %6357 = vmatmul.msk.f32.vlgmr.msra.gmra.mxu3 %vm805_vm8, %v4845_v32 }
0x13c0   :  { %v5092_v31 = vadd.f32 %v6817_v39, %v5091_v49 }
0x13c2   :  { %v8787_v4 = vsel %vm5093_vm5, %v6817_v39, %v5092_v31 }
0x13c9   :  { %v4921_v8 = vpop.f32.mrf.mxu2 }
0x13ca   :  { %v5056_v58 = vsub.f32 %v8672_v53, %v4921_v8  ;;  %v5066_v53 = vpop.xlane.xlu2 %5065 }
0x13cc   :  { %v5271_v57 = vsel %vm805_vm8, %v5056_v58, 0.0 }
0x13cd   :  { %5272 = vadd.xlane.f32.xlu2 %v5271_v57  ;;  %v9887_v57 = vld [vmem:[#allocation35_spill] sm:$0xff] }
0x13d2   :  { %v5069_v26 = vpop.xlane.xlu2 %5068 }
0x13d3   :  { %v5096_v50 = vmul.f32 %v8787_v4, %v5069_v26 }
0x13da   :  { %v5072_v9 = vpop.xlane.xlu2 %5071 }
0x1420   :  { %v5267_v56 = vpop.xlane.xlu1 %5266 }
0x1421   :  { %v4999_v63 = vpop.f32.mrf.mxu1  ;;  %v5289_v5 = vmul.f32 %v5267_v56, %v8787_v4  ;;  %v5097_v56 = vmul.f32 %v8787_v4, %v5072_v9 }
0x1422   :  { %v8791_v45 = vsub.f32 %v8690_v13, %v4999_v63 }
0x1423   :  { %v8793_v59 = vsub.f32 %v5054_v47, %v5289_v5 }
0x1424   :  { %v5270_v46 = vpop.xlane.xlu0 %5269  ;;  %v5280_v37 = vsel %vm805_vm8, %v8791_v45, 0.0 }
0x1425   :  { %v5290_v17 = vmul.f32 %v5270_v46, %v8787_v4  ;;  %5281 = vadd.xlane.f32.xlu1 %v5280_v37  ;;  %v5305_v25 = vmul.f32 %v8793_v59, %v8793_v59  ;;  %v5082_v46 = vsel %vm805_vm8, %v8282_v54, 0.0 }
0x1427   :  { %v8800_v11 = vsub.f32 %v5055_v6, %v5290_v17  ;;  %v5313_v21 = vsel %vm805_vm8, %v5305_v25, 0.0  ;;  %v5085_v17 = vsel %vm805_vm8, %v8370_v18, 0.0 }
0x1428   :  { %5314 = vadd.xlane.f32.xlu0 %v5313_v21 }
0x1429   :  { %v5306_v13 = vmul.f32 %v8800_v11, %v8800_v11 }
0x142b   :  { %v5316_v61 = vsel %vm805_vm8, %v5306_v13, 0.0 }
0x142c   :  { %v5279_v40 = vpop.xlane.xlu1 %5278 }
0x142d   :  { %v5293_v14 = vmul.f32 %v5279_v40, %v8787_v4 }
0x142f   :  { %v5025_v29 = vpop.f32.mrf.mxu2  ;;  %v8823_v6 = vsub.f32 %v5058_v10, %v5293_v14 }
0x1430   :  { %v8806_v20 = vsub.f32 %v8693_v16, %v5025_v29  ;;  %5317 = vadd.xlane.f32.xlu0 %v5316_v61 }
0x1431   :  { %v5309_v36 = vmul.f32 %v8823_v6, %v8823_v6 }
0x1432   :  { %v5283_v55 = vsel %vm805_vm8, %v8806_v20, 0.0 }
0x1433   :  { %5284 = vadd.xlane.f32.xlu1 %v5283_v55  ;;  %v5325_v32 = vsel %vm805_vm8, %v5309_v36, 0.0 }
0x1437   :  { %v4947_v16 = vpop.f32.mrf.mxu3 }
0x1438   :  { %v8819_v47 = vsub.f32 %v8710_v2, %v4947_v16  ;;  %v5095_v2 = vmul.f32 %v8787_v4, %v5066_v53  ;;  %v8867_v53 = vsub.f32 %v8273_v60, %v5097_v56 }
0x143a   :  { %v5274_v24 = vsel %vm805_vm8, %v8819_v47, 0.0  ;;  %v8838_v35 = vsub.f32 %v8751_v41, %v5095_v2  ;;  %v9888_v41 = vld [vmem:[#allocation22_spill] sm:$0xff] }
0x143b   :  { %5275 = vadd.xlane.f32.xlu2 %v5274_v24  ;;  %5077 = vadd.xlane.f32.xlu1 %v5076_v33  ;;  %v1843_v7 = vsub.f32 %v9888_v41, %v9887_v57 }
0x143c   :  { %v5111_v8 = vmul.f32 %v8838_v35, %v8838_v35 }
0x143d   :  { %v2387_v0 = vsub.f32 %v1843_v7, %v9889_v12 }
0x143e   :  { %v5119_v49 = vsel %vm805_vm8, %v5111_v8, 0.0 }
0x143f   :  { %v8859_v31 = vsub.f32 %v2387_v0, %v8311_v52  ;;  %v5113_v52 = vmul.f32 %v8867_v53, %v8867_v53 }
0x1440   :  { %v5273_v51 = vpop.xlane.xlu2 %5272 }
0x1441   :  { %v5291_v10 = vmul.f32 %v5273_v51, %v8787_v4  ;;  %v5079_v5 = vsel %vm805_vm8, %v8859_v31, 0.0  ;;  %v5125_v37 = vsel %vm805_vm8, %v5113_v52, 0.0 }
0x1442   :  { %v5051_v43 = vpop.f32.mrf.mxu3 }
0x1443   :  { %v8843_v30 = vsub.f32 %v5056_v58, %v5291_v10  ;;  %5074 = vadd.xlane.f32.xlu2 %v5073_v38  ;;  %5326 = vadd.xlane.f32.xlu1 %v5325_v32  ;;  %v8855_v58 = vsub.f32 %v8761_v1, %v5096_v50  ;;  %v8886_v15 = vsub.f32 %v8713_v23, %v5051_v43 }
0x1445   :  { %v5307_v44 = vmul.f32 %v8843_v30, %v8843_v30  ;;  %v5112_v63 = vmul.f32 %v8855_v58, %v8855_v58  ;;  %v5286_v3 = vsel %vm805_vm8, %v8886_v15, 0.0 }
0x1447   :  { %v5319_v39 = vsel %vm805_vm8, %v5307_v44, 0.0  ;;  %v5122_v1 = vsel %vm805_vm8, %v5112_v63, 0.0 }
0x1448   :  { %5320 = vadd.xlane.f32.xlu0 %v5319_v39 }
0x144b   :  { %5120 = vadd.xlane.f32.xlu2 %v5119_v49 }
0x1450   :  { %5080 = vadd.xlane.f32.xlu0 %v5079_v5 }
0x1453   :  { %5123 = vadd.xlane.f32.xlu2 %v5122_v1 }
0x1458   :  { %5083 = vadd.xlane.f32.xlu0 %v5082_v46  ;;  %v8924_v46 = vld [vmem:[%s9772_s8] ss:$0 sm:$0xff] }
0x145b   :  { %5126 = vadd.xlane.f32.xlu2 %v5125_v37 }
0x1460   :  { %5086 = vadd.xlane.f32.xlu0 %v5085_v17 }
0x1498   :  { %v5282_v25 = vpop.xlane.xlu1 %5281 }
0x1499   :  { %v5294_v60 = vmul.f32 %v5282_v25, %v8787_v4 }
0x149b   :  { %v8879_v21 = vsub.f32 %v8791_v45, %v5294_v60  ;;  %v5315_v13 = vpop.xlane.xlu0 %5314 }
0x149c   :  { %v5337_v26 = vmul.f32 %v5315_v13, %v8787_v4 }
0x149d   :  { %v5310_v29 = vmul.f32 %v8879_v21, %v8879_v21 }
0x149e   :  { %v5345_v34 = vadd.f32 1e-05, %v5337_v26 }
0x149f   :  { %v5328_v61 = vsel %vm805_vm8, %v5310_v29, 0.0 }
0x14a0   :  { %5329 = vadd.xlane.f32.xlu1 %v5328_v61  ;;  %6818 = vrsqrt.f32 %v5345_v34  ;;  %vm5359_vm12 = vweird.f32 %v5345_v34 }
0x14a3   :  { %v5318_v55 = vpop.xlane.xlu0 %5317 }
0x14a4   :  { %v5338_v40 = vmul.f32 %v5318_v55, %v8787_v4 }
0x14a6   :  { %v5285_v45 = vpop.xlane.xlu1 %5284  ;;  %v5346_v14 = vadd.f32 1e-05, %v5338_v40  ;;  %v6819_v9 = vpop.eup %6818 }
0x14a7   :  { %v5295_v19 = vmul.f32 %v5285_v45, %v8787_v4  ;;  %v5354_v62 = vmul.f32 %v6819_v9, %v5345_v34  ;;  %vm5360_vm11 = vweird.f32 %v6819_v9 }
0x14a8   :  { %5287 = vadd.xlane.f32.xlu1 %v5286_v3  ;;  %6820 = vrsqrt.f32 %v5346_v14  ;;  %vm5361_vm13 = vmor %vm5359_vm12, %vm5360_vm11  ;;  %vm5369_vm15 = vweird.f32 %v5346_v14  ;;  %vm5503_vm12 = vcmask 130048  }
0x14a9   :  { %v8893_v16 = vsub.f32 %v8806_v20, %v5295_v19  ;;  %v5355_v2 = vmul.f32 %v6819_v9, %v5354_v62 }
0x14ab   :  { %v5311_v23 = vmul.f32 %v8893_v16, %v8893_v16  ;;  %v5356_v32 = vmul.f32 0.5, %v5355_v2 }
0x14ad   :  { %v5331_v27 = vsel %vm805_vm8, %v5311_v23, 0.0 }
0x14ae   :  { %v5276_v48 = vpop.xlane.xlu2 %5275  ;;  %v5078_v22 = vpop.xlane.xlu1 %5077 }
0x14af   :  { %v5292_v24 = vmul.f32 %v5276_v48, %v8787_v4  ;;  %v5099_v33 = vmul.f32 %v8787_v4, %v5078_v22  ;;  %v6821_v51 = vpop.eup %6820 }
0x14b0   :  { %5332 = vadd.xlane.f32.xlu1 %v5331_v27  ;;  %v5364_v8 = vmul.f32 %v6821_v51, %v5346_v14  ;;  %vm5370_vm14 = vweird.f32 %v6821_v51 }
0x14b1   :  { %v8901_v36 = vsub.f32 %v8819_v47, %v5292_v24  ;;  %v8904_v20 = vsub.f32 %v8815_v28, %v5099_v33  ;;  %v5357_v28 = vsub.f32 1.5, %v5356_v32  ;;  %vm5371_vm1 = vmor %vm5369_vm15, %vm5370_vm14  ;;  %v5498_v33 = vld [vmem:[%s9773_s10 + $0x8] sm:$0xff] }
0x14b2   :  { %v5365_v7 = vmul.f32 %v6821_v51, %v5364_v8  ;;  %5542 = vmatpush.msrb.mxu0 %v5498_v33 }
0x14b3   :  { %v5308_v10 = vmul.f32 %v8901_v36, %v8901_v36  ;;  %v5115_v38 = vmul.f32 %v8904_v20, %v8904_v20  ;;  %v5358_v0 = vmul.f32 %v6819_v9, %v5357_v28 }
0x14b4   :  { %v5366_v56 = vmul.f32 0.5, %v5365_v7 }
0x14b5   :  { %v5322_v44 = vsel %vm805_vm8, %v5308_v10, 0.0  ;;  %v5131_v50 = vsel %vm805_vm8, %v5115_v38, 0.0  ;;  %v5362_v63 = vsel %vm5361_vm13, %v6819_v9, %v5358_v0 }
0x14b6   :  { %5323 = vadd.xlane.f32.xlu2 %v5322_v44  ;;  %v5075_v57 = vpop.xlane.xlu2 %5074  ;;  %5132 = vadd.xlane.f32.xlu0 %v5131_v50  ;;  %v5367_v5 = vsub.f32 1.5, %v5366_v56  ;;  %v5433_v52 = vmul.f32 %v5362_v63, %v8793_v59  ;;  %v8934_v59 = vld [vmem:[%s9772_s8 + $0x1] ss:$0 sm:$0xff]  ;;  %v5327_v23 = vpop.xlane.xlu1 %5326 }
0x14b7   :  { %v5098_v47 = vmul.f32 %v8787_v4, %v5075_v57  ;;  %v5341_v48 = vmul.f32 %v5327_v23, %v8787_v4 }
0x14b8   :  { %v5368_v37 = vmul.f32 %v6821_v51, %v5367_v5  ;;  %v5441_v60 = vmul.f32 %v8924_v46, %v5433_v52 }
0x14b9   :  { %v8914_v41 = vsub.f32 %v8831_v42, %v5098_v47  ;;  %v8954_v22 = vadd.f32 1e-05, %v5341_v48 }
0x14ba   :  { %v5372_v13 = vsel %vm5371_vm1, %v6821_v51, %v5368_v37  ;;  %v5449_v29 = vadd.f32 %v8934_v59, %v5441_v60  ;;  %v5497_v51 = vld [vmem:[%s9773_s10] sm:$0xff] }
0x14bb   :  { %v5321_v39 = vpop.xlane.xlu0 %5320  ;;  %v5114_v12 = vmul.f32 %v8914_v41, %v8914_v41  ;;  %5543 = vmatpush.msrb.mxu0 %v5497_v51  ;;  %vm5399_vm5 = vweird.f32 %v8954_v22 }
0x14bc   :  { %v5339_v9 = vmul.f32 %v5321_v39, %v8787_v4 }
0x14bd   :  { %v5128_v49 = vsel %vm805_vm8, %v5114_v12, 0.0 }
0x14be   :  { %5129 = vadd.xlane.f32.xlu1 %v5128_v49  ;;  %v5121_v19 = vpop.xlane.xlu2 %5120  ;;  %v5347_v62 = vadd.f32 1e-05, %v5339_v9 }
0x14bf   :  { %v5143_v3 = vmul.f32 %v5121_v19, %v8787_v4 }
0x14c0   :  { %vm5379_vm7 = vweird.f32 %v5347_v62 }
0x14c1   :  { %v5151_v14 = vadd.f32 1e-05, %v5143_v3 }
0x14c3   :  { %v5081_v1 = vpop.xlane.xlu0 %5080  ;;  %6822 = vrsqrt.f32 %v5151_v14  ;;  %vm5165_vm3 = vweird.f32 %v5151_v14 }
0x14c4   :  { %v5100_v42 = vmul.f32 %v8787_v4, %v5081_v1  ;;  %6824 = vrsqrt.f32 %v5347_v62 }
0x14c5   :  { %6826 = vrsqrt.f32 %v8954_v22 }
0x14c6   :  { %v8927_v17 = vsub.f32 %v8859_v31, %v5100_v42  ;;  %v5434_v31 = vmul.f32 %v5372_v13, %v8800_v11  ;;  %v5124_v38 = vpop.xlane.xlu2 %5123 }
0x14c7   :  { %v5144_v50 = vmul.f32 %v5124_v38, %v8787_v4 }
0x14c8   :  { %v5116_v25 = vmul.f32 %v8927_v17, %v8927_v17  ;;  %v5442_v61 = vmul.f32 %v8924_v46, %v5434_v31 }
0x14c9   :  { %v8969_v39 = vadd.f32 1e-05, %v5144_v50 }
0x14ca   :  { %v5134_v26 = vsel %vm805_vm8, %v5116_v25, 0.0  ;;  %v5450_v43 = vadd.f32 %v8934_v59, %v5442_v61 }
0x14cb   :  { %5135 = vadd.xlane.f32.xlu0 %v5134_v26  ;;  %v5084_v34 = vpop.xlane.xlu0 %5083 }
0x14cc   :  { %v5101_v55 = vmul.f32 %v8787_v4, %v5084_v34 }
0x14ce   :  { %5465 = vrot.lane.b32.xlu2 %v5449_v29, %s6902_s15  ;;  %v8946_v40 = vsub.f32 %v8282_v54, %v5101_v55  ;;  %v6823_v54 = vpop.eup %6822  ;;  %v8982_v42 = vpop.xlane.xlu2 %5126 }
0x14cf   :  { %v5160_v24 = vmul.f32 %v6823_v54, %v5151_v14  ;;  %v6825_v27 = vpop.eup %6824  ;;  %vm5166_vm2 = vweird.f32 %v6823_v54 }
0x14d0   :  { %v5117_v45 = vmul.f32 %v8946_v40, %v8946_v40  ;;  %v5374_v44 = vmul.f32 %v6825_v27, %v5347_v62  ;;  %v8967_v47 = vpop.eup %6826  ;;  %vm5167_vm4 = vmor %vm5165_vm3, %vm5166_vm2  ;;  %vm5380_vm6 = vweird.f32 %v6825_v27  ;;  %vm5175_vm2 = vweird.f32 %v8969_v39 }
0x14d1   :  { %v5161_v10 = vmul.f32 %v6823_v54, %v5160_v24  ;;  %v5394_v0 = vmul.f32 %v8967_v47, %v8954_v22  ;;  %vm5381_vm9 = vmor %vm5379_vm7, %vm5380_vm6  ;;  %vm5400_vm10 = vweird.f32 %v8967_v47 }
0x14d2   :  { %v5137_v11 = vsel %vm805_vm8, %v5117_v45, 0.0  ;;  %v5375_v28 = vmul.f32 %v6825_v27, %v5374_v44  ;;  %vm5401_vm11 = vmor %vm5399_vm5, %vm5400_vm10 }
0x14d3   :  { %v5162_v8 = vmul.f32 0.5, %v5161_v10  ;;  %v5395_v1 = vmul.f32 %v8967_v47, %v5394_v0 }
0x14d4   :  { %v5376_v56 = vmul.f32 0.5, %v5375_v28 }
0x14d5   :  { %v5163_v49 = vsub.f32 1.5, %v5162_v8  ;;  %v5396_v26 = vmul.f32 0.5, %v5395_v1 }
0x14d6   :  { %v5377_v37 = vsub.f32 1.5, %v5376_v56 }
0x14d7   :  { %5467 = vrot.lane.b32.xlu1 %v5450_v43, %s6902_s15  ;;  %v5164_v52 = vmul.f32 %v6823_v54, %v5163_v49  ;;  %v5397_v45 = vsub.f32 1.5, %v5396_v26 }
0x14d8   :  { %v5378_v61 = vmul.f32 %v6825_v27, %v5377_v37 }
0x14d9   :  { %v5168_v29 = vsel %vm5167_vm4, %v6823_v54, %v5164_v52  ;;  %v5398_v62 = vmul.f32 %v8967_v47, %v5397_v45 }
0x14da   :  { %v5239_v55 = vmul.f32 %v5168_v29, %v8838_v35  ;;  %v5382_v3 = vsel %vm5381_vm9, %v6825_v27, %v5378_v61 }
0x14db   :  { %v5435_v35 = vmul.f32 %v5382_v3, %v8843_v30  ;;  %v5402_v51 = vsel %vm5401_vm11, %v8967_v47, %v5398_v62 }
0x14dc   :  { %v5248_v48 = vmul.f32 %v8924_v46, %v5239_v55  ;;  %v5437_v22 = vmul.f32 %v5402_v51, %v8823_v6 }
0x14de   :  { %v5445_v56 = vmul.f32 %v8924_v46, %v5437_v22 }
0x14f7   :  { %5138 = vadd.xlane.f32.xlu2 %v5137_v11 }
0x1513   :  { %v5330_v2 = vpop.xlane.xlu1 %5329 }
0x1514   :  { %v5342_v32 = vmul.f32 %v5330_v2, %v8787_v4  ;;  %v5257_v2 = vadd.f32 %v8934_v59, %v5248_v48 }
0x1516   :  { %v8965_v57 = vadd.f32 1e-05, %v5342_v32  ;;  %v5443_v32 = vmul.f32 %v8924_v46, %v5435_v35  ;;  %v5145_v35 = vmul.f32 %v8982_v42, %v8787_v4 }
0x1518   :  { %6828 = vrsqrt.f32 %v8965_v57  ;;  %vm5409_vm14 = vweird.f32 %v8965_v57 }
0x1519   :  { %6830 = vrsqrt.f32 %v8969_v39 }
0x151b   :  { %v5288_v7 = vpop.xlane.xlu1 %5287 }
0x151c   :  { %v5296_v12 = vmul.f32 %v5288_v7, %v8787_v4 }
0x151e   :  { %v8976_v63 = vsub.f32 %v8886_v15, %v5296_v12  ;;  %v8985_v60 = vpop.eup %6828  ;;  %v5451_v12 = vadd.f32 %v8934_v59, %v5443_v32 }
0x151f   :  { %v8988_v31 = vpop.eup %6830  ;;  %v5404_v43 = vmul.f32 %v8985_v60, %v8965_v57  ;;  %vm5410_vm13 = vweird.f32 %v8985_v60 }
0x1520   :  { %v5312_v5 = vmul.f32 %v8976_v63, %v8976_v63  ;;  %v5170_v11 = vmul.f32 %v8988_v31, %v8969_v39  ;;  %vm5176_vm15 = vweird.f32 %v8988_v31  ;;  %vm5411_vm1 = vmor %vm5409_vm14, %vm5410_vm13 }
0x1521   :  { %v5405_v14 = vmul.f32 %v8985_v60, %v5404_v43  ;;  %vm5177_vm4 = vmor %vm5175_vm2, %vm5176_vm15 }
0x1522   :  { %v5334_v25 = vsel %vm805_vm8, %v5312_v5, 0.0  ;;  %v5171_v54 = vmul.f32 %v8988_v31, %v5170_v11 }
0x1523   :  { %v5333_v13 = vpop.xlane.xlu1 %5332  ;;  %5335 = vadd.xlane.f32.xlu0 %v5334_v25  ;;  %v5406_v33 = vmul.f32 0.5, %v5405_v14  ;;  %v5453_v25 = vadd.f32 %v8934_v59, %v5445_v56 }
0x1524   :  { %v5343_v15 = vmul.f32 %v5333_v13, %v8787_v4  ;;  %v5172_v10 = vmul.f32 0.5, %v5171_v54  ;;  %v5153_v54 = vadd.f32 1e-05, %v5145_v35 }
0x1525   :  { %v5407_v30 = vsub.f32 1.5, %v5406_v33 }
0x1526   :  { %v8992_v34 = vadd.f32 1e-05, %v5343_v15  ;;  %v5173_v28 = vsub.f32 1.5, %v5172_v10  ;;  %vm5185_vm13 = vweird.f32 %v5153_v54 }
0x1527   :  { %v5408_v0 = vmul.f32 %v8985_v60, %v5407_v30 }
0x1528   :  { %6832 = vrsqrt.f32 %v8992_v34  ;;  %v5174_v5 = vmul.f32 %v8988_v31, %v5173_v28  ;;  %vm5419_vm10 = vweird.f32 %v8992_v34 }
0x1529   :  { %v5324_v19 = vpop.xlane.xlu2 %5323  ;;  %v5412_v1 = vsel %vm5411_vm1, %v8985_v60, %v5408_v0 }
0x152a   :  { %v5340_v9 = vmul.f32 %v5324_v19, %v8787_v4  ;;  %v5178_v57 = vsel %vm5177_vm4, %v8988_v31, %v5174_v5  ;;  %v5438_v13 = vmul.f32 %v5412_v1, %v8879_v21 }
0x152b   :  { %v5240_v60 = vmul.f32 %v5178_v57, %v8855_v58 }
0x152c   :  { %v5348_v23 = vadd.f32 1e-05, %v5340_v9  ;;  %v5446_v31 = vmul.f32 %v8924_v46, %v5438_v13 }
0x152d   :  { %v5249_v45 = vmul.f32 %v8924_v46, %v5240_v60 }
0x152e   :  { %v6833_v24 = vpop.eup %6832  ;;  %6834 = vrsqrt.f32 %v5348_v23  ;;  %vm5389_vm6 = vweird.f32 %v5348_v23  ;;  %v5454_v19 = vadd.f32 %v8934_v59, %v5446_v31 }
0x152f   :  { %v5414_v27 = vmul.f32 %v6833_v24, %v8992_v34  ;;  %vm5420_vm7 = vweird.f32 %v6833_v24  ;;  %v5258_v58 = vadd.f32 %v8934_v59, %v5249_v45  ;;  %6836 = vrsqrt.f32 %v5153_v54 }
0x1530   :  { %vm5421_vm5 = vmor %vm5419_vm10, %vm5420_vm7 }
0x1531   :  { %v5466_v38 = vpop.permute.xlu2 %5465  ;;  %v5415_v44 = vmul.f32 %v6833_v24, %v5414_v27  ;;  %v5130_v61 = vpop.xlane.xlu1 %5129 }
0x1532   :  { %v5489_v50 = vsel %vm805_vm8, %v5257_v2, %v5466_v38  ;;  %v5146_v27 = vmul.f32 %v5130_v61, %v8787_v4 }
0x1533   :  { %6358 = vmatmul.msk.f32.vlgmr.msrb.gmra.mxu0 %vm5503_vm12, %v5489_v50  ;;  %v5416_v47 = vmul.f32 0.5, %v5415_v44 }
0x1534   :  { %v6835_v8 = vpop.eup %6834  ;;  %v5154_v51 = vadd.f32 1e-05, %v5146_v27 }
0x1535   :  { %v5384_v7 = vmul.f32 %v6835_v8, %v5348_v23  ;;  %v5417_v52 = vsub.f32 1.5, %v5416_v47  ;;  %vm5390_vm3 = vweird.f32 %v6835_v8 }
0x1536   :  { %vm5391_vm9 = vmor %vm5389_vm6, %vm5390_vm3  ;;  %6838 = vrsqrt.f32 %v5154_v51  ;;  %vm5195_vm2 = vweird.f32 %v5154_v51 }
0x1537   :  { %v5385_v49 = vmul.f32 %v6835_v8, %v5384_v7  ;;  %5469 = vrot.lane.b32.xlu0 %v5451_v12, %s6902_s15  ;;  %v5418_v26 = vmul.f32 %v6833_v24, %v5417_v52 }
0x1539   :  { %v5386_v6 = vmul.f32 0.5, %v5385_v49  ;;  %v5422_v43 = vsel %vm5421_vm5, %v6833_v24, %v5418_v26  ;;  %v6837_v24 = vpop.eup %6836 }
0x153a   :  { %v5439_v11 = vmul.f32 %v5422_v43, %v8893_v16  ;;  %v5087_v16 = vpop.xlane.xlu0 %5086  ;;  %v5180_v2 = vmul.f32 %v6837_v24, %v5153_v54  ;;  %vm5186_vm11 = vweird.f32 %v6837_v24 }
0x153b   :  { %v5387_v37 = vsub.f32 1.5, %v5386_v6  ;;  %v5102_v9 = vmul.f32 %v8787_v4, %v5087_v16  ;;  %vm5187_vm14 = vmor %vm5185_vm13, %vm5186_vm11 }
0x153c   :  { %v5447_v34 = vmul.f32 %v8924_v46, %v5439_v11  ;;  %v5181_v10 = vmul.f32 %v6837_v24, %v5180_v2  ;;  %v6839_v50 = vpop.eup %6838 }
0x153d   :  { %v5388_v15 = vmul.f32 %v6835_v8, %v5387_v37  ;;  %v9046_v23 = vsub.f32 %v8370_v18, %v5102_v9  ;;  %v5190_v7 = vmul.f32 %v6839_v50, %v5154_v51  ;;  %vm5196_vm15 = vweird.f32 %v6839_v50  ;;  %v9078_v9 = vld [vmem:[%s9774_s11] ss:$0 sm:$0xff] }
0x153e   :  { %v5455_v14 = vadd.f32 %v8934_v59, %v5447_v34  ;;  %v5182_v32 = vmul.f32 0.5, %v5181_v10  ;;  %vm5197_vm3 = vmor %vm5195_vm2, %vm5196_vm15 }
0x153f   :  { %v5392_v29 = vsel %vm5391_vm9, %v6835_v8, %v5388_v15  ;;  %5473 = vrot.lane.b32.xlu0 %v5453_v25, %s6902_s15  ;;  %v5118_v48 = vmul.f32 %v9046_v23, %v9046_v23  ;;  %v5191_v56 = vmul.f32 %v6839_v50, %v5190_v7 }
0x1540   :  { %v5436_v39 = vmul.f32 %v5392_v29, %v8901_v36  ;;  %v5183_v44 = vsub.f32 1.5, %v5182_v32 }
0x1541   :  { %v5140_v62 = vsel %vm805_vm8, %v5118_v48, 0.0  ;;  %v5192_v37 = vmul.f32 0.5, %v5191_v56 }
0x1542   :  { %v5444_v21 = vmul.f32 %v8924_v46, %v5436_v39  ;;  %v5133_v33 = vpop.xlane.xlu0 %5132  ;;  %v5184_v28 = vmul.f32 %v6837_v24, %v5183_v44 }
0x1543   :  { %v5147_v18 = vmul.f32 %v5133_v33, %v8787_v4  ;;  %v5193_v29 = vsub.f32 1.5, %v5192_v37 }
0x1544   :  { %v5452_v55 = vadd.f32 %v8934_v59, %v5444_v21  ;;  %v5188_v49 = vsel %vm5187_vm14, %v6837_v24, %v5184_v28 }
0x1545   :  { %v9055_v30 = vadd.f32 1e-05, %v5147_v18  ;;  %v5241_v6 = vmul.f32 %v5188_v49, %v8867_v53  ;;  %v5194_v43 = vmul.f32 %v6839_v50, %v5193_v29 }
0x1546   :  { %5471 = vrot.lane.b32.xlu1 %v5452_v55, %s6902_s15 }
0x1547   :  { %5475 = vrot.lane.b32.xlu0 %v5454_v19, %s6902_s15  ;;  %6840 = vrsqrt.f32 %v9055_v30  ;;  %v5250_v26 = vmul.f32 %v8924_v46, %v5241_v6  ;;  %vm5205_vm9 = vweird.f32 %v9055_v30 }
0x1549   :  { %v5468_v36 = vpop.permute.xlu1 %5467  ;;  %v5259_v53 = vadd.f32 %v8934_v59, %v5250_v26 }
0x154a   :  { %v5490_v3 = vsel %vm805_vm8, %v5258_v58, %v5468_v36  ;;  %v5136_v38 = vpop.xlane.xlu0 %5135  ;;  %v5198_v36 = vsel %vm5197_vm3, %v6839_v50, %v5194_v43 }
0x154b   :  { %6359 = vmatmul.msk.f32.gmra.mxu0 %vm5503_vm12, %v5490_v3  ;;  %v5148_v8 = vmul.f32 %v5136_v38, %v8787_v4  ;;  %v5242_v48 = vmul.f32 %v5198_v36, %v8914_v41 }
0x154d   :  { %v9060_v0 = vadd.f32 1e-05, %v5148_v8  ;;  %v6841_v47 = vpop.eup %6840  ;;  %v5251_v2 = vmul.f32 %v8924_v46, %v5242_v48  ;;  %v9890_v48 = vld [vmem:[#allocation3_spill] sm:$0xff] }
0x154e   :  { %v5200_v1 = vmul.f32 %v6841_v47, %v9055_v30  ;;  %vm5206_vm7 = vweird.f32 %v6841_v47 }
0x154f   :  { %5477 = vrot.lane.b32.xlu0 %v5455_v14, %s6902_s15  ;;  %vm5207_vm10 = vmor %vm5205_vm9, %vm5206_vm7  ;;  %v5260_v32 = vadd.f32 %v8934_v59, %v5251_v2  ;;  %vm5215_vm11 = vweird.f32 %v9060_v0 }
0x1550   :  { %v5201_v13 = vmul.f32 %v6841_v47, %v5200_v1 }
0x1552   :  { %v5202_v31 = vmul.f32 0.5, %v5201_v13 }
0x1554   :  { %v5203_v58 = vsub.f32 1.5, %v5202_v31 }
0x1556   :  { %v5204_v35 = vmul.f32 %v6841_v47, %v5203_v58 }
0x1558   :  { %v5208_v51 = vsel %vm5207_vm10, %v6841_v47, %v5204_v35 }
0x1559   :  { %v5243_v38 = vmul.f32 %v5208_v51, %v8904_v20 }
0x156a   :  { %v5139_v5 = vpop.xlane.xlu2 %5138 }
0x156b   :  { %v5149_v52 = vmul.f32 %v5139_v5, %v8787_v4 }
0x156d   :  { %v9066_v15 = vadd.f32 1e-05, %v5149_v52 }
0x156f   :  { %vm5225_vm15 = vweird.f32 %v9066_v15 }
0x1570   :  { %5141 = vadd.xlane.f32.xlu1 %v5140_v62 }
0x1596   :  { %v5336_v42 = vpop.xlane.xlu0 %5335 }
0x1597   :  { %v5344_v22 = vmul.f32 %v5336_v42, %v8787_v4 }
0x1599   :  { %v5352_v12 = vadd.f32 1e-05, %v5344_v22  ;;  %v5252_v22 = vmul.f32 %v8924_v46, %v5243_v38 }
0x159b   :  { %6842 = vrsqrt.f32 %v5352_v12  ;;  %vm5429_vm4 = vweird.f32 %v5352_v12 }
0x159c   :  { %6844 = vrsqrt.f32 %v9060_v0 }
0x159d   :  { %6846 = vrsqrt.f32 %v9066_v15 }
0x15a1   :  { %v6843_v25 = vpop.eup %6842 }
0x15a2   :  { %v5424_v57 = vmul.f32 %v6843_v25, %v5352_v12  ;;  %v6845_v39 = vpop.eup %6844  ;;  %vm5430_vm1 = vweird.f32 %v6843_v25  ;;  %v5261_v12 = vadd.f32 %v8934_v59, %v5252_v22 }
0x15a3   :  { %v5210_v21 = vmul.f32 %v6845_v39, %v9060_v0  ;;  %vm5431_vm6 = vmor %vm5429_vm4, %vm5430_vm1  ;;  %v6847_v14 = vpop.eup %6846  ;;  %vm5216_vm5 = vweird.f32 %v6845_v39 }
0x15a4   :  { %v5425_v60 = vmul.f32 %v6843_v25, %v5424_v57  ;;  %v5220_v24 = vmul.f32 %v6847_v14, %v9066_v15  ;;  %vm5217_vm13 = vmor %vm5215_vm11, %vm5216_vm5  ;;  %vm5226_vm14 = vweird.f32 %v6847_v14 }
0x15a5   :  { %v5211_v34 = vmul.f32 %v6845_v39, %v5210_v21  ;;  %vm5227_vm1 = vmor %vm5225_vm15, %vm5226_vm14 }
0x15a6   :  { %v5426_v61 = vmul.f32 0.5, %v5425_v60  ;;  %v5221_v18 = vmul.f32 %v6847_v14, %v5220_v24 }
0x15a7   :  { %v5212_v54 = vmul.f32 0.5, %v5211_v34 }
0x15a8   :  { %v5427_v55 = vsub.f32 1.5, %v5426_v61  ;;  %v5222_v44 = vmul.f32 0.5, %v5221_v18 }
0x15a9   :  { %v5470_v45 = vpop.permute.xlu0 %5469  ;;  %v5213_v10 = vsub.f32 1.5, %v5212_v54 }
0x15aa   :  { %v5428_v11 = vmul.f32 %v6843_v25, %v5427_v55  ;;  %v5491_v19 = vsel %vm805_vm8, %v5259_v53, %v5470_v45  ;;  %v5223_v7 = vsub.f32 1.5, %v5222_v44 }
0x15ab   :  { %6360 = vmatmul.msk.f32.gmra.mxu0 %vm5503_vm12, %v5491_v19  ;;  %v5214_v30 = vmul.f32 %v6845_v39, %v5213_v10 }
0x15ac   :  { %v5432_v3 = vsel %vm5431_vm6, %v6843_v25, %v5428_v11  ;;  %v5224_v47 = vmul.f32 %v6847_v14, %v5223_v7 }
0x15ad   :  { %v5440_v16 = vmul.f32 %v5432_v3, %v8976_v63  ;;  %v5218_v28 = vsel %vm5217_vm13, %v6845_v39, %v5214_v30 }
0x15ae   :  { %v5244_v20 = vmul.f32 %v5218_v28, %v8927_v17  ;;  %v5228_v56 = vsel %vm5227_vm1, %v6847_v14, %v5224_v47 }
0x15af   :  { %v5448_v62 = vmul.f32 %v8924_v46, %v5440_v16  ;;  %v5245_v6 = vmul.f32 %v5228_v56, %v8946_v40 }
0x15b0   :  { %v5545_v33 = vpop.f32.mrf.mxu0  ;;  %v5253_v0 = vmul.f32 %v8924_v46, %v5244_v20 }
0x15b1   :  { %v9084_v27 = vadd.f32 %v9078_v9, %v5545_v33  ;;  %v5456_v63 = vadd.f32 %v8934_v59, %v5448_v62  ;;  %v5474_v8 = vpop.permute.xlu0 %5473  ;;  %v5254_v25 = vmul.f32 %v8924_v46, %v5245_v6 }
0x15b2   :  { %v5493_v49 = vsel %vm805_vm8, %v5261_v12, %v5474_v8  ;;  %v5262_v1 = vadd.f32 %v8934_v59, %v5253_v0 }
0x15b3   :  { %5773 = vrot.lane.b32.xlu2 %v9084_v27, %s6891_s27  ;;  %5479 = vrot.lane.b32.xlu0 %v5456_v63, %s6902_s15  ;;  %v5571_v41 = vsel %vm55_vm0, %v9084_v27, 0.0  ;;  %v5263_v13 = vadd.f32 %v8934_v59, %v5254_v25 }
0x15b4   :  { %5572 = vadd.xlane.f32.xlu1 %v5571_v41 }
0x15b8   :  { %v5472_v50 = vpop.permute.xlu1 %5471 }
0x15b9   :  { %v5492_v42 = vsel %vm805_vm8, %v5260_v32, %v5472_v50  ;;  %v5476_v5 = vpop.permute.xlu0 %5475 }
0x15ba   :  { %6361 = vmatmul.msk.f32.gmra.mxu0 %vm5503_vm12, %v5492_v42  ;;  %v5494_v52 = vsel %vm805_vm8, %v5262_v1, %v5476_v5 }
0x15c1   :  { %v5478_v57 = vpop.permute.xlu0 %5477 }
0x15c2   :  { %6362 = vmatmul.msk.f32.gmra.mxu0 %vm5503_vm12, %v5493_v49  ;;  %v5495_v40 = vsel %vm805_vm8, %v5263_v13, %v5478_v57 }
0x15c8   :  { %v5548_v17 = vpop.f32.mrf.mxu0 }
0x15c9   :  { %v9110_v37 = vadd.f32 %v9078_v9, %v5548_v17 }
0x15ca   :  { %6363 = vmatmul.msk.f32.gmra.mxu0 %vm5503_vm12, %v5494_v52 }
0x15cb   :  { %5775 = vrot.lane.b32.xlu0 %v9110_v37, %s6891_s27  ;;  %v5574_v15 = vsel %vm55_vm0, %v9110_v37, 0.0 }
0x15d2   :  { %6364 = vmatmul.msk.f32.gmra.mxu0 %vm5503_vm12, %v5495_v40 }
0x15dc   :  { %5575 = vadd.xlane.f32.xlu2 %v5574_v15 }
0x15e3   :  { %v5142_v26 = vpop.xlane.xlu1 %5141 }
0x15e4   :  { %v5150_v29 = vmul.f32 %v5142_v26, %v8787_v4 }
0x15e6   :  { %v5158_v60 = vadd.f32 1e-05, %v5150_v29 }
0x15e8   :  { %6848 = vrsqrt.f32 %v5158_v60  ;;  %vm5235_vm3 = vweird.f32 %v5158_v60 }
0x15ee   :  { %v6849_v39 = vpop.eup %6848 }
0x15ef   :  { %v5230_v61 = vmul.f32 %v6849_v39, %v5158_v60  ;;  %vm5236_vm2 = vweird.f32 %v6849_v39 }
0x15f0   :  { %vm5237_vm4 = vmor %vm5235_vm3, %vm5236_vm2 }
0x15f1   :  { %v5231_v31 = vmul.f32 %v6849_v39, %v5230_v61 }
0x15f3   :  { %v5232_v53 = vmul.f32 0.5, %v5231_v31 }
0x15f5   :  { %v5233_v43 = vsub.f32 1.5, %v5232_v53 }
0x15f7   :  { %v5234_v21 = vmul.f32 %v6849_v39, %v5233_v43 }
0x15f9   :  { %v5238_v55 = vsel %vm5237_vm4, %v6849_v39, %v5234_v21 }
0x15fa   :  { %v5246_v45 = vmul.f32 %v5238_v55, %v9046_v23 }
0x15fc   :  { %v5255_v11 = vmul.f32 %v8924_v46, %v5246_v45 }
0x15fe   :  { %v5264_v19 = vadd.f32 %v8934_v59, %v5255_v11 }
0x160d   :  { %v5774_v16 = vpop.permute.xlu2 %5773 }
0x160e   :  { %v5797_v63 = vsel %vm55_vm0, %v5774_v16, 0.0 }
0x1625   :  { %v5480_v58 = vpop.permute.xlu0 %5479 }
0x1626   :  { %v5496_v4 = vsel %vm805_vm8, %v5264_v19, %v5480_v58 }
0x1627   :  { %6365 = vmatmul.msk.f32.gmra.mxu0 %vm5503_vm12, %v5496_v4  ;;  %v5573_v54 = vpop.xlane.xlu1 %5572 }
0x1628   :  { %v5551_v36 = vpop.f32.mrf.mxu0  ;;  %v5595_v33 = vmul.f32 %v5573_v54, %v9890_v48 }
0x1629   :  { %v5552_v34 = vadd.f32 %v9078_v9, %v5551_v36 }
0x162a   :  { %v9141_v41 = vsub.f32 %v9084_v27, %v5595_v33 }
0x162b   :  { %5777 = vrot.lane.b32.xlu0 %v5552_v34, %s6891_s27  ;;  %v5577_v62 = vsel %vm55_vm0, %v5552_v34, 0.0 }
0x162c   :  { %v5611_v2 = vmul.f32 %v9141_v41, %v9141_v41 }
0x162e   :  { %v5619_v51 = vsel %vm55_vm0, %v5611_v2, 0.0 }
0x1637   :  { %v5554_v42 = vpop.f32.mrf.mxu0 }
0x1638   :  { %v9173_v56 = vadd.f32 %v9078_v9, %v5554_v42 }
0x163a   :  { %v5580_v13 = vsel %vm55_vm0, %v9173_v56, 0.0 }
0x163d   :  { %v5776_v3 = vpop.permute.xlu0 %5775 }
0x163e   :  { %v5800_v14 = vsel %vm55_vm0, %v5776_v3, 0.0 }
0x163f   :  { %5801 = vadd.xlane.f32.xlu2 %v5800_v14  ;;  %v5557_v20 = vpop.f32.mrf.mxu0 }
0x1640   :  { %v9161_v47 = vadd.f32 %v9078_v9, %v5557_v20 }
0x1642   :  { %v5583_v29 = vsel %vm55_vm0, %v9161_v47, 0.0 }
0x1647   :  { %v5560_v5 = vpop.f32.mrf.mxu0 }
0x1648   :  { %v9178_v6 = vadd.f32 %v9078_v9, %v5560_v5 }
0x164a   :  { %v5586_v1 = vsel %vm55_vm0, %v9178_v6, 0.0 }
0x164f   :  { %v5576_v23 = vpop.xlane.xlu2 %5575  ;;  %v5563_v57 = vpop.f32.mrf.mxu0 }
0x1650   :  { %v5596_v46 = vmul.f32 %v5576_v23, %v9890_v48  ;;  %v9191_v40 = vadd.f32 %v9078_v9, %v5563_v57 }
0x1652   :  { %v9132_v59 = vsub.f32 %v9110_v37, %v5596_v46  ;;  %v5589_v15 = vsel %vm55_vm0, %v9191_v40, 0.0 }
0x1654   :  { %v5612_v35 = vmul.f32 %v9132_v59, %v9132_v59 }
0x1655   :  { %5578 = vadd.xlane.f32.xlu0 %v5577_v62 }
0x1656   :  { %v5622_v24 = vsel %vm55_vm0, %v5612_v35, 0.0 }
0x1657   :  { %5623 = vadd.xlane.f32.xlu2 %v5622_v24 }
0x165d   :  { %5798 = vadd.xlane.f32.xlu0 %v5797_v63 }
0x1665   :  { %5620 = vadd.xlane.f32.xlu0 %v5619_v51 }
0x169d   :  { %v5778_v10 = vpop.permute.xlu0 %5777 }
0x169e   :  { %v5803_v18 = vsel %vm55_vm0, %v5778_v10, 0.0 }
0x169f   :  { %5804 = vadd.xlane.f32.xlu1 %v5803_v18 }
0x16a4   :  { %v5566_v31 = vpop.f32.mrf.mxu0 }
0x16a5   :  { %v9205_v53 = vadd.f32 %v9078_v9, %v5566_v31 }
0x16a7   :  { %v5592_v45 = vsel %vm55_vm0, %v9205_v53, 0.0 }
0x16b2   :  { %v5802_v12 = vpop.xlane.xlu2 %5801 }
0x16b3   :  { %v5822_v49 = vmul.f32 %v5802_v12, %v9890_v48 }
0x16b5   :  { %v9167_v0 = vsub.f32 %v9110_v37, %v5822_v49 }
0x16c8   :  { %v5579_v38 = vpop.xlane.xlu0 %5578 }
0x16c9   :  { %v5597_v32 = vmul.f32 %v5579_v38, %v9890_v48 }
0x16cb   :  { %v9148_v30 = vsub.f32 %v5552_v34, %v5597_v32 }
0x16cd   :  { %v5613_v44 = vmul.f32 %v9148_v30, %v9148_v30 }
0x16cf   :  { %v5625_v50 = vsel %vm55_vm0, %v5613_v44, 0.0 }
0x16d0   :  { %5626 = vadd.xlane.f32.xlu1 %v5625_v50  ;;  %v5799_v8 = vpop.xlane.xlu0 %5798 }
0x16d1   :  { %v5821_v22 = vmul.f32 %v5799_v8, %v9890_v48 }
0x16d3   :  { %v9155_v28 = vsub.f32 %v9084_v27, %v5821_v22  ;;  %v5838_v27 = vmul.f32 %v9167_v0, %v9167_v0 }
0x16d5   :  { %v5837_v7 = vmul.f32 %v9155_v28, %v9155_v28 }
0x16d7   :  { %5853 = vrot.lane.b32.xlu0 %v5837_v7, %s6891_s27 }
0x16d8   :  { %v9197_v26 = vpop.xlane.xlu0 %5620 }
0x16df   :  { %5781 = vrot.lane.b32.xlu0 %v9161_v47, %s6891_s27 }
0x16e9   :  { %5855 = vrot.lane.b32.xlu1 %v5838_v27, %s6891_s27 }
0x16f1   :  { %5779 = vrot.lane.b32.xlu1 %v9173_v56, %s6891_s27 }
0x1709   :  { %5587 = vadd.xlane.f32.xlu0 %v5586_v1 }
0x1712   :  { %v5805_v17 = vpop.xlane.xlu1 %5804 }
0x1713   :  { %v5823_v52 = vmul.f32 %v5805_v17, %v9890_v48 }
0x1715   :  { %v9183_v37 = vsub.f32 %v5552_v34, %v5823_v52  ;;  %v9223_v34 = vpop.xlane.xlu2 %5623 }
0x1717   :  { %v5839_v25 = vmul.f32 %v9183_v37, %v9183_v37 }
0x1719   :  { %5857 = vrot.lane.b32.xlu2 %v5839_v25, %s6891_s27 }
0x171b   :  { %5581 = vadd.xlane.f32.xlu1 %v5580_v13 }
0x171d   :  { %5785 = vrot.lane.b32.xlu0 %v9191_v40, %s6891_s27 }
0x1723   :  { %5590 = vadd.xlane.f32.xlu1 %v5589_v15 }
0x1742   :  { %5584 = vadd.xlane.f32.xlu2 %v5583_v29 }
0x1743   :  { %v9209_v43 = vpop.xlane.xlu1 %5626 }
0x1749   :  { %v5854_v60 = vpop.permute.xlu0 %5853 }
0x174a   :  { %v5877_v5 = vsel %vm55_vm0, %v5854_v60, 0.0 }
0x1751   :  { %v5782_v39 = vpop.permute.xlu0 %5781 }
0x1752   :  { %v5809_v61 = vsel %vm55_vm0, %v5782_v39, 0.0 }
0x1753   :  { %5810 = vadd.xlane.f32.xlu0 %v5809_v61 }
0x175a   :  { %5783 = vrot.lane.b32.xlu2 %v9178_v6, %s6891_s27 }
0x175b   :  { %v9211_v21 = vpop.permute.xlu1 %5855 }
0x1762   :  { %5787 = vrot.lane.b32.xlu2 %v9205_v53, %s6891_s27 }
0x1763   :  { %v5780_v55 = vpop.permute.xlu1 %5779 }
0x1764   :  { %v5806_v9 = vsel %vm55_vm0, %v5780_v55, 0.0 }
0x1773   :  { %v5858_v3 = vpop.permute.xlu2 %5857 }
0x1774   :  { %v5883_v52 = vsel %vm55_vm0, %v5858_v3, 0.0 }
0x177c   :  { %v5588_v23 = vpop.xlane.xlu0 %5587 }
0x177d   :  { %v5600_v62 = vmul.f32 %v5588_v23, %v9890_v48 }
0x177f   :  { %v9234_v33 = vsub.f32 %v9178_v6, %v5600_v62 }
0x1781   :  { %v5616_v51 = vmul.f32 %v9234_v33, %v9234_v33 }
0x1783   :  { %v5634_v32 = vsel %vm55_vm0, %v5616_v51, 0.0 }
0x178b   :  { %5593 = vadd.xlane.f32.xlu2 %v5592_v45 }
0x178e   :  { %v5582_v11 = vpop.xlane.xlu1 %5581 }
0x178f   :  { %v5598_v19 = vmul.f32 %v5582_v11, %v9890_v48  ;;  %v5786_v2 = vpop.permute.xlu0 %5785 }
0x1790   :  { %v5815_v10 = vsel %vm55_vm0, %v5786_v2, 0.0 }
0x1791   :  { %v9217_v58 = vsub.f32 %v9173_v56, %v5598_v19 }
0x1793   :  { %5807 = vadd.xlane.f32.xlu2 %v5806_v9  ;;  %v5614_v4 = vmul.f32 %v9217_v58, %v9217_v58 }
0x1795   :  { %v5628_v36 = vsel %vm55_vm0, %v5614_v4, 0.0 }
0x1796   :  { %5629 = vadd.xlane.f32.xlu0 %v5628_v36  ;;  %v5591_v25 = vpop.xlane.xlu1 %5590 }
0x1797   :  { %v5601_v9 = vmul.f32 %v5591_v25, %v9890_v48 }
0x1799   :  { %v9288_v4 = vsub.f32 %v9191_v40, %v5601_v9 }
0x179b   :  { %v5617_v36 = vmul.f32 %v9288_v4, %v9288_v4 }
0x179d   :  { %v5637_v3 = vsel %vm55_vm0, %v5617_v36, 0.0 }
0x17b5   :  { %v5585_v14 = vpop.xlane.xlu2 %5584 }
0x17b6   :  { %v5599_v16 = vmul.f32 %v5585_v14, %v9890_v48  ;;  %v5880_v14 = vsel %vm55_vm0, %v9211_v21, 0.0 }
0x17b8   :  { %v9227_v46 = vsub.f32 %v9161_v47, %v5599_v16 }
0x17ba   :  { %v5615_v35 = vmul.f32 %v9227_v46, %v9227_v46 }
0x17bc   :  { %v5631_v54 = vsel %vm55_vm0, %v5615_v35, 0.0 }
0x17bd   :  { %v5784_v24 = vpop.permute.xlu2 %5783  ;;  %5632 = vadd.xlane.f32.xlu2 %v5631_v54 }
0x17be   :  { %v5812_v63 = vsel %vm55_vm0, %v5784_v24, 0.0 }
0x17bf   :  { %5813 = vadd.xlane.f32.xlu1 %v5812_v63 }
0x17c5   :  { %v5788_v18 = vpop.permute.xlu2 %5787  ;;  %5816 = vadd.xlane.f32.xlu2 %v5815_v10  ;;  %v9308_v10 = vld [vmem:[%s9775_s9 + $0x1] ss:$0 sm:$0xff] }
0x17c6   :  { %v5818_v38 = vsel %vm55_vm0, %v5788_v18, 0.0  ;;  %v5811_v44 = vpop.xlane.xlu0 %5810 }
0x17c7   :  { %5819 = vadd.xlane.f32.xlu0 %v5818_v38  ;;  %5635 = vadd.xlane.f32.xlu1 %v5634_v32  ;;  %v5825_v50 = vmul.f32 %v5811_v44, %v9890_v48  ;;  %v9316_v32 = vld [vmem:[%s9775_s9] ss:$0 sm:$0xff]  ;;  %v5644_v44 = vmul.f32 %v9223_v34, %v9890_v48 }
0x17c9   :  { %v9244_v42 = vsub.f32 %v9161_v47, %v5825_v50  ;;  %v5652_v50 = vadd.f32 1e-05, %v5644_v44 }
0x17cb   :  { %v5841_v8 = vmul.f32 %v9244_v42, %v9244_v42  ;;  %6850 = vrsqrt.f32 %v5652_v50  ;;  %vm5675_vm6 = vweird.f32 %v5652_v50 }
0x17e0   :  { %5861 = vrot.lane.b32.xlu1 %v5841_v8, %s6891_s27  ;;  %v5643_v8 = vmul.f32 %v9197_v26, %v9890_v48 }
0x17fe   :  { %v5594_v22 = vpop.xlane.xlu2 %5593 }
0x17ff   :  { %v5602_v7 = vmul.f32 %v5594_v22, %v9890_v48  ;;  %v5645_v22 = vmul.f32 %v9209_v43, %v9890_v48 }
0x1801   :  { %v9251_v20 = vsub.f32 %v9205_v53, %v5602_v7  ;;  %v5651_v7 = vadd.f32 1e-05, %v5643_v8 }
0x1803   :  { %v5618_v12 = vmul.f32 %v9251_v20, %v9251_v20  ;;  %6852 = vrsqrt.f32 %v5651_v7  ;;  %vm5665_vm10 = vweird.f32 %v5651_v7 }
0x1805   :  { %v5640_v49 = vsel %vm55_vm0, %v5618_v12, 0.0  ;;  %v9326_v12 = vadd.f32 1e-05, %v5645_v22 }
0x1806   :  { %v5808_v27 = vpop.xlane.xlu2 %5807  ;;  %5641 = vadd.xlane.f32.xlu2 %v5640_v49 }
0x1807   :  { %v5824_v47 = vmul.f32 %v5808_v27, %v9890_v48  ;;  %v6851_v27 = vpop.eup %6850  ;;  %6854 = vrsqrt.f32 %v9326_v12  ;;  %vm5685_vm13 = vweird.f32 %v9326_v12 }
0x1808   :  { %v5670_v34 = vmul.f32 %v6851_v27, %v5652_v50  ;;  %vm5676_vm12 = vweird.f32 %v6851_v27 }
0x1809   :  { %v9259_v1 = vsub.f32 %v9173_v56, %v5824_v47  ;;  %v5630_v13 = vpop.xlane.xlu0 %5629  ;;  %v6853_v26 = vpop.eup %6852  ;;  %vm5677_vm7 = vmor %vm5675_vm6, %vm5676_vm12 }
0x180a   :  { %5878 = vadd.xlane.f32.xlu1 %v5877_v5  ;;  %v5646_v49 = vmul.f32 %v5630_v13, %v9890_v48  ;;  %v5671_v25 = vmul.f32 %v6851_v27, %v5670_v34  ;;  %vm5666_vm9 = vweird.f32 %v6853_v26 }
0x180b   :  { %v5840_v17 = vmul.f32 %v9259_v1, %v9259_v1  ;;  %vm9365_vm5 = vmor %vm5665_vm10, %vm5666_vm9 }
0x180c   :  { %v9331_v5 = vadd.f32 1e-05, %v5646_v49  ;;  %v5672_v13 = vmul.f32 0.5, %v5671_v25 }
0x180d   :  { %5859 = vrot.lane.b32.xlu0 %v5840_v17, %s6891_s27  ;;  %v9336_v43 = vpop.eup %6854 }
0x180e   :  { %5884 = vadd.xlane.f32.xlu2 %v5883_v52  ;;  %6856 = vrsqrt.f32 %v9331_v5  ;;  %vm5686_vm11 = vweird.f32 %v9336_v43  ;;  %vm5695_vm2 = vweird.f32 %v9331_v5 }
0x180f   :  { %vm5687_vm14 = vmor %vm5685_vm13, %vm5686_vm11 }
0x1830   :  { %v5633_v57 = vpop.xlane.xlu2 %5632 }
0x1831   :  { %v5647_v47 = vmul.f32 %v5633_v57, %v9890_v48  ;;  %v5680_v57 = vmul.f32 %v9336_v43, %v9326_v12 }
0x1832   :  { %v5814_v15 = vpop.xlane.xlu1 %5813 }
0x1833   :  { %v5826_v29 = vmul.f32 %v5814_v15, %v9890_v48  ;;  %v9333_v17 = vadd.f32 1e-05, %v5647_v47  ;;  %v5660_v15 = vmul.f32 %v6853_v26, %v5651_v7 }
0x1835   :  { %v9267_v60 = vsub.f32 %v9178_v6, %v5826_v29  ;;  %6858 = vrsqrt.f32 %v9333_v17  ;;  %v5661_v29 = vmul.f32 %v6853_v26, %v5660_v15  ;;  %vm5705_vm4 = vweird.f32 %v9333_v17 }
0x1837   :  { %v5842_v56 = vmul.f32 %v9267_v60, %v9267_v60 }
0x1838   :  { %v5817_v39 = vpop.xlane.xlu2 %5816 }
0x1839   :  { %v5827_v61 = vmul.f32 %v5817_v39, %v9890_v48  ;;  %5863 = vrot.lane.b32.xlu0 %v5842_v56, %s6891_s27  ;;  %v9341_v56 = vpop.eup %6856 }
0x183a   :  { %v5820_v31 = vpop.xlane.xlu0 %5819  ;;  %vm5696_vm15 = vweird.f32 %v9341_v56 }
0x183b   :  { %v9274_v55 = vsub.f32 %v9191_v40, %v5827_v61  ;;  %v5828_v45 = vmul.f32 %v5820_v31, %v9890_v48  ;;  %v9343_v39 = vpop.eup %6858  ;;  %v5673_v61 = vsub.f32 1.5, %v5672_v13  ;;  %v5681_v31 = vmul.f32 %v9336_v43, %v5680_v57  ;;  %vm9411_vm3 = vmor %vm5695_vm2, %vm5696_vm15 }
0x183c   :  { %vm5706_vm1 = vweird.f32 %v9343_v39 }
0x183d   :  { %v5843_v11 = vmul.f32 %v9274_v55, %v9274_v55  ;;  %v9280_v6 = vsub.f32 %v9205_v53, %v5828_v45  ;;  %v5636_v53 = vpop.xlane.xlu1 %5635  ;;  %vm5707_vm12 = vmor %vm5705_vm4, %vm5706_vm1 }
0x183e   :  { %v5648_v45 = vmul.f32 %v5636_v53, %v9890_v48 }
0x183f   :  { %v5844_v19 = vmul.f32 %v9280_v6, %v9280_v6  ;;  %5865 = vrot.lane.b32.xlu2 %v5843_v11, %s6891_s27  ;;  %v5662_v11 = vmul.f32 0.5, %v5661_v29 }
0x1841   :  { %5867 = vrot.lane.b32.xlu1 %v5844_v19, %s6891_s27  ;;  %v5690_v19 = vmul.f32 %v9341_v56, %v9331_v5 }
0x1852   :  { %v5862_v16 = vpop.permute.xlu1 %5861 }
0x1853   :  { %v5889_v23 = vsel %vm55_vm0, %v5862_v16, 0.0  ;;  %v5682_v16 = vmul.f32 0.5, %v5681_v31 }
0x1863   :  { %5638 = vadd.xlane.f32.xlu0 %v5637_v3  ;;  %v5700_v3 = vmul.f32 %v9343_v39, %v9333_v17 }
0x1865   :  { %v5701_v53 = vmul.f32 %v9343_v39, %v5700_v3 }
0x186b   :  { %5881 = vadd.xlane.f32.xlu0 %v5880_v14  ;;  %v5674_v14 = vmul.f32 %v6851_v27, %v5673_v61 }
0x1873   :  { %5890 = vadd.xlane.f32.xlu0 %v5889_v23  ;;  %v9352_v23 = vadd.f32 1e-05, %v5648_v45 }
0x1875   :  { %6860 = vrsqrt.f32 %v9352_v23  ;;  %vm5715_vm11 = vweird.f32 %v9352_v23 }
0x1879   :  { %v9297_v40 = vpop.xlane.xlu2 %5641 }
0x187b   :  { %v9375_v7 = vpop.eup %6860 }
0x187c   :  { %v5710_v45 = vmul.f32 %v9375_v7, %v9352_v23  ;;  %vm5716_vm10 = vweird.f32 %v9375_v7 }
0x187d   :  { %v9302_v2 = vpop.xlane.xlu1 %5878  ;;  %vm9488_vm13 = vmor %vm5715_vm11, %vm5716_vm10 }
0x187e   :  { %v5901_v44 = vmul.f32 %v9302_v2, %v9890_v48  ;;  %v5711_v5 = vmul.f32 %v9375_v7, %v5710_v45 }
0x187f   :  { %v5860_v62 = vpop.permute.xlu0 %5859 }
0x1880   :  { %v5886_v35 = vsel %vm55_vm0, %v5860_v62, 0.0  ;;  %v5663_v62 = vsub.f32 1.5, %v5662_v11  ;;  %v9378_v25 = vadd.f32 1e-05, %v5901_v44 }
0x1881   :  { %5887 = vadd.xlane.f32.xlu1 %v5886_v35  ;;  %v9299_v54 = vpop.xlane.xlu2 %5884  ;;  %v5691_v35 = vmul.f32 %v9341_v56, %v5690_v19 }
0x1882   :  { %v5903_v50 = vmul.f32 %v9299_v54, %v9890_v48  ;;  %vm5923_vm4 = vweird.f32 %v9378_v25 }
0x1884   :  { %v9384_v29 = vadd.f32 1e-05, %v5903_v50 }
0x1899   :  { %v5866_v24 = vpop.permute.xlu2 %5865 }
0x189a   :  { %v5895_v63 = vsel %vm55_vm0, %v5866_v24, 0.0 }
0x189b   :  { %5896 = vadd.xlane.f32.xlu1 %v5895_v63  ;;  %v5678_v63 = vsel %vm5677_vm7, %v6851_v27, %v5674_v14 }
0x189c   :  { %v5740_v22 = vmul.f32 %v5678_v63, %v9132_v59 }
0x189e   :  { %v5749_v57 = vmul.f32 %v9316_v32, %v5740_v22 }
0x18a0   :  { %v5758_v3 = vadd.f32 %v9308_v10, %v5749_v57 }
0x18a2   :  { %vm6031_vm6 = vcmp.ge.f32.partialorder %v5758_v3, 0.0 }
0x18ab   :  { %v5864_v21 = vpop.permute.xlu0 %5863 }
0x18ac   :  { %v5892_v51 = vsel %vm55_vm0, %v5864_v21, 0.0  ;;  %v5683_v21 = vsub.f32 1.5, %v5682_v16 }
0x18ad   :  { %5893 = vadd.xlane.f32.xlu2 %v5892_v51  ;;  %v5664_v51 = vmul.f32 %v6853_v26, %v5663_v62 }
0x18ae   :  { %v5684_v47 = vmul.f32 %v9336_v43, %v5683_v21 }
0x18af   :  { %v5668_v2 = vsel %vm9365_vm5, %v6853_v26, %v5664_v51 }
0x18b0   :  { %v5739_v26 = vmul.f32 %v5668_v2, %v9141_v41  ;;  %v5688_v61 = vsel %vm5687_vm14, %v9336_v43, %v5684_v47 }
0x18b2   :  { %v5748_v17 = vmul.f32 %v9316_v32, %v5739_v26 }
0x18b3   :  { %v5868_v18 = vpop.permute.xlu1 %5867 }
0x18b4   :  { %v5898_v38 = vsel %vm55_vm0, %v5868_v18, 0.0  ;;  %6018 = vrot.lane.b32.xlu1 %v9308_v10, %s6893_s23  ;;  %v5692_v18 = vmul.f32 0.5, %v5691_v35  ;;  %v5757_v44 = vadd.f32 %v9308_v10, %v5748_v17 }
0x18b5   :  { %5899 = vadd.xlane.f32.xlu0 %v5898_v38  ;;  %v5702_v38 = vmul.f32 0.5, %v5701_v53 }
0x18b6   :  { %vm6030_vm7 = vcmp.ge.f32.partialorder %v5757_v44, 0.0 }
0x18b7   :  { %v5703_v54 = vsub.f32 1.5, %v5702_v38 }
0x18b9   :  { %v5704_v19 = vmul.f32 %v9343_v39, %v5703_v54 }
0x18bb   :  { %v5708_v16 = vsel %vm5707_vm12, %v9343_v39, %v5704_v19  ;;  %v5712_v39 = vmul.f32 0.5, %v5711_v5  ;;  %vm5943_vm12 = vweird.f32 %v9384_v29 }
0x18bd   :  { %v5713_v2 = vsub.f32 1.5, %v5712_v39 }
0x18c5   :  { %6006 = vrot.lane.b32.xlu2 %v9316_v32, %s6893_s23 }
0x18d6   :  { %v5639_v52 = vpop.xlane.xlu0 %5638 }
0x18d7   :  { %v5649_v9 = vmul.f32 %v5639_v52, %v9890_v48  ;;  %v5693_v52 = vsub.f32 1.5, %v5692_v18  ;;  %v5743_v18 = vmul.f32 %v5708_v16, %v9227_v46 }
0x18d9   :  { %v9355_v24 = vadd.f32 1e-05, %v5649_v9  ;;  %v5694_v12 = vmul.f32 %v9341_v56, %v5693_v52  ;;  %v5741_v9 = vmul.f32 %v5688_v61, %v9148_v30  ;;  %v9420_v30 = vstv %s9776_s12 }
0x18da   :  { %v6040_v63 = vmul.f32 %v9420_v30, %v5758_v3  ;;  %v6039_v26 = vmul.f32 %v9420_v30, %v5757_v44 }
0x18db   :  { %6862 = vrsqrt.f32 %v9355_v24  ;;  %v5750_v35 = vmul.f32 %v9316_v32, %v5741_v9  ;;  %vm5725_vm14 = vweird.f32 %v9355_v24 }
0x18dc   :  { %6864 = vrsqrt.f32 %v9378_v25  ;;  %v6047_v16 = vsel %vm6030_vm7, %v5757_v44, %v6039_v26 }
0x18dd   :  { %6866 = vrsqrt.f32 %v9384_v29  ;;  %v5759_v50 = vadd.f32 %v9308_v10, %v5750_v35 }
0x18de   :  { %v5882_v36 = vpop.xlane.xlu0 %5881 }
0x18df   :  { %v5902_v34 = vmul.f32 %v5882_v36, %v9890_v48  ;;  %v5650_v36 = vmul.f32 %v9297_v40, %v9890_v48  ;;  %v5698_v40 = vsel %vm9411_vm3, %v9341_v56, %v5694_v12  ;;  %v6041_v61 = vmul.f32 %v9420_v30, %v5759_v50 }
0x18e0   :  { %v5742_v21 = vmul.f32 %v5698_v40, %v9217_v58  ;;  %v6048_v58 = vsel %vm6031_vm6, %v5758_v3, %v6040_v63  ;;  %vm6032_vm9 = vcmp.ge.f32.partialorder %v5759_v50, 0.0  ;;  %v5714_v3 = vmul.f32 %v9375_v7, %v5713_v2 }
0x18e1   :  { %v9381_v13 = vpop.eup %6862  ;;  %v9389_v31 = vadd.f32 1e-05, %v5902_v34  ;;  %v9434_v53 = vadd.f32 1e-05, %v5650_v36  ;;  %v5752_v34 = vmul.f32 %v9316_v32, %v5743_v18 }
0x18e2   :  { %v5720_v41 = vmul.f32 %v9381_v13, %v9355_v24  ;;  %v9436_v56 = vpop.eup %6864  ;;  %v5751_v27 = vmul.f32 %v9316_v32, %v5742_v21  ;;  %vm5726_vm5 = vweird.f32 %v9381_v13 }
0x18e3   :  { %6868 = vrsqrt.f32 %v9389_v31  ;;  %v9440_v51 = vpop.eup %6866  ;;  %v5918_v46 = vmul.f32 %v9436_v56, %v9378_v25  ;;  %v5761_v36 = vadd.f32 %v9308_v10, %v5752_v34  ;;  %vm9498_vm2 = vmor %vm5725_vm14, %vm5726_vm5  ;;  %v9513_v34 = vld [vmem:[%s9764_s0 + $0x8] sm:$0xff]  ;;  %vm5924_vm3 = vweird.f32 %v9436_v56 }
0x18e4   :  { %v5721_v62 = vmul.f32 %v9381_v13, %v5720_v41  ;;  %v5938_v52 = vmul.f32 %v9440_v51, %v9384_v29  ;;  %v5760_v19 = vadd.f32 %v9308_v10, %v5751_v27  ;;  %v9516_v2 = vadd.f32 %v9513_v34, %v6048_v58 }
0x18e5   :  { %v5919_v41 = vmul.f32 %v9436_v56, %v5918_v46  ;;  %vm6034_vm1 = vcmp.ge.f32.partialorder %v5761_v36, 0.0  ;;  %v6043_v23 = vmul.f32 %v9420_v30, %v5761_v36  ;;  %vm5944_vm6 = vweird.f32 %v9440_v51 }
0x18e6   :  { %v5891_v49 = vpop.xlane.xlu0 %5890  ;;  %v5939_v14 = vmul.f32 %v9440_v51, %v5938_v52  ;;  %v6042_v63 = vmul.f32 %v9420_v30, %v5760_v19  ;;  %vm6033_vm15 = vcmp.ge.f32.partialorder %v5760_v19, 0.0  ;;  %vm5933_vm10 = vweird.f32 %v9389_v31  ;;  %vm9556_vm11 = vmor %vm5943_vm12, %vm5944_vm6 }
0x18e7   :  { %v5905_v15 = vmul.f32 %v5891_v49, %v9890_v48  ;;  %v5920_v39 = vmul.f32 0.5, %v5919_v41 }
0x18e8   :  { %v5940_v44 = vmul.f32 0.5, %v5939_v14  ;;  %v6050_v58 = vsel %vm6033_vm15, %v5760_v19, %v6042_v63 }
0x18e9   :  { %v9401_v43 = vadd.f32 1e-05, %v5905_v15  ;;  %v9443_v38 = vpop.eup %6868 }
0x18ea   :  { %v5928_v15 = vmul.f32 %v9443_v38, %v9389_v31  ;;  %v5941_v41 = vsub.f32 1.5, %v5940_v44  ;;  %vm5934_vm7 = vweird.f32 %v9443_v38 }
0x18eb   :  { %vm9563_vm14 = vmor %vm5933_vm10, %vm5934_vm7  ;;  %vm5963_vm15 = vweird.f32 %v9401_v43  ;;  %vm5735_vm7 = vweird.f32 %v9434_v53 }
0x18ec   :  { %v5929_v5 = vmul.f32 %v9443_v38, %v5928_v15 }
0x18ee   :  { %v5930_v24 = vmul.f32 0.5, %v5929_v5 }
0x18f0   :  { %v5931_v14 = vsub.f32 1.5, %v5930_v24 }
0x18f2   :  { %v5932_v29 = vmul.f32 %v9443_v38, %v5931_v14 }
0x18f4   :  { %v5888_v8 = vpop.xlane.xlu1 %5887 }
0x18f5   :  { %v5904_v59 = vmul.f32 %v5888_v8, %v9890_v48  ;;  %v5722_v8 = vmul.f32 0.5, %v5721_v62  ;;  %v6049_v62 = vsel %vm6032_vm9, %v5759_v50, %v6041_v61  ;;  %v5718_v50 = vsel %vm9488_vm13, %v9375_v7, %v5714_v3  ;;  %v9521_v7 = vld [vmem:[%s9764_s0] sm:$0xff]  ;;  %vm9548_vm9 = vmor %vm5923_vm4, %vm5924_vm3 }
0x18f6   :  { %v9524_v52 = vadd.f32 %v9521_v7, %v6047_v16  ;;  %v6051_v61 = vsel %vm6034_vm1, %v5761_v36, %v6043_v23  ;;  %v5942_v16 = vmul.f32 %v9440_v51, %v5941_v41 }
0x18f7   :  { %v9395_v11 = vadd.f32 1e-05, %v5904_v59  ;;  %v5723_v54 = vsub.f32 1.5, %v5722_v8 }
0x18f9   :  { %6870 = vrsqrt.f32 %v9395_v11  ;;  %v5724_v40 = vmul.f32 %v9381_v13, %v5723_v54  ;;  %vm5953_vm3 = vweird.f32 %v9395_v11 }
0x18fa   :  { %6872 = vrsqrt.f32 %v9401_v43 }
0x18fb   :  { %6874 = vrsqrt.f32 %v9434_v53  ;;  %v5728_v27 = vsel %vm9498_vm2, %v9381_v13, %v5724_v40  ;;  %v9529_v13 = vld [vmem:[%s9764_s0 + $0x10] sm:$0xff] }
0x18fc   :  { %v5745_v3 = vmul.f32 %v5728_v27, %v9288_v4  ;;  %v9581_v27 = vld [vmem:[%s9764_s0 + $0x18] sm:$0xff] }
0x18ff   :  { %v9446_v22 = vpop.eup %6870 }
0x1900   :  { %v9450_v49 = vpop.eup %6872  ;;  %v5948_v57 = vmul.f32 %v9446_v22, %v9395_v11  ;;  %vm5954_vm13 = vweird.f32 %v9446_v22 }
0x1901   :  { %v5958_v12 = vmul.f32 %v9450_v49, %v9401_v43  ;;  %v9472_v9 = vpop.eup %6874  ;;  %vm5964_vm5 = vweird.f32 %v9450_v49  ;;  %v9584_v43 = vadd.f32 %v9581_v27, %v6050_v58  ;;  %vm9591_vm4 = vmor %vm5953_vm3, %vm5954_vm13 }
0x1902   :  { %v5949_v17 = vmul.f32 %v9446_v22, %v5948_v57  ;;  %v5730_v18 = vmul.f32 %v9472_v9, %v9434_v53  ;;  %v5921_v57 = vsub.f32 1.5, %v5920_v39  ;;  %vm9572_vm2 = vmor %vm5963_vm15, %vm5964_vm5 }
0x1903   :  { %v5959_v35 = vmul.f32 %v9450_v49, %v5958_v12  ;;  %v5744_v12 = vmul.f32 %v5718_v50, %v9234_v33 }
0x1904   :  { %v5950_v46 = vmul.f32 0.5, %v5949_v17  ;;  %v5731_v15 = vmul.f32 %v9472_v9, %v5730_v18  ;;  %v5922_v36 = vmul.f32 %v9436_v56, %v5921_v57 }
0x1905   :  { %v5960_v54 = vmul.f32 0.5, %v5959_v35  ;;  %v5753_v23 = vmul.f32 %v9316_v32, %v5744_v12 }
0x1906   :  { %v5951_v40 = vsub.f32 1.5, %v5950_v46  ;;  %v5732_v17 = vmul.f32 0.5, %v5731_v15  ;;  %v5926_v24 = vsel %vm9548_vm9, %v9436_v56, %v5922_v36  ;;  %v5936_v56 = vsel %vm9563_vm14, %v9443_v38, %v5932_v29 }
0x1907   :  { %v5961_v19 = vsub.f32 1.5, %v5960_v54  ;;  %v5946_v54 = vsel %vm9556_vm11, %v9440_v51, %v5942_v16  ;;  %v9617_v51 = vld [vmem:[%s9764_s0 + $0x20] sm:$0xff]  ;;  %vm5736_vm9 = vweird.f32 %v9472_v9  ;;  %v5998_v41 = vmul.f32 %v5936_v56, %v9167_v0 }
0x1908   :  { %v5952_v35 = vmul.f32 %v9446_v22, %v5951_v40  ;;  %v5733_v44 = vsub.f32 1.5, %v5732_v17  ;;  %v9620_v57 = vadd.f32 %v9617_v51, %v6051_v61  ;;  %v5997_v61 = vmul.f32 %v5926_v24, %v9155_v28  ;;  %vm9648_vm5 = vmor %vm5735_vm7, %vm5736_vm9 }
0x1909   :  { %v5962_v31 = vmul.f32 %v9450_v49, %v5961_v19 }
0x190a   :  { %v5956_v15 = vsel %vm9591_vm4, %v9446_v22, %v5952_v35  ;;  %v9633_v12 = vmul.f32 %v9472_v9, %v5733_v44 }
0x190b   :  { %v5966_v38 = vsel %vm9572_vm2, %v9450_v49, %v5962_v31  ;;  %v5999_v49 = vmul.f32 %v5946_v54, %v9183_v37 }
0x190c   :  { %v6001_v40 = vmul.f32 %v5966_v38, %v9244_v42  ;;  %v5738_v42 = vsel %vm9648_vm5, %v9472_v9, %v9633_v12 }
0x190e   :  { %v5897_v47 = vpop.xlane.xlu1 %5896 }
0x190f   :  { %v5907_v59 = vmul.f32 %v5897_v47, %v9890_v48 }
0x1911   :  { %v9467_v45 = vadd.f32 1e-05, %v5907_v59  ;;  %v9532_v59 = vadd.f32 %v9529_v13, %v6049_v62  ;;  %v5754_v62 = vmul.f32 %v9316_v32, %v5745_v3 }
0x1913   :  { %6876 = vrsqrt.f32 %v9467_v45  ;;  %vm5983_vm12 = vweird.f32 %v9467_v45  ;;  %v5763_v58 = vadd.f32 %v9308_v10, %v5754_v62 }
0x1915   :  { %vm6036_vm10 = vcmp.ge.f32.partialorder %v5763_v58, 0.0  ;;  %v6045_v14 = vmul.f32 %v9420_v30, %v5763_v58 }
0x1917   :  { %v6053_v35 = vsel %vm6036_vm10, %v5763_v58, %v6045_v14 }
0x1919   :  { %v9508_v47 = vpop.eup %6876 }
0x191a   :  { %v5978_v26 = vmul.f32 %v9508_v47, %v9467_v45  ;;  %vm5984_vm1 = vweird.f32 %v9508_v47 }
0x191b   :  { %vm9610_vm6 = vmor %vm5983_vm12, %vm5984_vm1 }
0x191c   :  { %v5979_v5 = vmul.f32 %v9508_v47, %v5978_v26  ;;  %v9630_v26 = vadd.f32 %v9308_v10, %v5753_v23 }
0x191e   :  { %v5980_v33 = vmul.f32 0.5, %v5979_v5 }
0x1920   :  { %v5981_v63 = vsub.f32 1.5, %v5980_v33  ;;  %v5894_v21 = vpop.xlane.xlu2 %5893 }
0x1921   :  { %v5906_v39 = vmul.f32 %v5894_v21, %v9890_v48 }
0x1922   :  { %v5982_v50 = vmul.f32 %v9508_v47, %v5981_v63 }
0x1923   :  { %v9596_v11 = vadd.f32 1e-05, %v5906_v39 }
0x1924   :  { %v5986_v22 = vsel %vm9610_vm6, %v9508_v47, %v5982_v50  ;;  %v6000_v47 = vmul.f32 %v5956_v15, %v9259_v1  ;;  %vm6035_vm6 = vcmp.ge.f32.partialorder %v9630_v26, 0.0 }
0x1925   :  { %6878 = vrsqrt.f32 %v9596_v11  ;;  %v6003_v5 = vmul.f32 %v5986_v22, %v9274_v55  ;;  %vm5973_vm11 = vweird.f32 %v9596_v11 }
0x1926   :  { %v9641_v3 = vpop.permute.xlu1 %6018 }
0x1928   :  { %v9646_v53 = vpop.permute.xlu2 %6006  ;;  %v5900_v19 = vpop.xlane.xlu0 %5899 }
0x1929   :  { %v6009_v0 = vmul.f32 %v9646_v53, %v5997_v61  ;;  %v6010_v37 = vmul.f32 %v9646_v53, %v5998_v41  ;;  %v6011_v1 = vmul.f32 %v9646_v53, %v5999_v49  ;;  %v6012_v17 = vmul.f32 %v9646_v53, %v6000_v47 }
0x192a   :  { %v6013_v55 = vmul.f32 %v9646_v53, %v6001_v40  ;;  %v6015_v36 = vmul.f32 %v9646_v53, %v6003_v5  ;;  %v5908_v33 = vmul.f32 %v5900_v19, %v9890_v48  ;;  %v6888_v40 = vld [vmem:[%s9764_s0 + $0x30] sm:$0xff]  ;;  %v5746_v19 = vmul.f32 %v5738_v42, %v9251_v20 }
0x192b   :  { %v6879_v4 = vpop.eup %6878  ;;  %v6021_v16 = vadd.f32 %v9641_v3, %v6009_v0  ;;  %v6022_v62 = vadd.f32 %v9641_v3, %v6010_v37  ;;  %v6023_v25 = vadd.f32 %v9641_v3, %v6011_v1  ;;  %v6024_v29 = vadd.f32 %v9641_v3, %v6012_v17 }
0x192c   :  { %v5968_v63 = vmul.f32 %v6879_v4, %v9596_v11  ;;  %v9669_v9 = vadd.f32 1e-05, %v5908_v33  ;;  %v6025_v21 = vadd.f32 %v9641_v3, %v6013_v55  ;;  %v6027_v48 = vadd.f32 %v9641_v3, %v6015_v36 }
0x192d   :  { %vm6055_vm13 = vcmp.ge.f32.partialorder %v6021_v16, 0.0  ;;  %vm6056_vm14 = vcmp.ge.f32.partialorder %v6022_v62, 0.0  ;;  %vm6057_vm15 = vcmp.ge.f32.partialorder %v6023_v25, 0.0  ;;  %vm6058_vm1 = vcmp.ge.f32.partialorder %v6024_v29, 0.0 }
0x192e   :  { %v5969_v18 = vmul.f32 %v6879_v4, %v5968_v63  ;;  %6880 = vrsqrt.f32 %v9669_v9  ;;  %vm6059_vm2 = vcmp.ge.f32.partialorder %v6025_v21, 0.0  ;;  %vm6061_vm3 = vcmp.ge.f32.partialorder %v6027_v48, 0.0 }
0x192f   :  { %v6063_v31 = vmul.f32 %v9420_v30, %v6021_v16  ;;  %v6064_v39 = vmul.f32 %v9420_v30, %v6022_v62  ;;  %v6065_v44 = vmul.f32 %v9420_v30, %v6023_v25  ;;  %v6066_v8 = vmul.f32 %v9420_v30, %v6024_v29 }
0x1930   :  { %v5970_v23 = vmul.f32 0.5, %v5969_v18  ;;  %v6067_v50 = vmul.f32 %v9420_v30, %v6025_v21  ;;  %vm5974_vm4 = vweird.f32 %v6879_v4  ;;  %v6069_v24 = vmul.f32 %v9420_v30, %v6027_v48 }
0x1931   :  { %v6071_v46 = vsel %vm6055_vm13, %v6021_v16, %v6063_v31  ;;  %v6072_v54 = vsel %vm6056_vm14, %v6022_v62, %v6064_v39  ;;  %v6073_v56 = vsel %vm6057_vm15, %v6023_v25, %v6065_v44  ;;  %v6074_v15 = vsel %vm6058_vm1, %v6024_v29, %v6066_v8  ;;  %vm5975_vm12 = vmor %vm5973_vm11, %vm5974_vm4 }
0x1932   :  { %v5971_v58 = vsub.f32 1.5, %v5970_v23  ;;  %v6075_v45 = vsel %vm6059_vm2, %v6025_v21, %v6067_v50  ;;  %v6077_v38 = vsel %vm6061_vm3, %v6027_v48, %v6069_v24  ;;  %v6087_v22 = vadd.f32 %v9521_v7, %v6071_v46  ;;  %v6890_v21 = vld [vmem:[%s9764_s0 + $0x38] sm:$0xff] }
0x1933   :  { %v6088_v12 = vadd.f32 %v9513_v34, %v6072_v54  ;;  %v6089_v61 = vadd.f32 %v9529_v13, %v6073_v56  ;;  %v6090_v47 = vadd.f32 %v9581_v27, %v6074_v15  ;;  %v6091_v14 = vadd.f32 %v9617_v51, %v6075_v45 }
0x1934   :  { %v6881_v49 = vpop.eup %6880  ;;  %v5972_v41 = vmul.f32 %v6879_v4, %v5971_v58  ;;  %v6093_v5 = vadd.f32 %v6888_v40, %v6077_v38  ;;  %v6095_v7 = vsel %vm55_vm0, %v9524_v52, %v6087_v22  ;;  %v6085_v27 = vadd.f32 %v6888_v40, %v6053_v35 }
0x1935   :  { %v5988_v34 = vmul.f32 %v6881_v49, %v9669_v9  ;;  %v6096_v13 = vsel %vm55_vm0, %v9516_v2, %v6088_v12  ;;  %v6097_v28 = vsel %vm55_vm0, %v9532_v59, %v6089_v61  ;;  %v6098_v20 = vsel %vm55_vm0, %v9584_v43, %v6090_v47  ;;  %6103 = vst.msk [vmem:[%s9777_s13] sm:$0xff] %vm805_vm8, %v6095_v7 }
0x1936   :  { %v5976_v51 = vsel %vm5975_vm12, %v6879_v4, %v5972_v41  ;;  %v6099_v52 = vsel %vm55_vm0, %v9620_v57, %v6091_v14  ;;  %6104 = vst.msk [vmem:[%s9777_s13 + $0x8] sm:$0xff] %vm805_vm8, %v6096_v13  ;;  %v6044_v2 = vmul.f32 %v9420_v30, %v9630_v26  ;;  %v6101_v59 = vsel %vm55_vm0, %v6085_v27, %v6093_v5  ;;  %v6889_v4 = vld [vmem:[%s9764_s0 + $0x28] sm:$0xff] }
0x1937   :  { %v6002_v11 = vmul.f32 %v5976_v51, %v9267_v60  ;;  %v5989_v0 = vmul.f32 %v6881_v49, %v5988_v34  ;;  %6105 = vst.msk [vmem:[%s9777_s13 + $0x10] sm:$0xff] %vm805_vm8, %v6097_v28  ;;  %v5755_v57 = vmul.f32 %v9316_v32, %v5746_v19  ;;  %vm5994_vm7 = vweird.f32 %v6881_v49 }
0x1938   :  { %6106 = vst.msk [vmem:[%s9777_s13 + $0x18] sm:$0xff] %vm805_vm8, %v6098_v20  ;;  %v6052_v17 = vsel %vm6035_vm6, %v9630_v26, %v6044_v2  ;;  %vm5993_vm9 = vweird.f32 %v9669_v9 }
0x1939   :  { %v6014_v60 = vmul.f32 %v9646_v53, %v6002_v11  ;;  %v5990_v43 = vmul.f32 0.5, %v5989_v0  ;;  %6107 = vst.msk [vmem:[%s9777_s13 + $0x20] sm:$0xff] %vm805_vm8, %v6099_v52  ;;  %v5764_v55 = vadd.f32 %v9308_v10, %v5755_v57  ;;  %vm5995_vm5 = vmor %vm5993_vm9, %vm5994_vm7  ;;  %v6084_v16 = vadd.f32 %v6889_v4, %v6052_v17 }
0x193a   :  { %6109 = vst.msk [vmem:[%s9777_s13 + $0x30] sm:$0xff] %vm805_vm8, %v6101_v59 }
0x193b   :  { %v5991_v37 = vsub.f32 1.5, %v5990_v43  ;;  %v6026_v1 = vadd.f32 %v9641_v3, %v6014_v60  ;;  %v6046_v26 = vmul.f32 %v9420_v30, %v5764_v55  ;;  %vm6037_vm11 = vcmp.ge.f32.partialorder %v5764_v55, 0.0 }
0x193d   :  { %v5992_v42 = vmul.f32 %v6881_v49, %v5991_v37  ;;  %vm6060_vm10 = vcmp.ge.f32.partialorder %v6026_v1, 0.0  ;;  %v6068_v32 = vmul.f32 %v9420_v30, %v6026_v1  ;;  %v6054_v63 = vsel %vm6037_vm11, %v5764_v55, %v6046_v26 }
0x193f   :  { %v5996_v36 = vsel %vm5995_vm5, %v6881_v49, %v5992_v42  ;;  %v6076_v33 = vsel %vm6060_vm10, %v6026_v1, %v6068_v32 }
0x1940   :  { %v6004_v62 = vmul.f32 %v5996_v36, %v9280_v6  ;;  %v6092_v25 = vadd.f32 %v6889_v4, %v6076_v33 }
0x1942   :  { %v6016_v29 = vmul.f32 %v9646_v53, %v6004_v62  ;;  %v6100_v35 = vsel %vm55_vm0, %v6084_v16, %v6092_v25  ;;  %v6086_v53 = vadd.f32 %v6890_v21, %v6054_v63 }
0x1943   :  { %6108 = vst.msk [vmem:[%s9777_s13 + $0x28] sm:$0xff] %vm805_vm8, %v6100_v35 }
0x1944   :  { %v6028_v10 = vadd.f32 %v9641_v3, %v6016_v29 }
0x1946   :  { %vm6062_vm13 = vcmp.ge.f32.partialorder %v6028_v10, 0.0  ;;  %v6070_v9 = vmul.f32 %v9420_v30, %v6028_v10 }
0x1948   :  { %v6078_v6 = vsel %vm6062_vm13, %v6028_v10, %v6070_v9 }
0x1949   :  { %v6094_v48 = vadd.f32 %v6890_v21, %v6078_v6 }
0x194b   :  { %v6102_v18 = vsel %vm55_vm0, %v6086_v53, %v6094_v48 }
0x194c   :  { %6110 = vst.msk [vmem:[%s9777_s13 + $0x38] sm:$0xff] %vm805_vm8, %v6102_v18 }

</bundles_post_ra>
